<compile_context>
chip_gen: v5e
topology: v5e:2x2
jax: 0.10.0
libtpu: 0.0.40
codegen_flags: <defaults>
</compile_context>

<pallas_src>
import functools

import jax
import jax.numpy as jnp
from jax import lax
from jax.experimental import pallas as pl
from jax.experimental.pallas import tpu as pltpu

_EPS = 1e-5  # PyTorch BatchNorm2d default eps


# ---------------------------------------------------------------------------
# VMEM budgeting helpers
# ---------------------------------------------------------------------------
def _phys_bytes(shape, dtype):
    """Physical VMEM bytes of a buffer incl. sublane/lane padding."""
    it = jnp.dtype(dtype).itemsize
    shp = tuple(int(s) for s in shape)
    if len(shp) == 0:
        shp = (1, 1)
    elif len(shp) == 1:
        shp = (1,) + shp
    lead = 1
    for d in shp[:-2]:
        lead *= d
    sub_mult = (32 // it) if it in (1, 2, 4) else 8     # 8 f32 / 16 bf16 / 32 i8
    sub = -(-shp[-2] // sub_mult) * sub_mult
    lane = -(-shp[-1] // 128) * 128
    return lead * sub * lane * it


def _vmem_cap_bytes():
    try:
        info = pltpu.get_tpu_info()
        cap = getattr(info, "vmem_capacity_bytes", None)
        if cap:
            return int(cap)
    except Exception:
        pass
    return 64 << 20  # conservative floor (v7x per-TensorCore VMEM)


def _vmem_limit(blocks, scratches):
    """Honest per-call VMEM limit: 2x (double-buffered) pipeline blocks +
    scratch + headroom, clamped below physical capacity."""
    cap = _vmem_cap_bytes()
    need = 2 * sum(_phys_bytes(s, d) for s, d in blocks)
    need += sum(_phys_bytes(s, d) for s, d in scratches)
    need += 4 << 20  # compiler-internal scratch headroom
    return int(min(cap - (8 << 20), max(need, 16 << 20)))


# ---------------------------------------------------------------------------
# In-kernel helpers
# ---------------------------------------------------------------------------
def _zero_halo(ref):
    """Zero only the 1-element spatial halo of a (n, hp, wp, c) padded scratch.

    Done every grid step (cheap: four thin stores) so the kernel stays correct
    when the 'parallel' grid axis is sharded across TensorCores."""
    n, hp, wp, c = ref.shape
    dt = ref.dtype
    ref[:, 0:1, :, :] = jnp.zeros((n, 1, wp, c), dt)
    ref[:, hp - 1:hp, :, :] = jnp.zeros((n, 1, wp, c), dt)
    ref[:, :, 0:1, :] = jnp.zeros((n, hp, 1, c), dt)
    ref[:, :, wp - 1:wp, :] = jnp.zeros((n, hp, 1, c), dt)


def _im2col(ref, stride, ho, wo):
    """3x3 im2col from a zero-padded (n, hp, wp, c) bf16 scratch ref.

    Returns an (n*ho*wo, 9*c) bf16 operand: one fat-K MXU dot instead of nine
    thin K=c dots.  Taps are read straight from the ref (no whole-slab vreg
    residency, no extra cast since the scratch is already bf16)."""
    n, _, _, c = ref.shape
    cols = []
    for kh in range(3):
        for kw in range(3):
            if stride == 1:
                p = ref[:, kh:kh + ho, kw:kw + wo, :]
            else:
                # TODO(synk): push the stride into the DMA/index_map instead
                # of a value-level strided slice (untested downsampling path).
                v = ref[:, kh:kh + stride * (ho - 1) + 1,
                        kw:kw + stride * (wo - 1) + 1, :]
                v = lax.slice_in_dim(v, 0, stride * (ho - 1) + 1, stride, axis=1)
                v = lax.slice_in_dim(v, 0, stride * (wo - 1) + 1, stride, axis=2)
                p = v
            cols.append(p)
    patch = jnp.concatenate(cols, axis=-1)            # (n, ho, wo, 9c) bf16
    return patch.reshape(n * ho * wo, 9 * c)


def _tile_stats(y):
    """Per-tile per-column [sum, sum-of-squares] of an (rows, C) f32 value."""
    s = jnp.sum(y, axis=0, keepdims=True)
    ss = jnp.sum(y * y, axis=0, keepdims=True)
    return jnp.concatenate([s, ss], axis=0)[None]     # (1, 2, C)


# ---------------------------------------------------------------------------
# Stage 1: relu + conv1 of both branches (+ fused 1x1 shortcut) + BN1 partials
# ---------------------------------------------------------------------------
def _conv1_kernel(x_ref, w1_ref, *refs, stride, cout, has_sc):
    if has_sc:
        y1b_ref, y1s_ref, st_ref, xpad_ref = refs
    else:
        y1b_ref, st_ref, xpad_ref = refs
        y1s_ref = None
    tn, H, W, _ = x_ref.shape
    _, Ho, Wo, _ = y1b_ref.shape
    C = cout

    # relu(x) into a zero-padded bf16 scratch; only the halo is zeroed.
    _zero_halo(xpad_ref)
    xpad_ref[:, 1:H + 1, 1:W + 1, :] = jnp.maximum(x_ref[...], 0)

    # conv1 of both branches (+ both 1x1 shortcut convs): ONE fat-K dot.
    p1 = _im2col(xpad_ref, stride, Ho, Wo)                     # (rows, 9*Cin)
    y1 = jnp.dot(p1, w1_ref[...], preferred_element_type=jnp.float32)

    # per-tile BN statistics (folded into scale/shift by the host wrapper)
    st_ref[...] = _tile_stats(y1)

    yb = y1[:, :2 * C] if has_sc else y1
    y1b_ref[...] = yb.reshape(tn, Ho, Wo, 2 * C)
    if has_sc:
        # retire the shortcut columns immediately into their own slab
        y1s_ref[...] = y1[:, 2 * C:].reshape(tn, Ho, Wo, C)


# ---------------------------------------------------------------------------
# Stage 2: BN1 + relu + conv2 of both branches + BN2 partials
# ---------------------------------------------------------------------------
def _conv2_kernel(y1_ref, s1_ref, t1_ref, w2_ref, y2_ref, st_ref, pad2_ref):
    tn, Ho, Wo, C2 = y1_ref.shape

    # BN1 scale/shift + relu in f32; cast only at the bf16 scratch store.
    act = jnp.maximum(y1_ref[...] * s1_ref[...] + t1_ref[...], 0.0)
    _zero_halo(pad2_ref)
    pad2_ref[:, 1:Ho + 1, 1:Wo + 1, :] = act.astype(pad2_ref.dtype)

    # conv2 of both branches: ONE block-diagonal dot (K = 18C, Nout = 2C).
    p2 = _im2col(pad2_ref, 1, Ho, Wo)
    y2 = jnp.dot(p2, w2_ref[...], preferred_element_type=jnp.float32)

    st_ref[...] = _tile_stats(y2)
    y2_ref[...] = y2.reshape(tn, Ho, Wo, C2)


# ---------------------------------------------------------------------------
# Stage 3: BN2 + shake combine + shortcut add, lane-dense output slab
# ---------------------------------------------------------------------------
def _combine_kernel(y2_ref, h0_ref, s2_ref, t2_ref, hs_ref, ht_ref, a_ref,
                    out_ref, *, cout):
    tn, Ho, Wo, _ = y2_ref.shape
    C = cout

    y2 = y2_ref[...] * s2_ref[...] + t2_ref[...]               # BN2 (f32)
    h1 = y2[..., :C]
    h2 = y2[..., C:]
    a = a_ref[...]                                             # (tn,1,1,1)
    h = h2 + a * (h1 - h2)                                     # shake combine

    # identity: hs=1, ht=0; shortcut: BN scale/shift of the fused 1x1 convs.
    h0 = h0_ref[...].astype(jnp.float32) * hs_ref[...] + ht_ref[...]

    # lane-dense store: last dim Wo*C (multiple of 128 for shake-resnet shapes)
    out_ref[...] = (h + h0).reshape(tn, Ho, Wo * C).astype(out_ref.dtype)


# ---------------------------------------------------------------------------
# Parameter fusion + BN stat folding (host side, tiny)
# ---------------------------------------------------------------------------
def _fuse_params(params, in_ch):
    """Pre-fold conv weights into the fused-matmul layout (bf16 MXU operands)."""
    wa1, ga1, ba1, wb1, gb1, bb1 = params["b1"]
    wa2, ga2, ba2, wb2, gb2, bb2 = params["b2"]
    C = wa1.shape[3]
    Ci = in_ch

    w1_cols = [wa1.reshape(9 * Ci, C), wa2.reshape(9 * Ci, C)]
    g1_cols = [ga1, ga2]
    b1_cols = [ba1, ba2]
    if "sc" in params:
        ws1, ws2, gs, bs = params["sc"]
        # The 1x1 shortcut convs ride along as extra conv1 output columns:
        # conv1 tap (1,1) equals avg_pool(relu(x),1,stride) and tap (2,2)
        # equals the (-1,+1)-shifted/zero-padded variant.
        sc = jnp.zeros((9 * Ci, C), jnp.float32)
        sc = sc.at[4 * Ci:5 * Ci, :C // 2].set(ws1)
        sc = sc.at[8 * Ci:9 * Ci, C // 2:].set(ws2)
        w1_cols.append(sc)
        g1_cols.append(gs)
        b1_cols.append(bs)
    w1 = jnp.concatenate(w1_cols, axis=1).astype(jnp.bfloat16)
    g1 = jnp.concatenate(g1_cols, axis=1).astype(jnp.float32)
    b1 = jnp.concatenate(b1_cols, axis=1).astype(jnp.float32)

    # conv2 of both branches as one block-diagonal weight (K = 18C, Nout = 2C).
    w2blk = jnp.zeros((9, 2 * C, 2 * C), jnp.float32)
    w2blk = w2blk.at[:, :C, :C].set(wb1.reshape(9, C, C))
    w2blk = w2blk.at[:, C:, C:].set(wb2.reshape(9, C, C))
    w2 = w2blk.reshape(18 * C, 2 * C).astype(jnp.bfloat16)
    g2 = jnp.concatenate([gb1, gb2], axis=1).astype(jnp.float32)
    b2 = jnp.concatenate([bb1, bb2], axis=1).astype(jnp.float32)
    return w1, g1, b1, w2, g2, b2


def _fold_bn(stats, gamma, beta, count):
    """Fold per-tile [sum, sumsq] partials + BN affine into scale/shift."""
    s = jnp.sum(stats[:, 0, :], axis=0)
    ss = jnp.sum(stats[:, 1, :], axis=0)
    mean = s / count
    # one-pass variance, clamped at 0 to guard against cancellation -> NaN
    var = jnp.maximum(ss / count - mean * mean, 0.0)
    scale = gamma.reshape(-1) * lax.rsqrt(var + _EPS)
    shift = beta.reshape(-1) - mean * scale
    return scale.reshape(1, -1), shift.reshape(1, -1)


# ---------------------------------------------------------------------------
# Public forward
# ---------------------------------------------------------------------------
@functools.partial(jax.jit, static_argnames=("stride", "tile_n"))
def shake_block_forward(x_nchw, params, alpha, *, stride=1, tile_n=None):
    """Fused Pallas forward.  x_nchw: (N, Cin, H, W) f32; alpha: (N,) f32."""
    N, Cin, H, W = x_nchw.shape
    C = params["b1"][0].shape[3]
    equal_io = (Cin == C)
    if equal_io:
        assert stride == 1, "identity shortcut requires stride == 1"
    Ho = (H - 1) // stride + 1
    Wo = (W - 1) // stride + 1

    if tile_n is None:
        # target >= ~256 matmul rows per grid step, but stay a divisor of N
        cap_tiles = max(1, min(N, -(-256 // (Ho * Wo))))
        tile_n = max(d for d in range(1, cap_tiles + 1) if N % d == 0)
    assert N % tile_n == 0, "tile_n must divide the batch size"
    T = N // tile_n

    # NHWC bf16 input (halves input DMA); all BN / combine math stays f32.
    x = jnp.transpose(x_nchw, (0, 2, 3, 1)).astype(jnp.bfloat16)
    alpha4 = alpha.reshape(N, 1, 1, 1).astype(jnp.float32)
    w1, g1, b1, w2, g2, b2 = _fuse_params(params, Cin)
    CC1 = w1.shape[1]                      # 2C (identity) or 3C (with shortcut)
    count = N * Ho * Wo                    # BN reduction count per channel

    # ---------------- stage 1: conv1 (+ shortcut) + BN1 partials -----------
    out_shape1 = [jax.ShapeDtypeStruct((N, Ho, Wo, 2 * C), jnp.float32)]
    out_spec1 = [pl.BlockSpec((tile_n, Ho, Wo, 2 * C), lambda i: (i, 0, 0, 0))]
    if not equal_io:
        out_shape1.append(jax.ShapeDtypeStruct((N, Ho, Wo, C), jnp.float32))
        out_spec1.append(pl.BlockSpec((tile_n, Ho, Wo, C), lambda i: (i, 0, 0, 0)))
    out_shape1.append(jax.ShapeDtypeStruct((T, 2, CC1), jnp.float32))
    out_spec1.append(pl.BlockSpec((1, 2, CC1), lambda i: (i, 0, 0)))

    blocks1 = [((tile_n, H, W, Cin), jnp.bfloat16),
               ((9 * Cin, CC1), jnp.bfloat16),
               ((tile_n, Ho, Wo, 2 * C), jnp.float32),
               ((1, 2, CC1), jnp.float32)]
    if not equal_io:
        blocks1.append(((tile_n, Ho, Wo, C), jnp.float32))
    vmem1 = _vmem_limit(blocks1, [((tile_n, H + 2, W + 2, Cin), jnp.bfloat16)])

    res1 = pl.pallas_call(
        functools.partial(_conv1_kernel, stride=stride, cout=C,
                          has_sc=not equal_io),
        out_shape=tuple(out_shape1),
        grid_spec=pltpu.PrefetchScalarGridSpec(
            num_scalar_prefetch=0,
            grid=(T,),
            in_specs=[pl.BlockSpec((tile_n, H, W, Cin), lambda i: (i, 0, 0, 0)),
                      pl.BlockSpec((9 * Cin, CC1), lambda i: (0, 0))],
            out_specs=out_spec1,
            scratch_shapes=[pltpu.VMEM((tile_n, H + 2, W + 2, Cin),
                                       jnp.bfloat16)],
        ),
        compiler_params=pltpu.CompilerParams(
            dimension_semantics=("parallel",), vmem_limit_bytes=vmem1),
    )(x, w1)
    if equal_io:
        y1b, st1 = res1
        y1s = None
    else:
        y1b, y1s, st1 = res1

    s1, t1 = _fold_bn(st1, g1, b1, count)          # two-phase BN, phase fold
    s1b, t1b = s1[:, :2 * C], t1[:, :2 * C]

    # ---------------- stage 2: BN1+relu, conv2, BN2 partials ---------------
    blocks2 = [((tile_n, Ho, Wo, 2 * C), jnp.float32),
               ((1, 2 * C), jnp.float32), ((1, 2 * C), jnp.float32),
               ((18 * C, 2 * C), jnp.bfloat16),
               ((tile_n, Ho, Wo, 2 * C), jnp.float32),
               ((1, 2, 2 * C), jnp.float32)]
    vmem2 = _vmem_limit(blocks2,
                        [((tile_n, Ho + 2, Wo + 2, 2 * C), jnp.bfloat16)])

    y2, st2 = pl.pallas_call(
        _conv2_kernel,
        out_shape=(jax.ShapeDtypeStruct((N, Ho, Wo, 2 * C), jnp.float32),
                   jax.ShapeDtypeStruct((T, 2, 2 * C), jnp.float32)),
        grid_spec=pltpu.PrefetchScalarGridSpec(
            num_scalar_prefetch=0,
            grid=(T,),
            in_specs=[pl.BlockSpec((tile_n, Ho, Wo, 2 * C), lambda i: (i, 0, 0, 0)),
                      pl.BlockSpec((1, 2 * C), lambda i: (0, 0)),
                      pl.BlockSpec((1, 2 * C), lambda i: (0, 0)),
                      pl.BlockSpec((18 * C, 2 * C), lambda i: (0, 0))],
            out_specs=[pl.BlockSpec((tile_n, Ho, Wo, 2 * C), lambda i: (i, 0, 0, 0)),
                       pl.BlockSpec((1, 2, 2 * C), lambda i: (i, 0, 0))],
            scratch_shapes=[pltpu.VMEM((tile_n, Ho + 2, Wo + 2, 2 * C),
                                       jnp.bfloat16)],
        ),
        compiler_params=pltpu.CompilerParams(
            dimension_semantics=("parallel",), vmem_limit_bytes=vmem2),
    )(y1b, s1b, t1b, w2)

    s2, t2 = _fold_bn(st2, g2, b2, count)

    # ---------------- stage 3: BN2 + shake + shortcut add ------------------
    if equal_io:
        h0_src = x                                   # raw x (identity shortcut)
        hs = jnp.ones((1, C), jnp.float32)
        ht = jnp.zeros((1, C), jnp.float32)
    else:
        h0_src = y1s                                 # fused 1x1-shortcut output
        hs, ht = s1[:, 2 * C:], t1[:, 2 * C:]

    blocks3 = [((tile_n, Ho, Wo, 2 * C), jnp.float32),
               ((tile_n, Ho, Wo, C), h0_src.dtype),
               ((1, 2 * C), jnp.float32), ((1, 2 * C), jnp.float32),
               ((1, C), jnp.float32), ((1, C), jnp.float32),
               ((tile_n, 1, 1, 1), jnp.float32),
               ((tile_n, Ho, Wo * C), jnp.float32)]
    vmem3 = _vmem_limit(blocks3, [])

    out = pl.pallas_call(
        functools.partial(_combine_kernel, cout=C),
        out_shape=jax.ShapeDtypeStruct((N, Ho, Wo * C), jnp.float32),
        grid_spec=pltpu.PrefetchScalarGridSpec(
            num_scalar_prefetch=0,
            grid=(T,),
            in_specs=[pl.BlockSpec((tile_n, Ho, Wo, 2 * C), lambda i: (i, 0, 0, 0)),
                      pl.BlockSpec((tile_n, Ho, Wo, C), lambda i: (i, 0, 0, 0)),
                      pl.BlockSpec((1, 2 * C), lambda i: (0, 0)),
                      pl.BlockSpec((1, 2 * C), lambda i: (0, 0)),
                      pl.BlockSpec((1, C), lambda i: (0, 0)),
                      pl.BlockSpec((1, C), lambda i: (0, 0)),
                      pl.BlockSpec((tile_n, 1, 1, 1), lambda i: (i, 0, 0, 0))],
            out_specs=pl.BlockSpec((tile_n, Ho, Wo * C), lambda i: (i, 0, 0)),
        ),
        compiler_params=pltpu.CompilerParams(
            dimension_semantics=("parallel",), vmem_limit_bytes=vmem3),
    )(y2, h0_src, s2, t2, hs, ht, alpha4)

    # NCHW to match the PyTorch module.  Drop this transpose (or fuse it into
    # the next op) if the consumer accepts NHWC / the lane-dense slab.
    out = out.reshape(N, Ho, Wo, C)
    return jnp.transpose(out, (0, 3, 1, 2))


# ---------------------------------------------------------------------------
# Synthetic parameters + pure-JAX reference
# ---------------------------------------------------------------------------
def init_params(key, in_ch, out_ch):
    """Deterministic synthetic parameters (conv weights directly in HWIO)."""
    keys = iter(jax.random.split(key, 32))

    def conv_w(shape):
        fan_in = shape[0] * shape[1] * shape[2]
        return (jax.random.normal(next(keys), shape, jnp.float32)
                / jnp.sqrt(float(fan_in)))

    def bn(c):
        g = 1.0 + 0.1 * jax.random.normal(next(keys), (1, c), jnp.float32)
        b = 0.1 * jax.random.normal(next(keys), (1, c), jnp.float32)
        return g, b

    p = {}
    for name in ("b1", "b2"):
        wa = conv_w((3, 3, in_ch, out_ch))
        ga, ba = bn(out_ch)
        wb = conv_w((3, 3, out_ch, out_ch))
        gb, bb = bn(out_ch)
        p[name] = (wa, ga, ba, wb, gb, bb)
    if in_ch != out_ch:
        ws1 = conv_w((1, 1, in_ch, out_ch // 2)).reshape(in_ch, out_ch // 2)
        ws2 = conv_w((1, 1, in_ch, out_ch // 2)).reshape(in_ch, out_ch // 2)
        gs, bs = bn(out_ch)
        p["sc"] = (ws1, ws2, gs, bs)
    return p


def reference_forward(x_nchw, params, alpha, *, stride=1):
    """Pure-JAX reference mirroring the PyTorch module (training forward, f32)."""
    N, Cin, H, W = x_nchw.shape
    Cout = params["b1"][0].shape[3]
    equal_io = (Cin == Cout)
    x = jnp.transpose(x_nchw, (0, 2, 3, 1)).astype(jnp.float32)

    def conv(h, w, s):
        return lax.conv_general_dilated(
            h, w, (s, s), ((1, 1), (1, 1)),
            dimension_numbers=("NHWC", "HWIO", "NHWC"),
            precision=lax.Precision.HIGHEST)

    def bn(h, g, b):
        m = jnp.mean(h, axis=(0, 1, 2))
        v = jnp.mean((h - m) ** 2, axis=(0, 1, 2))
        return (h - m) * lax.rsqrt(v + _EPS) * g.reshape(-1) + b.reshape(-1)

    def branch(wa, ga, ba, wb, gb, bb):
        h = jnp.maximum(x, 0.0)
        h = conv(h, wa, stride)
        h = jnp.maximum(bn(h, ga, ba), 0.0)
        h = conv(h, wb, 1)
        return bn(h, gb, bb)

    h1 = branch(*params["b1"])
    h2 = branch(*params["b2"])
    a = alpha.reshape(N, 1, 1, 1)
    h = a * h1 + (1.0 - a) * h2

    if equal_io:
        h0 = x
    else:
        ws1, ws2, gs, bs = params["sc"]
        hr = jnp.maximum(x, 0.0)
        p1 = hr[:, ::stride, ::stride, :]
        shifted = jnp.pad(hr[:, 1:, 1:, :], ((0, 0), (0, 1), (0, 1), (0, 0)))
        p2 = shifted[:, ::stride, ::stride, :]
        c1 = jnp.einsum("nhwc,cd->nhwd", p1, ws1, precision=lax.Precision.HIGHEST)
        c2 = jnp.einsum("nhwc,cd->nhwd", p2, ws2, precision=lax.Precision.HIGHEST)
        h0 = bn(jnp.concatenate([c1, c2], axis=-1), gs, bs)

    return jnp.transpose(h + h0, (0, 3, 1, 2))


if __name__ == "__main__":
    root = jax.random.PRNGKey(0)
    N, H, W = 2, 8, 8
    configs = [
        dict(name="equal_io", in_ch=16, out_ch=16, stride=1, tile_n=1),
        dict(name="shortcut", in_ch=8, out_ch=16, stride=1, tile_n=1),
        dict(name="equal_io_single_tile", in_ch=16, out_ch=16, stride=1,
             tile_n=None),
    ]

    for idx, cfg in enumerate(configs):
        key = jax.random.fold_in(root, idx)
        kx, kp, ka = jax.random.split(key, 3)
        x = jax.random.normal(kx, (N, cfg["in_ch"], H, W), jnp.float32)
        params = init_params(kp, cfg["in_ch"], cfg["out_ch"])
        # ShakeShake training-mode alpha ~ U[0,1) per sample (deterministic here)
        alpha = jax.random.uniform(ka, (N,), jnp.float32)

        y_kernel = jax.block_until_ready(
            shake_block_forward(x, params, alpha, stride=cfg["stride"],
                                tile_n=cfg["tile_n"]))
        y_ref = reference_forward(x, params, alpha, stride=cfg["stride"])

        assert y_kernel.shape == y_ref.shape, (cfg["name"], y_kernel.shape,
                                               y_ref.shape)
        err = float(jnp.max(jnp.abs(y_kernel - y_ref)))
        # bf16 MXU operands / bf16 input vs f32 HIGHEST reference.
        assert err < 5e-2, f"{cfg['name']}: max abs err {err}"

    print("KERNEL_OK")
</pallas_src>

<mosaic_0001>
module attributes {stable_mosaic.version = 11 : i64} {
  func.func @_conv1_kernel(%arg0: i32, %arg1: memref<1x8x8x16xbf16, #tpu.memory_space<vmem>>, %arg2: memref<144x32xbf16, #tpu.memory_space<vmem>>, %arg3: memref<1x8x8x32xf32, #tpu.memory_space<vmem>>, %arg4: memref<1x2x32xf32, #tpu.memory_space<vmem>>, %arg5: memref<1x10x10x16xbf16, #tpu.memory_space<vmem>>) attributes {dimension_semantics = [#tpu.dimension_semantics<parallel>], iteration_bounds = array<i64: 2>, scalar_prefetch = 0 : i64, scratch_operands = 1 : i64, tpu.core_type = #tpu.core_type<tc>, window_params = [{transform_indices = @transform_0, window_bounds = array<i64: 1, 8, 8, 16>}, {pipeline_mode = #tpu.pipeline_mode<synchronous>, transform_indices = @transform_1, window_bounds = array<i64: 144, 32>}, {transform_indices = @transform_2, window_bounds = array<i64: 1, 8, 8, 32>}, {transform_indices = @transform_3, window_bounds = array<i64: 1, 2, 32>}]} {
    %cst = arith.constant 0.000000e+00 : bf16
    %0 = vector.broadcast %cst : bf16 to vector<1x1x10x16xbf16>
    %c0 = arith.constant 0 : index
    %c0_0 = arith.constant 0 : index
    %c0_1 = arith.constant 0 : index
    %c0_2 = arith.constant 0 : index
    %1 = vector.load %arg5[%c0, %c0_0, %c0_1, %c0_2] : memref<1x10x10x16xbf16, #tpu.memory_space<vmem>>, vector<1x1x10x16xbf16>
    tpu.vector_store %arg5[%c0, %c0_0, %c0_1, %c0_2], %0 {strides = array<i32>} : memref<1x10x10x16xbf16, #tpu.memory_space<vmem>>, vector<1x1x10x16xbf16>,
    %cst_3 = arith.constant 0.000000e+00 : bf16
    %2 = vector.broadcast %cst_3 : bf16 to vector<1x1x10x16xbf16>
    %c0_4 = arith.constant 0 : index
    %c9 = arith.constant 9 : index
    %c0_5 = arith.constant 0 : index
    %c0_6 = arith.constant 0 : index
    %3 = vector.load %arg5[%c0_4, %c9, %c0_5, %c0_6] : memref<1x10x10x16xbf16, #tpu.memory_space<vmem>>, vector<1x1x10x16xbf16>
    tpu.vector_store %arg5[%c0_4, %c9, %c0_5, %c0_6], %2 {strides = array<i32>} : memref<1x10x10x16xbf16, #tpu.memory_space<vmem>>, vector<1x1x10x16xbf16>,
    %cst_7 = arith.constant 0.000000e+00 : bf16
    %4 = vector.broadcast %cst_7 : bf16 to vector<1x10x1x16xbf16>
    %c0_8 = arith.constant 0 : index
    %c0_9 = arith.constant 0 : index
    %c0_10 = arith.constant 0 : index
    %c0_11 = arith.constant 0 : index
    %5 = vector.load %arg5[%c0_8, %c0_9, %c0_10, %c0_11] : memref<1x10x10x16xbf16, #tpu.memory_space<vmem>>, vector<1x10x1x16xbf16>
    tpu.vector_store %arg5[%c0_8, %c0_9, %c0_10, %c0_11], %4 {strides = array<i32>} : memref<1x10x10x16xbf16, #tpu.memory_space<vmem>>, vector<1x10x1x16xbf16>,
    %cst_12 = arith.constant 0.000000e+00 : bf16
    %6 = vector.broadcast %cst_12 : bf16 to vector<1x10x1x16xbf16>
    %c0_13 = arith.constant 0 : index
    %c0_14 = arith.constant 0 : index
    %c9_15 = arith.constant 9 : index
    %c0_16 = arith.constant 0 : index
    %7 = vector.load %arg5[%c0_13, %c0_14, %c9_15, %c0_16] : memref<1x10x10x16xbf16, #tpu.memory_space<vmem>>, vector<1x10x1x16xbf16>
    tpu.vector_store %arg5[%c0_13, %c0_14, %c9_15, %c0_16], %6 {strides = array<i32>} : memref<1x10x10x16xbf16, #tpu.memory_space<vmem>>, vector<1x10x1x16xbf16>,
    %c0_17 = arith.constant 0 : index
    %c0_18 = arith.constant 0 : index
    %c0_19 = arith.constant 0 : index
    %c0_20 = arith.constant 0 : index
    %8 = vector.load %arg1[%c0_17, %c0_18, %c0_19, %c0_20] : memref<1x8x8x16xbf16, #tpu.memory_space<vmem>>, vector<1x8x8x16xbf16>
    %cst_21 = arith.constant 0.000000e+00 : bf16
    %9 = vector.broadcast %cst_21 : bf16 to vector<1x8x8x16xbf16>
    %10 = arith.maximumf %8, %9 : vector<1x8x8x16xbf16>
    %c0_22 = arith.constant 0 : index
    %c1 = arith.constant 1 : index
    %c1_23 = arith.constant 1 : index
    %c0_24 = arith.constant 0 : index
    %11 = vector.load %arg5[%c0_22, %c1, %c1_23, %c0_24] : memref<1x10x10x16xbf16, #tpu.memory_space<vmem>>, vector<1x8x8x16xbf16>
    tpu.vector_store %arg5[%c0_22, %c1, %c1_23, %c0_24], %10 {strides = array<i32>} : memref<1x10x10x16xbf16, #tpu.memory_space<vmem>>, vector<1x8x8x16xbf16>,
    %c0_25 = arith.constant 0 : index
    %c0_26 = arith.constant 0 : index
    %c0_27 = arith.constant 0 : index
    %c0_28 = arith.constant 0 : index
    %12 = vector.load %arg5[%c0_25, %c0_26, %c0_27, %c0_28] : memref<1x10x10x16xbf16, #tpu.memory_space<vmem>>, vector<1x8x8x16xbf16>
    %c0_29 = arith.constant 0 : index
    %c0_30 = arith.constant 0 : index
    %c1_31 = arith.constant 1 : index
    %c0_32 = arith.constant 0 : index
    %13 = vector.load %arg5[%c0_29, %c0_30, %c1_31, %c0_32] : memref<1x10x10x16xbf16, #tpu.memory_space<vmem>>, vector<1x8x8x16xbf16>
    %c0_33 = arith.constant 0 : index
    %c0_34 = arith.constant 0 : index
    %c2 = arith.constant 2 : index
    %c0_35 = arith.constant 0 : index
    %14 = vector.load %arg5[%c0_33, %c0_34, %c2, %c0_35] : memref<1x10x10x16xbf16, #tpu.memory_space<vmem>>, vector<1x8x8x16xbf16>
    %c0_36 = arith.constant 0 : index
    %c1_37 = arith.constant 1 : index
    %c0_38 = arith.constant 0 : index
    %c0_39 = arith.constant 0 : index
    %15 = vector.load %arg5[%c0_36, %c1_37, %c0_38, %c0_39] : memref<1x10x10x16xbf16, #tpu.memory_space<vmem>>, vector<1x8x8x16xbf16>
    %c0_40 = arith.constant 0 : index
    %c1_41 = arith.constant 1 : index
    %c1_42 = arith.constant 1 : index
    %c0_43 = arith.constant 0 : index
    %16 = vector.load %arg5[%c0_40, %c1_41, %c1_42, %c0_43] : memref<1x10x10x16xbf16, #tpu.memory_space<vmem>>, vector<1x8x8x16xbf16>
    %c0_44 = arith.constant 0 : index
    %c1_45 = arith.constant 1 : index
    %c2_46 = arith.constant 2 : index
    %c0_47 = arith.constant 0 : index
    %17 = vector.load %arg5[%c0_44, %c1_45, %c2_46, %c0_47] : memref<1x10x10x16xbf16, #tpu.memory_space<vmem>>, vector<1x8x8x16xbf16>
    %c0_48 = arith.constant 0 : index
    %c2_49 = arith.constant 2 : index
    %c0_50 = arith.constant 0 : index
    %c0_51 = arith.constant 0 : index
    %18 = vector.load %arg5[%c0_48, %c2_49, %c0_50, %c0_51] : memref<1x10x10x16xbf16, #tpu.memory_space<vmem>>, vector<1x8x8x16xbf16>
    %c0_52 = arith.constant 0 : index
    %c2_53 = arith.constant 2 : index
    %c1_54 = arith.constant 1 : index
    %c0_55 = arith.constant 0 : index
    %19 = vector.load %arg5[%c0_52, %c2_53, %c1_54, %c0_55] : memref<1x10x10x16xbf16, #tpu.memory_space<vmem>>, vector<1x8x8x16xbf16>
    %c0_56 = arith.constant 0 : index
    %c2_57 = arith.constant 2 : index
    %c2_58 = arith.constant 2 : index
    %c0_59 = arith.constant 0 : index
    %20 = vector.load %arg5[%c0_56, %c2_57, %c2_58, %c0_59] : memref<1x10x10x16xbf16, #tpu.memory_space<vmem>>, vector<1x8x8x16xbf16>
    %21 = tpu.concatenate %12, %13, %14, %15, %16, %17, %18, %19, %20 in 3 : vector<1x8x8x16xbf16>, vector<1x8x8x16xbf16>, vector<1x8x8x16xbf16>, vector<1x8x8x16xbf16>, vector<1x8x8x16xbf16>, vector<1x8x8x16xbf16>, vector<1x8x8x16xbf16>, vector<1x8x8x16xbf16>, vector<1x8x8x16xbf16> -> vector<1x8x8x144xbf16>
    %22 = vector.shape_cast %21 : vector<1x8x8x144xbf16> to vector<64x144xbf16>
    %c0_60 = arith.constant 0 : index
    %c0_61 = arith.constant 0 : index
    %23 = vector.load %arg2[%c0_60, %c0_61] : memref<144x32xbf16, #tpu.memory_space<vmem>>, vector<144x32xbf16>
    %cst_62 = arith.constant dense<0.000000e+00> : vector<64x32xf32>
    %24 = tpu.matmul %22, %23, %cst_62 {dimension_numbers = #tpu.dot_dimension_numbers<[1], [0], [0], [1], [0, 0, 1, 1], [], []>} : vector<64x144xbf16>, vector<144x32xbf16>, vector<64x32xf32> -> vector<64x32xf32>
    %cst_63 = arith.constant dense<0.000000e+00> : vector<32xf32>
    %25 = vector.multi_reduction <add>, %24, %cst_63 [0] : vector<64x32xf32> to vector<32xf32>
    %26 = vector.shape_cast %25 : vector<32xf32> to vector<1x32xf32>
    %27 = arith.mulf %24, %24 : vector<64x32xf32>
    %cst_64 = arith.constant dense<0.000000e+00> : vector<32xf32>
    %28 = vector.multi_reduction <add>, %27, %cst_64 [0] : vector<64x32xf32> to vector<32xf32>
    %29 = vector.shape_cast %28 : vector<32xf32> to vector<1x32xf32>
    %30 = tpu.concatenate %26, %29 in 0 : vector<1x32xf32>, vector<1x32xf32> -> vector<2x32xf32>
    %31 = vector.shape_cast %30 : vector<2x32xf32> to vector<1x2x32xf32>
    %c0_65 = arith.constant 0 : index
    %c0_66 = arith.constant 0 : index
    %c0_67 = arith.constant 0 : index
    %32 = vector.load %arg4[%c0_65, %c0_66, %c0_67] : memref<1x2x32xf32, #tpu.memory_space<vmem>>, vector<1x2x32xf32>
    tpu.vector_store %arg4[%c0_65, %c0_66, %c0_67], %31 {strides = array<i32>} : memref<1x2x32xf32, #tpu.memory_space<vmem>>, vector<1x2x32xf32>,
    %33 = vector.shape_cast %24 : vector<64x32xf32> to vector<1x8x8x32xf32>
    %c0_68 = arith.constant 0 : index
    %c0_69 = arith.constant 0 : index
    %c0_70 = arith.constant 0 : index
    %c0_71 = arith.constant 0 : index
    %34 = vector.load %arg3[%c0_68, %c0_69, %c0_70, %c0_71] : memref<1x8x8x32xf32, #tpu.memory_space<vmem>>, vector<1x8x8x32xf32>
    tpu.vector_store %arg3[%c0_68, %c0_69, %c0_70, %c0_71], %33 {strides = array<i32>} : memref<1x8x8x32xf32, #tpu.memory_space<vmem>>, vector<1x8x8x32xf32>,
    return
  }
  func.func @transform_0(%arg0: i32) -> (i32, i32, i32, i32) {
    %c0_i32 = arith.constant 0 : i32
    %c0_i32_0 = arith.constant 0 : i32
    %c0_i32_1 = arith.constant 0 : i32
    %c0_i32_2 = arith.constant 0 : i32
    return %arg0, %c0_i32, %c0_i32_0, %c0_i32_1 : i32, i32, i32, i32
  }
  func.func @transform_1(%arg0: i32) -> (i32, i32) {
    %c0_i32 = arith.constant 0 : i32
    %c0_i32_0 = arith.constant 0 : i32
    %c0_i32_1 = arith.constant 0 : i32
    return %c0_i32, %c0_i32_0 : i32, i32
  }
  func.func @transform_2(%arg0: i32) -> (i32, i32, i32, i32) {
    %c0_i32 = arith.constant 0 : i32
    %c0_i32_0 = arith.constant 0 : i32
    %c0_i32_1 = arith.constant 0 : i32
    %c0_i32_2 = arith.constant 0 : i32
    return %arg0, %c0_i32, %c0_i32_0, %c0_i32_1 : i32, i32, i32, i32
  }
  func.func @transform_3(%arg0: i32) -> (i32, i32, i32) {
    %c0_i32 = arith.constant 0 : i32
    %c0_i32_0 = arith.constant 0 : i32
    %c0_i32_1 = arith.constant 0 : i32
    return %arg0, %c0_i32, %c0_i32_0 : i32, i32, i32
  }
}

module attributes {stable_mosaic.version = 11 : i64} {
  func.func @_conv2_kernel(%arg0: i32, %arg1: memref<1x8x8x32xf32, #tpu.memory_space<vmem>>, %arg2: memref<1x32xf32, #tpu.memory_space<vmem>>, %arg3: memref<1x32xf32, #tpu.memory_space<vmem>>, %arg4: memref<288x32xbf16, #tpu.memory_space<vmem>>, %arg5: memref<1x8x8x32xf32, #tpu.memory_space<vmem>>, %arg6: memref<1x2x32xf32, #tpu.memory_space<vmem>>, %arg7: memref<1x10x10x32xbf16, #tpu.memory_space<vmem>>) attributes {dimension_semantics = [#tpu.dimension_semantics<parallel>], iteration_bounds = array<i64: 2>, scalar_prefetch = 0 : i64, scratch_operands = 1 : i64, tpu.core_type = #tpu.core_type<tc>, window_params = [{transform_indices = @transform_0, window_bounds = array<i64: 1, 8, 8, 32>}, {pipeline_mode = #tpu.pipeline_mode<synchronous>, transform_indices = @transform_1, window_bounds = array<i64: 1, 32>}, {pipeline_mode = #tpu.pipeline_mode<synchronous>, transform_indices = @transform_2, window_bounds = array<i64: 1, 32>}, {pipeline_mode = #tpu.pipeline_mode<synchronous>, transform_indices = @transform_3, window_bounds = array<i64: 288, 32>}, {transform_indices = @transform_4, window_bounds = array<i64: 1, 8, 8, 32>}, {transform_indices = @transform_5, window_bounds = array<i64: 1, 2, 32>}]} {
    %c0 = arith.constant 0 : index
    %c0_0 = arith.constant 0 : index
    %c0_1 = arith.constant 0 : index
    %c0_2 = arith.constant 0 : index
    %0 = vector.load %arg1[%c0, %c0_0, %c0_1, %c0_2] : memref<1x8x8x32xf32, #tpu.memory_space<vmem>>, vector<1x8x8x32xf32>
    %c0_3 = arith.constant 0 : index
    %c0_4 = arith.constant 0 : index
    %1 = vector.load %arg2[%c0_3, %c0_4] : memref<1x32xf32, #tpu.memory_space<vmem>>, vector<1x32xf32>
    %2 = vector.shape_cast %1 : vector<1x32xf32> to vector<1x1x1x32xf32>
    %3 = vector.broadcast %2 : vector<1x1x1x32xf32> to vector<1x8x8x32xf32>
    %4 = arith.mulf %0, %3 : vector<1x8x8x32xf32>
    %c0_5 = arith.constant 0 : index
    %c0_6 = arith.constant 0 : index
    %5 = vector.load %arg3[%c0_5, %c0_6] : memref<1x32xf32, #tpu.memory_space<vmem>>, vector<1x32xf32>
    %6 = vector.shape_cast %5 : vector<1x32xf32> to vector<1x1x1x32xf32>
    %7 = vector.broadcast %6 : vector<1x1x1x32xf32> to vector<1x8x8x32xf32>
    %8 = arith.addf %4, %7 : vector<1x8x8x32xf32>
    %cst = arith.constant 0.000000e+00 : f32
    %9 = vector.broadcast %cst : f32 to vector<1x8x8x32xf32>
    %10 = arith.maximumf %8, %9 : vector<1x8x8x32xf32>
    %cst_7 = arith.constant 0.000000e+00 : bf16
    %11 = vector.broadcast %cst_7 : bf16 to vector<1x1x10x32xbf16>
    %c0_8 = arith.constant 0 : index
    %c0_9 = arith.constant 0 : index
    %c0_10 = arith.constant 0 : index
    %c0_11 = arith.constant 0 : index
    %12 = vector.load %arg7[%c0_8, %c0_9, %c0_10, %c0_11] : memref<1x10x10x32xbf16, #tpu.memory_space<vmem>>, vector<1x1x10x32xbf16>
    tpu.vector_store %arg7[%c0_8, %c0_9, %c0_10, %c0_11], %11 {strides = array<i32>} : memref<1x10x10x32xbf16, #tpu.memory_space<vmem>>, vector<1x1x10x32xbf16>,
    %cst_12 = arith.constant 0.000000e+00 : bf16
    %13 = vector.broadcast %cst_12 : bf16 to vector<1x1x10x32xbf16>
    %c0_13 = arith.constant 0 : index
    %c9 = arith.constant 9 : index
    %c0_14 = arith.constant 0 : index
    %c0_15 = arith.constant 0 : index
    %14 = vector.load %arg7[%c0_13, %c9, %c0_14, %c0_15] : memref<1x10x10x32xbf16, #tpu.memory_space<vmem>>, vector<1x1x10x32xbf16>
    tpu.vector_store %arg7[%c0_13, %c9, %c0_14, %c0_15], %13 {strides = array<i32>} : memref<1x10x10x32xbf16, #tpu.memory_space<vmem>>, vector<1x1x10x32xbf16>,
    %cst_16 = arith.constant 0.000000e+00 : bf16
    %15 = vector.broadcast %cst_16 : bf16 to vector<1x10x1x32xbf16>
    %c0_17 = arith.constant 0 : index
    %c0_18 = arith.constant 0 : index
    %c0_19 = arith.constant 0 : index
    %c0_20 = arith.constant 0 : index
    %16 = vector.load %arg7[%c0_17, %c0_18, %c0_19, %c0_20] : memref<1x10x10x32xbf16, #tpu.memory_space<vmem>>, vector<1x10x1x32xbf16>
    tpu.vector_store %arg7[%c0_17, %c0_18, %c0_19, %c0_20], %15 {strides = array<i32>} : memref<1x10x10x32xbf16, #tpu.memory_space<vmem>>, vector<1x10x1x32xbf16>,
    %cst_21 = arith.constant 0.000000e+00 : bf16
    %17 = vector.broadcast %cst_21 : bf16 to vector<1x10x1x32xbf16>
    %c0_22 = arith.constant 0 : index
    %c0_23 = arith.constant 0 : index
    %c9_24 = arith.constant 9 : index
    %c0_25 = arith.constant 0 : index
    %18 = vector.load %arg7[%c0_22, %c0_23, %c9_24, %c0_25] : memref<1x10x10x32xbf16, #tpu.memory_space<vmem>>, vector<1x10x1x32xbf16>
    tpu.vector_store %arg7[%c0_22, %c0_23, %c9_24, %c0_25], %17 {strides = array<i32>} : memref<1x10x10x32xbf16, #tpu.memory_space<vmem>>, vector<1x10x1x32xbf16>,
    %19 = arith.truncf %10 : vector<1x8x8x32xf32> to vector<1x8x8x32xbf16>
    %c0_26 = arith.constant 0 : index
    %c1 = arith.constant 1 : index
    %c1_27 = arith.constant 1 : index
    %c0_28 = arith.constant 0 : index
    %20 = vector.load %arg7[%c0_26, %c1, %c1_27, %c0_28] : memref<1x10x10x32xbf16, #tpu.memory_space<vmem>>, vector<1x8x8x32xbf16>
    tpu.vector_store %arg7[%c0_26, %c1, %c1_27, %c0_28], %19 {strides = array<i32>} : memref<1x10x10x32xbf16, #tpu.memory_space<vmem>>, vector<1x8x8x32xbf16>,
    %c0_29 = arith.constant 0 : index
    %c0_30 = arith.constant 0 : index
    %c0_31 = arith.constant 0 : index
    %c0_32 = arith.constant 0 : index
    %21 = vector.load %arg7[%c0_29, %c0_30, %c0_31, %c0_32] : memref<1x10x10x32xbf16, #tpu.memory_space<vmem>>, vector<1x8x8x32xbf16>
    %c0_33 = arith.constant 0 : index
    %c0_34 = arith.constant 0 : index
    %c1_35 = arith.constant 1 : index
    %c0_36 = arith.constant 0 : index
    %22 = vector.load %arg7[%c0_33, %c0_34, %c1_35, %c0_36] : memref<1x10x10x32xbf16, #tpu.memory_space<vmem>>, vector<1x8x8x32xbf16>
    %c0_37 = arith.constant 0 : index
    %c0_38 = arith.constant 0 : index
    %c2 = arith.constant 2 : index
    %c0_39 = arith.constant 0 : index
    %23 = vector.load %arg7[%c0_37, %c0_38, %c2, %c0_39] : memref<1x10x10x32xbf16, #tpu.memory_space<vmem>>, vector<1x8x8x32xbf16>
    %c0_40 = arith.constant 0 : index
    %c1_41 = arith.constant 1 : index
    %c0_42 = arith.constant 0 : index
    %c0_43 = arith.constant 0 : index
    %24 = vector.load %arg7[%c0_40, %c1_41, %c0_42, %c0_43] : memref<1x10x10x32xbf16, #tpu.memory_space<vmem>>, vector<1x8x8x32xbf16>
    %c0_44 = arith.constant 0 : index
    %c1_45 = arith.constant 1 : index
    %c1_46 = arith.constant 1 : index
    %c0_47 = arith.constant 0 : index
    %25 = vector.load %arg7[%c0_44, %c1_45, %c1_46, %c0_47] : memref<1x10x10x32xbf16, #tpu.memory_space<vmem>>, vector<1x8x8x32xbf16>
    %c0_48 = arith.constant 0 : index
    %c1_49 = arith.constant 1 : index
    %c2_50 = arith.constant 2 : index
    %c0_51 = arith.constant 0 : index
    %26 = vector.load %arg7[%c0_48, %c1_49, %c2_50, %c0_51] : memref<1x10x10x32xbf16, #tpu.memory_space<vmem>>, vector<1x8x8x32xbf16>
    %c0_52 = arith.constant 0 : index
    %c2_53 = arith.constant 2 : index
    %c0_54 = arith.constant 0 : index
    %c0_55 = arith.constant 0 : index
    %27 = vector.load %arg7[%c0_52, %c2_53, %c0_54, %c0_55] : memref<1x10x10x32xbf16, #tpu.memory_space<vmem>>, vector<1x8x8x32xbf16>
    %c0_56 = arith.constant 0 : index
    %c2_57 = arith.constant 2 : index
    %c1_58 = arith.constant 1 : index
    %c0_59 = arith.constant 0 : index
    %28 = vector.load %arg7[%c0_56, %c2_57, %c1_58, %c0_59] : memref<1x10x10x32xbf16, #tpu.memory_space<vmem>>, vector<1x8x8x32xbf16>
    %c0_60 = arith.constant 0 : index
    %c2_61 = arith.constant 2 : index
    %c2_62 = arith.constant 2 : index
    %c0_63 = arith.constant 0 : index
    %29 = vector.load %arg7[%c0_60, %c2_61, %c2_62, %c0_63] : memref<1x10x10x32xbf16, #tpu.memory_space<vmem>>, vector<1x8x8x32xbf16>
    %30 = tpu.concatenate %21, %22, %23, %24, %25, %26, %27, %28, %29 in 3 : vector<1x8x8x32xbf16>, vector<1x8x8x32xbf16>, vector<1x8x8x32xbf16>, vector<1x8x8x32xbf16>, vector<1x8x8x32xbf16>, vector<1x8x8x32xbf16>, vector<1x8x8x32xbf16>, vector<1x8x8x32xbf16>, vector<1x8x8x32xbf16> -> vector<1x8x8x288xbf16>
    %31 = vector.shape_cast %30 : vector<1x8x8x288xbf16> to vector<64x288xbf16>
    %c0_64 = arith.constant 0 : index
    %c0_65 = arith.constant 0 : index
    %32 = vector.load %arg4[%c0_64, %c0_65] : memref<288x32xbf16, #tpu.memory_space<vmem>>, vector<288x32xbf16>
    %cst_66 = arith.constant dense<0.000000e+00> : vector<64x32xf32>
    %33 = tpu.matmul %31, %32, %cst_66 {dimension_numbers = #tpu.dot_dimension_numbers<[1], [0], [0], [1], [0, 0, 1, 1], [], []>} : vector<64x288xbf16>, vector<288x32xbf16>, vector<64x32xf32> -> vector<64x32xf32>
    %cst_67 = arith.constant dense<0.000000e+00> : vector<32xf32>
    %34 = vector.multi_reduction <add>, %33, %cst_67 [0] : vector<64x32xf32> to vector<32xf32>
    %35 = vector.shape_cast %34 : vector<32xf32> to vector<1x32xf32>
    %36 = arith.mulf %33, %33 : vector<64x32xf32>
    %cst_68 = arith.constant dense<0.000000e+00> : vector<32xf32>
    %37 = vector.multi_reduction <add>, %36, %cst_68 [0] : vector<64x32xf32> to vector<32xf32>
    %38 = vector.shape_cast %37 : vector<32xf32> to vector<1x32xf32>
    %39 = tpu.concatenate %35, %38 in 0 : vector<1x32xf32>, vector<1x32xf32> -> vector<2x32xf32>
    %40 = vector.shape_cast %39 : vector<2x32xf32> to vector<1x2x32xf32>
    %c0_69 = arith.constant 0 : index
    %c0_70 = arith.constant 0 : index
    %c0_71 = arith.constant 0 : index
    %41 = vector.load %arg6[%c0_69, %c0_70, %c0_71] : memref<1x2x32xf32, #tpu.memory_space<vmem>>, vector<1x2x32xf32>
    tpu.vector_store %arg6[%c0_69, %c0_70, %c0_71], %40 {strides = array<i32>} : memref<1x2x32xf32, #tpu.memory_space<vmem>>, vector<1x2x32xf32>,
    %42 = vector.shape_cast %33 : vector<64x32xf32> to vector<1x8x8x32xf32>
    %c0_72 = arith.constant 0 : index
    %c0_73 = arith.constant 0 : index
    %c0_74 = arith.constant 0 : index
    %c0_75 = arith.constant 0 : index
    %43 = vector.load %arg5[%c0_72, %c0_73, %c0_74, %c0_75] : memref<1x8x8x32xf32, #tpu.memory_space<vmem>>, vector<1x8x8x32xf32>
    tpu.vector_store %arg5[%c0_72, %c0_73, %c0_74, %c0_75], %42 {strides = array<i32>} : memref<1x8x8x32xf32, #tpu.memory_space<vmem>>, vector<1x8x8x32xf32>,
    return
  }
  func.func @transform_0(%arg0: i32) -> (i32, i32, i32, i32) {
    %c0_i32 = arith.constant 0 : i32
    %c0_i32_0 = arith.constant 0 : i32
    %c0_i32_1 = arith.constant 0 : i32
    %c0_i32_2 = arith.constant 0 : i32
    return %arg0, %c0_i32, %c0_i32_0, %c0_i32_1 : i32, i32, i32, i32
  }
  func.func @transform_1(%arg0: i32) -> (i32, i32) {
    %c0_i32 = arith.constant 0 : i32
    %c0_i32_0 = arith.constant 0 : i32
    %c0_i32_1 = arith.constant 0 : i32
    return %c0_i32, %c0_i32_0 : i32, i32
  }
  func.func @transform_2(%arg0: i32) -> (i32, i32) {
    %c0_i32 = arith.constant 0 : i32
    %c0_i32_0 = arith.constant 0 : i32
    %c0_i32_1 = arith.constant 0 : i32
    return %c0_i32, %c0_i32_0 : i32, i32
  }
  func.func @transform_3(%arg0: i32) -> (i32, i32) {
    %c0_i32 = arith.constant 0 : i32
    %c0_i32_0 = arith.constant 0 : i32
    %c0_i32_1 = arith.constant 0 : i32
    return %c0_i32, %c0_i32_0 : i32, i32
  }
  func.func @transform_4(%arg0: i32) -> (i32, i32, i32, i32) {
    %c0_i32 = arith.constant 0 : i32
    %c0_i32_0 = arith.constant 0 : i32
    %c0_i32_1 = arith.constant 0 : i32
    %c0_i32_2 = arith.constant 0 : i32
    return %arg0, %c0_i32, %c0_i32_0, %c0_i32_1 : i32, i32, i32, i32
  }
  func.func @transform_5(%arg0: i32) -> (i32, i32, i32) {
    %c0_i32 = arith.constant 0 : i32
    %c0_i32_0 = arith.constant 0 : i32
    %c0_i32_1 = arith.constant 0 : i32
    return %arg0, %c0_i32, %c0_i32_0 : i32, i32, i32
  }
}

module attributes {stable_mosaic.version = 11 : i64} {
  func.func @_combine_kernel(%arg0: i32, %arg1: memref<1x8x8x32xf32, #tpu.memory_space<vmem>>, %arg2: memref<1x8x8x16xbf16, #tpu.memory_space<vmem>>, %arg3: memref<1x32xf32, #tpu.memory_space<vmem>>, %arg4: memref<1x32xf32, #tpu.memory_space<vmem>>, %arg5: memref<1x16xf32, #tpu.memory_space<vmem>>, %arg6: memref<1x16xf32, #tpu.memory_space<vmem>>, %arg7: memref<1x1x1x1xf32, #tpu.memory_space<vmem>>, %arg8: memref<1x8x128xf32, #tpu.memory_space<vmem>>) attributes {dimension_semantics = [#tpu.dimension_semantics<parallel>], iteration_bounds = array<i64: 2>, scalar_prefetch = 0 : i64, scratch_operands = 0 : i64, tpu.core_type = #tpu.core_type<tc>, window_params = [{transform_indices = @transform_0, window_bounds = array<i64: 1, 8, 8, 32>}, {transform_indices = @transform_1, window_bounds = array<i64: 1, 8, 8, 16>}, {pipeline_mode = #tpu.pipeline_mode<synchronous>, transform_indices = @transform_2, window_bounds = array<i64: 1, 32>}, {pipeline_mode = #tpu.pipeline_mode<synchronous>, transform_indices = @transform_3, window_bounds = array<i64: 1, 32>}, {pipeline_mode = #tpu.pipeline_mode<synchronous>, transform_indices = @transform_4, window_bounds = array<i64: 1, 16>}, {pipeline_mode = #tpu.pipeline_mode<synchronous>, transform_indices = @transform_5, window_bounds = array<i64: 1, 16>}, {transform_indices = @transform_6, window_bounds = array<i64: 1, 1, 1, 1>}, {transform_indices = @transform_7, window_bounds = array<i64: 1, 8, 128>}]} {
    %c0 = arith.constant 0 : index
    %c0_0 = arith.constant 0 : index
    %c0_1 = arith.constant 0 : index
    %c0_2 = arith.constant 0 : index
    %0 = vector.load %arg1[%c0, %c0_0, %c0_1, %c0_2] : memref<1x8x8x32xf32, #tpu.memory_space<vmem>>, vector<1x8x8x32xf32>
    %c0_3 = arith.constant 0 : index
    %c0_4 = arith.constant 0 : index
    %1 = vector.load %arg3[%c0_3, %c0_4] : memref<1x32xf32, #tpu.memory_space<vmem>>, vector<1x32xf32>
    %2 = vector.shape_cast %1 : vector<1x32xf32> to vector<1x1x1x32xf32>
    %3 = vector.broadcast %2 : vector<1x1x1x32xf32> to vector<1x8x8x32xf32>
    %4 = arith.mulf %0, %3 : vector<1x8x8x32xf32>
    %c0_5 = arith.constant 0 : index
    %c0_6 = arith.constant 0 : index
    %5 = vector.load %arg4[%c0_5, %c0_6] : memref<1x32xf32, #tpu.memory_space<vmem>>, vector<1x32xf32>
    %6 = vector.shape_cast %5 : vector<1x32xf32> to vector<1x1x1x32xf32>
    %7 = vector.broadcast %6 : vector<1x1x1x32xf32> to vector<1x8x8x32xf32>
    %8 = arith.addf %4, %7 : vector<1x8x8x32xf32>
    %9 = vector.extract_strided_slice %8 {offsets = [0, 0, 0, 0], sizes = [1, 8, 8, 16], strides = [1, 1, 1, 1]} : vector<1x8x8x32xf32> to vector<1x8x8x16xf32>
    %10 = vector.extract_strided_slice %8 {offsets = [0, 0, 0, 16], sizes = [1, 8, 8, 16], strides = [1, 1, 1, 1]} : vector<1x8x8x32xf32> to vector<1x8x8x16xf32>
    %c0_7 = arith.constant 0 : index
    %c0_8 = arith.constant 0 : index
    %c0_9 = arith.constant 0 : index
    %c0_10 = arith.constant 0 : index
    %11 = vector.load %arg7[%c0_7, %c0_8, %c0_9, %c0_10] : memref<1x1x1x1xf32, #tpu.memory_space<vmem>>, vector<1x1x1x1xf32>
    %12 = arith.subf %9, %10 : vector<1x8x8x16xf32>
    %13 = vector.broadcast %11 : vector<1x1x1x1xf32> to vector<1x8x8x16xf32>
    %14 = arith.mulf %13, %12 : vector<1x8x8x16xf32>
    %15 = arith.addf %10, %14 : vector<1x8x8x16xf32>
    %c0_11 = arith.constant 0 : index
    %c0_12 = arith.constant 0 : index
    %c0_13 = arith.constant 0 : index
    %c0_14 = arith.constant 0 : index
    %16 = vector.load %arg2[%c0_11, %c0_12, %c0_13, %c0_14] : memref<1x8x8x16xbf16, #tpu.memory_space<vmem>>, vector<1x8x8x16xbf16>
    %17 = arith.extf %16 : vector<1x8x8x16xbf16> to vector<1x8x8x16xf32>
    %c0_15 = arith.constant 0 : index
    %c0_16 = arith.constant 0 : index
    %18 = vector.load %arg5[%c0_15, %c0_16] : memref<1x16xf32, #tpu.memory_space<vmem>>, vector<1x16xf32>
    %19 = vector.shape_cast %18 : vector<1x16xf32> to vector<1x1x1x16xf32>
    %20 = vector.broadcast %19 : vector<1x1x1x16xf32> to vector<1x8x8x16xf32>
    %21 = arith.mulf %17, %20 : vector<1x8x8x16xf32>
    %c0_17 = arith.constant 0 : index
    %c0_18 = arith.constant 0 : index
    %22 = vector.load %arg6[%c0_17, %c0_18] : memref<1x16xf32, #tpu.memory_space<vmem>>, vector<1x16xf32>
    %23 = vector.shape_cast %22 : vector<1x16xf32> to vector<1x1x1x16xf32>
    %24 = vector.broadcast %23 : vector<1x1x1x16xf32> to vector<1x8x8x16xf32>
    %25 = arith.addf %21, %24 : vector<1x8x8x16xf32>
    %26 = arith.addf %15, %25 : vector<1x8x8x16xf32>
    %27 = vector.shape_cast %26 : vector<1x8x8x16xf32> to vector<1x8x128xf32>
    %c0_19 = arith.constant 0 : index
    %c0_20 = arith.constant 0 : index
    %c0_21 = arith.constant 0 : index
    %28 = vector.load %arg8[%c0_19, %c0_20, %c0_21] : memref<1x8x128xf32, #tpu.memory_space<vmem>>, vector<1x8x128xf32>
    tpu.vector_store %arg8[%c0_19, %c0_20, %c0_21], %27 {strides = array<i32>} : memref<1x8x128xf32, #tpu.memory_space<vmem>>, vector<1x8x128xf32>,
    return
  }
  func.func @transform_0(%arg0: i32) -> (i32, i32, i32, i32) {
    %c0_i32 = arith.constant 0 : i32
    %c0_i32_0 = arith.constant 0 : i32
    %c0_i32_1 = arith.constant 0 : i32
    %c0_i32_2 = arith.constant 0 : i32
    return %arg0, %c0_i32, %c0_i32_0, %c0_i32_1 : i32, i32, i32, i32
  }
  func.func @transform_1(%arg0: i32) -> (i32, i32, i32, i32) {
    %c0_i32 = arith.constant 0 : i32
    %c0_i32_0 = arith.constant 0 : i32
    %c0_i32_1 = arith.constant 0 : i32
    %c0_i32_2 = arith.constant 0 : i32
    return %arg0, %c0_i32, %c0_i32_0, %c0_i32_1 : i32, i32, i32, i32
  }
  func.func @transform_2(%arg0: i32) -> (i32, i32) {
    %c0_i32 = arith.constant 0 : i32
    %c0_i32_0 = arith.constant 0 : i32
    %c0_i32_1 = arith.constant 0 : i32
    return %c0_i32, %c0_i32_0 : i32, i32
  }
  func.func @transform_3(%arg0: i32) -> (i32, i32) {
    %c0_i32 = arith.constant 0 : i32
    %c0_i32_0 = arith.constant 0 : i32
    %c0_i32_1 = arith.constant 0 : i32
    return %c0_i32, %c0_i32_0 : i32, i32
  }
  func.func @transform_4(%arg0: i32) -> (i32, i32) {
    %c0_i32 = arith.constant 0 : i32
    %c0_i32_0 = arith.constant 0 : i32
    %c0_i32_1 = arith.constant 0 : i32
    return %c0_i32, %c0_i32_0 : i32, i32
  }
  func.func @transform_5(%arg0: i32) -> (i32, i32) {
    %c0_i32 = arith.constant 0 : i32
    %c0_i32_0 = arith.constant 0 : i32
    %c0_i32_1 = arith.constant 0 : i32
    return %c0_i32, %c0_i32_0 : i32, i32
  }
  func.func @transform_6(%arg0: i32) -> (i32, i32, i32, i32) {
    %c0_i32 = arith.constant 0 : i32
    %c0_i32_0 = arith.constant 0 : i32
    %c0_i32_1 = arith.constant 0 : i32
    %c0_i32_2 = arith.constant 0 : i32
    return %arg0, %c0_i32, %c0_i32_0, %c0_i32_1 : i32, i32, i32, i32
  }
  func.func @transform_7(%arg0: i32) -> (i32, i32, i32) {
    %c0_i32 = arith.constant 0 : i32
    %c0_i32_0 = arith.constant 0 : i32
    %c0_i32_1 = arith.constant 0 : i32
    return %arg0, %c0_i32, %c0_i32_0 : i32, i32, i32
  }
}

</mosaic_0001>

<bundles_post_ra>
// kernel: shake_block_forward.5
= control target key start
LH: loop header
LB: loop body
LE: loop exit
PB: predicated region body
PF: predicated region fallthrough
CT: control target
= control target key end

     0   :  { %s896_s24 = smov 0   ;;  %s1065_s0 = inlined_call_operand.vmem [shape: f32[2,8,8,32], index: 0, kind: input, shape index: {}]   ;;  %s1066_s1 = inlined_call_operand.vmem [shape: bf16[2,8,8,16], index: 1, kind: input, shape index: {}]   ;;  %s1067_s2 = inlined_call_operand.vmem [shape: f32[1,32], index: 2, kind: input, shape index: {}]   ;;  %s1068_s3 = inlined_call_operand.vmem [shape: f32[1,32], index: 3, kind: input, shape index: {}]   ;;  %s1069_s4 = inlined_call_operand.vmem [shape: f32[1,16], index: 4, kind: input, shape index: {}]   ;;  %s1070_s5 = inlined_call_operand.vmem [shape: f32[1,16], index: 5, kind: input, shape index: {}]   ;;  %s1071_s6 = inlined_call_operand.vmem [shape: f32[2,1,1,1], index: 6, kind: input, shape index: {}]   ;;  %s1072_s7 = inlined_call_operand.vmem [shape: f32[2,8,128], index: 7, kind: output, shape index: {}]  }
   0x1 LB: > { %s780_s25 = sadd.s32 4294967295, %s844_s24   ;;  %p784_p0 = scmp.ge.s32.totalorder %s844_s24, 1  ;;  %s844_s24 = sphi %s896_s24, %s17_s24  }
   0x2   : > { %p255_p1 = scmp.lt.s32.totalorder %s844_s24, 3 }
   0x4   : > { %p256_p2 = pnand %p784_p0, %p255_p1 }
   0x5   : > { %p294_p3 = scmp.lt.s32.totalorder (!%p256_p2), %s780_s25, 1  ;;  %s847_s15 = smov (!%p256_p2), 112  }
   0x6   : > { %259 = sbr.rel (%p256_p2) target bundleno = 542 (0x21e), region = 48  ;;  %s848_s23 = smov (!%p256_p2), 16  }
   0x7   : > { %s851_s26 = smov (!%p256_p2), 48   ;;  %s852_s27 = smov (!%p256_p2), 32  }
   0x8   : > { %s854_s29 = smov (!%p256_p2), 96   ;;  %s855_s30 = smov (!%p256_p2), 80  }
   0xb   : > { %s1074_s25 = smov (!%p294_p3, %s780_s25), 1  ;;  %v846_v0 = vmov 0   ;;  %v833_v1 = vld [vmem:[%s1067_s2] ss:$0 sm:$0xff]  ;;  %vm551_vm0 = vcmask 1047556   ;;  %vm691_vm1 = vcmask 130048  }
   0xc   : > { %831 = vset.pattern.permute.xlu2 %v846_v0  ;;  %832 = vset.pattern.permute.xlu0 %v846_v0  ;;  %s792_s28 = sshll.u32 %s1074_s25, 6  ;;  %s306_s8 = scalar_lea.vmem %s1071_s6, %s1074_s25  ;;  %v834_v2 = vld [vmem:[%s1068_s3] ss:$0 sm:$0xff]  ;;  %vm693_vm2 = vcmask 261120   ;;  %vm695_vm3 = vcmask 392192   ;;  %vm697_vm4 = vcmask 523264  }
   0xd   : > { %s298_s11 = scalar_lea.vmem %s1065_s0, %s792_s28  ;;  %v835_v3 = vld [vmem:[%s306_s8] ss:$0 sm:$0xff]  ;;  %s793_s14 = sshll.u32 %s1074_s25, 5  ;;  %vm699_vm5 = vcmask 654336   ;;  %vm701_vm6 = vcmask 785408   ;;  %vm703_vm7 = vcmask 916480  }
   0xe   : > { %v314_v4 = vld [vmem:[%s298_s11 + $0x18] sm:$0xff]  ;;  %v312_v5 = vld [vmem:[%s298_s11 + $0x8] sm:$0xff]  ;;  %387 = vperm.xlu2 %831, %v835_v3   ;;  %v317_v8 = vld [vmem:[%s298_s11 + $0x30] sm:$0xff]  ;;  %s934_s18 = scalar_lea.vmem %s1066_s1, %s793_s14  ;;  %s853_s28 = smov 64  }
   0xf   : > { %v326_v6 = vmul.f32 %v833_v1, %v314_v4  ;;  %v324_v7 = vmul.f32 %v833_v1, %v312_v5  ;;  %v313_v9 = vld [vmem:[%s298_s11 + $0x10] sm:$0xff]  ;;  %v318_v10 = vld [vmem:[%s298_s11 + $0x38] sm:$0xff]  ;;  %v329_v14 = vmul.f32 %v833_v1, %v317_v8  ;;  %v311_v17 = vld [vmem:[%s298_s11] sm:$0xff]  ;;  %s789_s8 = sshll.u32 %s1074_s25, 3 }
  0x10   : > { %v330_v13 = vmul.f32 %v833_v1, %v318_v10  ;;  %v325_v15 = vmul.f32 %v833_v1, %v313_v9  ;;  %v323_v20 = vmul.f32 %v833_v1, %v311_v17  ;;  %v315_v21 = vld [vmem:[%s298_s11 + $0x20] sm:$0xff]  ;;  %v316_v22 = vld [vmem:[%s298_s11 + $0x28] sm:$0xff]  ;;  %v812_v38 = vld [vmem:[%s934_s18 + $0x18] sm:$0xff]   ;;  %s310_s11 = scalar_lea.vmem %s1072_s7, %s789_s8 }
  0x11   : > { %v920_v11 = vadd.f32 %v834_v2, %v326_v6  ;;  %v922_v12 = vadd.f32 %v834_v2, %v324_v7  ;;  %v936_v18 = vadd.f32 %v834_v2, %v329_v14  ;;  %v810_v23 = vld [vmem:[%s934_s18 + $0x8] sm:$0xff]   ;;  %v327_v24 = vmul.f32 %v833_v1, %v315_v21  ;;  %v952_v28 = vld [vmem:[%s1069_s4] ss:$0 sm:$0xff]  ;;  %v811_v55 = vld [vmem:[%s934_s18 + $0x10] sm:$0xff]  }
  0x12   : > { %v929_v16 = vadd.f32 %v834_v2, %v330_v13  ;;  %v938_v19 = vadd.f32 %v834_v2, %v325_v15  ;;  %v328_v25 = vmul.f32 %v833_v1, %v316_v22  ;;  %v947_v26 = vadd.f32 %v834_v2, %v323_v20  ;;  %v955_v29 = vld [vmem:[%s934_s18] sm:$0xff]  }
  0x13   : > { %358 = vrot.lane.b32.xlu0 %v920_v11, %s847_s15  ;;  %354 = vrot.lane.b32.xlu1 %v922_v12, %s847_s15  ;;  %v801_v27 = vunpack.c.h.bf16 %v810_v23  ;;  %v957_v30 = vadd.f32 %v834_v2, %v327_v24  ;;  %v967_v33 = vld [vmem:[%s1070_s5] ss:$0 sm:$0xff]  ;;  %v797_v34 = vunpack.c.h.bf16 %v955_v29  ;;  %v808_v39 = vunpack.c.l.bf16 %v812_v38 }
  0x14   : > { %v959_v31 = vadd.f32 %v834_v2, %v328_v25  ;;  %v809_v40 = vunpack.c.h.bf16 %v812_v38  ;;  %v800_v45 = vunpack.c.l.bf16 %v810_v23  ;;  %v805_v56 = vunpack.c.h.bf16 %v811_v55 }
  0x15   : > { %v461_v32 = vmul.f32 %v952_v28, %v801_v27  ;;  %v459_v36 = vmul.f32 %v952_v28, %v797_v34  ;;  %v464_v41 = vmul.f32 %v952_v28, %v808_v39  ;;  %v804_v13 = vunpack.c.l.bf16 %v811_v55 }
  0x16   : > { %366 = vrot.lane.b32.xlu2 %v929_v16, %s847_s15  ;;  %v465_v42 = vmul.f32 %v952_v28, %v809_v40  ;;  %v460_v46 = vmul.f32 %v952_v28, %v800_v45  ;;  %v463_v57 = vmul.f32 %v952_v28, %v805_v56  ;;  %v796_v14 = vunpack.c.l.bf16 %v955_v29 }
  0x17   : > { %v473_v35 = vadd.f32 %v967_v33, %v461_v32  ;;  %v471_v37 = vadd.f32 %v967_v33, %v459_v36  ;;  %v476_v43 = vadd.f32 %v967_v33, %v464_v41  ;;  %v462_v20 = vmul.f32 %v952_v28, %v804_v13 }
  0x18   : > { %v477_v44 = vadd.f32 %v967_v33, %v465_v42  ;;  %v472_v47 = vadd.f32 %v967_v33, %v460_v46  ;;  %v475_v63 = vadd.f32 %v967_v33, %v463_v57  ;;  %v458_v21 = vmul.f32 %v952_v28, %v796_v14 }
  0x19   : > { %v474_v22 = vadd.f32 %v967_v33, %v462_v20 }
  0x1a   : > { %v470_v23 = vadd.f32 %v967_v33, %v458_v21 }
  0x1b   : > { %364 = vrot.lane.b32.xlu0 %v936_v18, %s847_s15  ;;  %356 = vrot.lane.b32.xlu1 %v938_v19, %s847_s15 }
  0x1e   : > { %352 = vrot.lane.b32.xlu2 %v947_v26, %s847_s15 }
  0x23   : > { %360 = vrot.lane.b32.xlu0 %v957_v30, %s847_s15  ;;  %362 = vrot.lane.b32.xlu1 %v959_v31, %s847_s15 }
  0x26   : > { %492 = vrot.lane.b32.xlu2 %v473_v35, %s848_s23 }
  0x2b   : > { %488 = vrot.lane.b32.xlu1 %v471_v37, %s848_s23  ;;  %500 = vrot.lane.b32.xlu0 %v477_v44, %s848_s23 }
  0x2e   : > { %498 = vrot.lane.b32.xlu2 %v476_v43, %s848_s23 }
  0x36   : > { %490 = vrot.lane.b32.xlu2 %v472_v47, %s848_s23 }
  0x68   : > { %v388_v48 = vpop.permute.xlu2 %387 }
  0x70   : > { %v367_v62 = vpop.permute.xlu2 %366 }
  0x71   : > { %v383_v2 = vsub.f32 %v929_v16, %v367_v62 }
  0x73   : > { %v397_v5 = vmul.f32 %v388_v48, %v383_v2 }
  0x78   : > { %v353_v7 = vpop.permute.xlu2 %352 }
  0x79   : > { %v376_v9 = vsub.f32 %v947_v26, %v353_v7  ;;  %v850_v7 = vmov 1934713408  }
  0x7b   : > { %v390_v15 = vmul.f32 %v388_v48, %v376_v9 }
  0x80   : > { %v493_v24 = vpop.permute.xlu2 %492 }
  0x85   : > { %v359_v49 = vpop.permute.xlu0 %358  ;;  %v355_v50 = vpop.permute.xlu1 %354 }
  0x86   : > { %v379_v51 = vsub.f32 %v920_v11, %v359_v49  ;;  %v377_v52 = vsub.f32 %v922_v12, %v355_v50 }
  0x88   : > { %v393_v53 = vmul.f32 %v388_v48, %v379_v51  ;;  %v391_v54 = vmul.f32 %v388_v48, %v377_v52  ;;  %v499_v25 = vpop.permute.xlu2 %498 }
  0x8a   : > { %412 = vrot.lane.b32.xlu0 %v393_v53, %s848_s23  ;;  %408 = vrot.lane.b32.xlu2 %v391_v54, %s848_s23 }
  0x8d   : > { %v365_v58 = vpop.permute.xlu0 %364  ;;  %v357_v59 = vpop.permute.xlu1 %356 }
  0x8e   : > { %v382_v60 = vsub.f32 %v936_v18, %v365_v58  ;;  %v378_v61 = vsub.f32 %v938_v19, %v357_v59  ;;  %v849_v58 = vmov 1983009808  }
  0x8f   : > { %v556_v59 = vunpack.c.l.s4 %v849_v58 }
  0x90   : > { %v396_v0 = vmul.f32 %v388_v48, %v382_v60  ;;  %v392_v1 = vmul.f32 %v388_v48, %v378_v61  ;;  %v491_v27 = vpop.permute.xlu2 %490 }
  0x91   : > { %v557_v62 = vunpack.c.0.s8 %v556_v59 }
  0x92   : > { %418 = vrot.lane.b32.xlu1 %v396_v0, %s848_s23  ;;  %410 = vrot.lane.b32.xlu0 %v392_v1, %s848_s23 }
  0x93   : > { %496 = vrot.lane.b32.xlu2 %v475_v63, %s848_s23 }
  0x95   : > { %v361_v3 = vpop.permute.xlu0 %360  ;;  %v363_v8 = vpop.permute.xlu1 %362 }
  0x96   : > { %v380_v4 = vsub.f32 %v957_v30, %v361_v3  ;;  %v381_v10 = vsub.f32 %v959_v31, %v363_v8  ;;  %v604_v8 = vunpack.c.l.s4 %v850_v7 }
  0x98   : > { %v394_v6 = vmul.f32 %v388_v48, %v380_v4  ;;  %v395_v17 = vmul.f32 %v388_v48, %v381_v10  ;;  %v605_v21 = vunpack.c.0.s8 %v604_v8 }
  0x9a   : > { %420 = vrot.lane.b32.xlu1 %v397_v5, %s848_s23  ;;  %414 = vrot.lane.b32.xlu0 %v394_v6, %s848_s23 }
  0x9d   : > { %v489_v32 = vpop.permute.xlu1 %488  ;;  %v501_v36 = vpop.permute.xlu0 %500 }
  0xa2   : > { %416 = vrot.lane.b32.xlu1 %v395_v17, %s848_s23  ;;  %406 = vrot.lane.b32.xlu0 %v390_v15, %s848_s23 }
  0xaa   : > { %494 = vrot.lane.b32.xlu1 %v474_v22, %s848_s23  ;;  %486 = vrot.lane.b32.xlu0 %v470_v23, %s848_s23 }
  0xe4   : > { %v409_v29 = vpop.permute.xlu2 %408 }
  0xe5   : > { %v431_v34 = vadd.f32 %v409_v29, %v922_v12 }
  0xe7   : > { %v511_v35 = vadd.f32 %v489_v32, %v431_v34 }
  0xe9   : > { %528 = vrot.lane.b32.xlu0 %v511_v35, %s847_s15 }
  0xed   : > { %v497_v46 = vpop.permute.xlu2 %496 }
  0xfc   : > { %v413_v28 = vpop.permute.xlu0 %412 }
  0xfd   : > { %v433_v37 = vadd.f32 %v413_v28, %v920_v11 }
  0xff   : > { %v513_v38 = vadd.f32 %v493_v24, %v433_v37 }
 0x101   : > { %532 = vrot.lane.b32.xlu1 %v513_v38, %s847_s15 }
 0x104   : > { %v411_v33 = vpop.permute.xlu0 %410  ;;  %v419_v39 = vpop.permute.xlu1 %418 }
 0x105   : > { %v432_v40 = vadd.f32 %v411_v33, %v938_v19  ;;  %v436_v41 = vadd.f32 %v419_v39, %v936_v18 }
 0x107   : > { %v512_v42 = vadd.f32 %v491_v27, %v432_v40  ;;  %v516_v43 = vadd.f32 %v499_v25, %v436_v41 }
 0x109   : > { %538 = vrot.lane.b32.xlu2 %v516_v43, %s847_s15  ;;  %530 = vrot.lane.b32.xlu1 %v512_v42, %s847_s15 }
 0x10c   : > { %v415_v12 = vpop.permute.xlu0 %414  ;;  %v421_v44 = vpop.permute.xlu1 %420 }
 0x10d   : > { %v437_v45 = vadd.f32 %v421_v44, %v929_v16  ;;  %v434_v18 = vadd.f32 %v415_v12, %v957_v30 }
 0x10f   : > { %v517_v11 = vadd.f32 %v501_v36, %v437_v45 }
 0x111   : > { %540 = vrot.lane.b32.xlu2 %v517_v11, %s847_s15 }
 0x114   : > { %v417_v47 = vpop.permute.xlu1 %416  ;;  %v407_v48 = vpop.permute.xlu0 %406 }
 0x115   : > { %v435_v19 = vadd.f32 %v417_v47, %v959_v31  ;;  %v430_v50 = vadd.f32 %v407_v48, %v947_v26 }
 0x117   : > { %v515_v49 = vadd.f32 %v497_v46, %v435_v19 }
 0x119   : > { %536 = vrot.lane.b32.xlu1 %v515_v49, %s847_s15 }
 0x11c   : > { %v495_v51 = vpop.permute.xlu1 %494  ;;  %v487_v52 = vpop.permute.xlu0 %486 }
 0x11d   : > { %v514_v53 = vadd.f32 %v495_v51, %v434_v18  ;;  %v510_v54 = vadd.f32 %v487_v52, %v430_v50 }
 0x11f   : > { %526 = vrot.lane.b32.xlu2 %v510_v54, %s847_s15  ;;  %534 = vrot.lane.b32.xlu0 %v514_v53, %s847_s15 }
 0x15b   : > { %v529_v61 = vpop.permute.xlu0 %528 }
 0x15c   : > { %v565_v14 = vrot.slane %v529_v61, 4 }
 0x163   : > { %v539_v16 = vpop.permute.xlu2 %538 }
 0x164   : > { %v575_v20 = vrot.slane %v539_v16, 4 }
 0x16b   : > { %v541_v56 = vpop.permute.xlu2 %540 }
 0x16c   : > { %v587_v2 = vrot.slane %v541_v56, 4 }
 0x173   : > { %v533_v55 = vpop.permute.xlu1 %532 }
 0x174   : > { %v563_v60 = vrot.slane %v533_v55, 4  ;;  %v566_v23 = vsel %vm551_vm0, %v533_v55, %v565_v14 }
 0x175   : > { %v574_v37 = vperm.slane %v566_v23, %v557_v62 }
 0x176   : > { %v564_v63 = vsel %vm551_vm0, %v563_v60, %v529_v61 }
 0x177   : > { %v570_v1 = vperm.slane %v564_v63, %v557_v62  ;;  %v611_v18 = vrot.slane %v574_v37, 4 }
 0x179   : > { %v527_v30 = vpop.permute.xlu2 %526  ;;  %v599_v9 = vrot.slane %v570_v1, 4 }
 0x17a   : > { %v553_v10 = vrot.slane %v527_v30, 4 }
 0x17b   : > { %v531_v57 = vpop.permute.xlu1 %530 }
 0x17c   : > { %v550_v31 = vrot.slane %v531_v57, 4  ;;  %v554_v24 = vsel %vm551_vm0, %v531_v57, %v553_v10 }
 0x17d   : > { %v562_v38 = vperm.slane %v554_v24, %v557_v62 }
 0x17e   : > { %v552_v26 = vsel %vm551_vm0, %v550_v31, %v527_v30 }
 0x17f   : > { %v558_v0 = vperm.slane %v552_v26, %v557_v62  ;;  %v613_v50 = vrot.slane %v562_v38, 4 }
 0x181   : > { %v601_v4 = vrot.slane %v558_v0, 4  ;;  %v600_v17 = vsel %vm551_vm0, %v599_v9, %v558_v0  ;;  %v614_v31 = vsel %vm551_vm0, %v574_v37, %v613_v50 }
 0x182   : > { %v606_v34 = vperm.slane %v600_v17, %v605_v21  ;;  %v622_v30 = vperm.slane %v614_v31, %v605_v21 }
 0x183   : > { %v602_v22 = vsel %vm551_vm0, %v570_v1, %v601_v4 }
 0x184   : > { %v610_v28 = vperm.slane %v602_v22, %v605_v21  ;;  %v649_v12 = vrot.slane %v606_v34, 4  ;;  %v661_v63 = vrot.slane %v622_v30, 4 }
 0x186   : > { %v653_v11 = vrot.slane %v610_v28, 4 }
 0x18b   : > { %v537_v3 = vpop.permute.xlu1 %536 }
 0x18c   : > { %v588_v5 = vsel %vm551_vm0, %v587_v2, %v537_v3  ;;  %v589_v6 = vrot.slane %v537_v3, 4 }
 0x18d   : > { %v594_v15 = vperm.slane %v588_v5, %v557_v62 }
 0x18e   : > { %v590_v13 = vsel %vm551_vm0, %v541_v56, %v589_v6 }
 0x18f   : > { %v598_v25 = vperm.slane %v590_v13, %v557_v62  ;;  %v623_v35 = vrot.slane %v594_v15, 4 }
 0x191   : > { %v535_v27 = vpop.permute.xlu0 %534  ;;  %v635_v39 = vrot.slane %v598_v25, 4 }
 0x192   : > { %v576_v29 = vsel %vm551_vm0, %v575_v20, %v535_v27  ;;  %v577_v32 = vrot.slane %v535_v27, 4 }
 0x193   : > { %v582_v36 = vperm.slane %v576_v29, %v557_v62 }
 0x194   : > { %v578_v33 = vsel %vm551_vm0, %v539_v16, %v577_v32  ;;  %v612_v16 = vsel %vm551_vm0, %v611_v18, %v562_v38 }
 0x195   : > { %v586_v40 = vperm.slane %v578_v33, %v557_v62  ;;  %v625_v41 = vrot.slane %v582_v36, 4  ;;  %v624_v42 = vsel %vm551_vm0, %v623_v35, %v582_v36  ;;  %v618_v58 = vperm.slane %v612_v16, %v605_v21 }
 0x196   : > { %v630_v43 = vperm.slane %v624_v42, %v605_v21 }
 0x197   : > { %v637_v44 = vrot.slane %v586_v40, 4  ;;  %v626_v45 = vsel %vm551_vm0, %v594_v15, %v625_v41  ;;  %v636_v46 = vsel %vm551_vm0, %v635_v39, %v586_v40  ;;  %v657_v26 = vrot.slane %v618_v58, 4 }
 0x198   : > { %v647_v47 = vrot.slane %v630_v43, 4  ;;  %v650_v48 = vsel %vm551_vm0, %v630_v43, %v649_v12  ;;  %v634_v19 = vperm.slane %v626_v45, %v605_v21  ;;  %v642_v49 = vperm.slane %v636_v46, %v605_v21 }
 0x199   : > { %664 = vrot.lane.b32.xlu0 %v650_v48, %s848_s23  ;;  %v638_v51 = vsel %vm551_vm0, %v598_v25, %v637_v44 }
 0x19a   : > { %v654_v52 = vsel %vm551_vm0, %v634_v19, %v653_v11  ;;  %v651_v53 = vrot.slane %v634_v19, 4  ;;  %v646_v54 = vperm.slane %v638_v51, %v605_v21  ;;  %v648_v55 = vsel %vm551_vm0, %v647_v47, %v606_v34 }
 0x19b   : > { %672 = vrot.lane.b32.xlu2 %v654_v52, %s851_s26  ;;  %v655_v57 = vrot.slane %v642_v49, 4  ;;  %v658_v62 = vsel %vm551_vm0, %v642_v49, %v657_v26 }
 0x19c   : > { %v652_v56 = vsel %vm551_vm0, %v651_v53, %v610_v28  ;;  %v659_v59 = vrot.slane %v646_v54, 4  ;;  %v662_v0 = vsel %vm551_vm0, %v646_v54, %v661_v63 }
 0x19d   : > { %668 = vrot.lane.b32.xlu1 %v652_v56, %s852_s27  ;;  %v656_v60 = vsel %vm551_vm0, %v655_v57, %v618_v58 }
 0x19e   : > { %v660_v61 = vsel %vm551_vm0, %v659_v59, %v622_v30 }
 0x1a1   : > { %676 = vrot.lane.b32.xlu0 %v656_v60, %s853_s28 }
 0x1a3   : > { %684 = vrot.lane.b32.xlu2 %v660_v61, %s854_s29 }
 0x1a5   : > { %680 = vrot.lane.b32.xlu1 %v658_v62, %s855_s30 }
 0x1a9   : > { %688 = vrot.lane.b32.xlu0 %v662_v0, %s847_s15 }
 0x1f5   : > { %v673_v3 = vpop.permute.xlu2 %672 }
 0x1fd   : > { %v685_v13 = vpop.permute.xlu2 %684 }
 0x20b   : > { %v665_v1 = vpop.permute.xlu0 %664 }
 0x20c   : > { %v692_v4 = vsel %vm691_vm1, %v648_v55, %v665_v1 }
 0x20f   : > { %v669_v2 = vpop.permute.xlu1 %668 }
 0x210   : > { %v694_v5 = vsel %vm693_vm2, %v692_v4, %v669_v2 }
 0x211   : > { %v696_v7 = vsel %vm695_vm3, %v694_v5, %v673_v3 }
 0x213   : > { %v677_v6 = vpop.permute.xlu0 %676 }
 0x214   : > { %v698_v8 = vsel %vm697_vm4, %v696_v7, %v677_v6 }
 0x217   : > { %v681_v9 = vpop.permute.xlu1 %680 }
 0x218   : > { %v700_v10 = vsel %vm699_vm5, %v698_v8, %v681_v9 }
 0x219   : > { %v702_v15 = vsel %vm701_vm6, %v700_v10, %v685_v13 }
 0x21b   : > { %v689_v14 = vpop.permute.xlu0 %688 }
 0x21c   : > { %v704_v17 = vsel %vm703_vm7, %v702_v15, %v689_v14 }
 0x21d   : > { %705 = vst [vmem:[%s310_s11] sm:$0xff] %v704_v17 }
 0x21e PF: > { %s17_s24 = sadd.s32 1, %s844_s24  }
 0x21f   : > { %p14_p4 = scmp.ge.s32.totalorder %s17_s24, 4  }
 0x221   :  { %16 = sbr.rel (!%p14_p4) target bundleno = 1 (0x1), region = 84 }

// kernel: shake_block_forward.3
= control target key start
LH: loop header
LB: loop body
LE: loop exit
PB: predicated region body
PF: predicated region fallthrough
CT: control target
= control target key end

     0   :  { %s1601_s12 = smov 0   ;;  %s2086_s0 = inlined_call_operand.vmem [shape: bf16[2,8,8,16], index: 0, kind: input, shape index: {}]   ;;  %s2087_s1 = inlined_call_operand.vmem [shape: bf16[144,32], index: 1, kind: input, shape index: {}]   ;;  %s2088_s2 = inlined_call_operand.vmem [shape: f32[2,8,8,32], index: 2, kind: output, shape index: {0}]   ;;  %s2089_s3 = inlined_call_operand.vmem [shape: f32[2,2,32], index: 3, kind: output, shape index: {1}]  }
   0x1 LB: > { %s1456_s13 = sadd.s32 4294967295, %s1571_s12   ;;  %p1460_p0 = scmp.ge.s32.totalorder %s1571_s12, 1  ;;  %s1571_s12 = sphi %s1601_s12, %s14_s12  }
   0x2   : > { %p140_p1 = scmp.lt.s32.totalorder %s1571_s12, 3 }
   0x4   : > { %p141_p2 = pnand %p1460_p0, %p140_p1 }
   0x5   : > { %p168_p3 = scmp.lt.s32.totalorder (!%p141_p2), %s1456_s13, 1  ;;  %s1574_s18 = smov (!%p141_p2), 32  }
   0x6   : > { %144 = sbr.rel (%p141_p2) target bundleno = 465 (0x1d1), region = 28  ;;  %s1575_s19 = smov (!%p141_p2), 16  }
   0x7   : > { %s1576_s20 = smov (!%p141_p2), 48   ;;  %s1577_s21 = smov (!%p141_p2), 80  }
   0x8   : > { %s1578_s22 = smov (!%p141_p2), 64   ;;  %s1579_s23 = smov (!%p141_p2), 96  }
   0x9   : > { %s1580_s24 = smov (!%p141_p2), 112  }
   0xb   : > { %vm183_vm0 = vcmask 125952   ;;  %vm185_vm1 = vcmask 122880   ;;  %vm191_vm2 = vsmask.f32 256  ;;  %v1573_v0 = vmov 0   ;;  %s2097_s13 = smov (!%p168_p3, %s1456_s13), 1 }
   0xc   : > { %184 = vst.msk [vmem:[#allocation2] sm:$0xf] %vm183_vm0, %v1573_v0  ;;  %vm1611_vm3 = vmand %vm185_vm1, %vm191_vm2  ;;  %vm223_vm4 = vsmask.f32 7938  ;;  %v199_v2 = vld [vmem:[#allocation2 + $0x10] sm:$0x1] }
   0xd   : > { %186 = vst.msk [vmem:[#allocation2 + $0x4] sm:$0x1] %vm185_vm1, %v1573_v0  ;;  %v200_v3 = vsel %vm1611_vm3, 0, %v199_v2  ;;  %v196_v4 = vld [vmem:[#allocation2 + $0x8] sm:$0x1]  ;;  %vm1626_vm5 = vmand %vm185_vm1, %vm223_vm4  ;;  %s1508_s14 = sshll.u32 %s2097_s13, 5 }
   0xe   : > { %188 = vst.msk [vmem:[#allocation2 + $0x48] sm:$0xf] %vm183_vm0, %v1573_v0  ;;  %v197_v5 = vsel %vm1611_vm3, 0, %v196_v4  ;;  %v205_v6 = vld [vmem:[#allocation2 + $0x20] sm:$0x1]  ;;  %s1636_s17 = scalar_lea.vmem %s2086_s0, %s1508_s14  ;;  %vm1660_vm6 = vmand %vm183_vm0, %vm223_vm4  ;;  %vm1003_vm7 = vcmask 130048  }
   0xf   : > { %189 = vst.msk [vmem:[#allocation2 + $0x4c] sm:$0x1] %vm185_vm1, %v1573_v0  ;;  %v206_v8 = vsel %vm1611_vm3, 0, %v205_v6  ;;  %v237_v9 = vld [vmem:[#allocation2 + $0x24] sm:$0x1]  ;;  %v1642_v13 = vld [vmem:[%s1636_s17 + $0x8] sm:$0xff]  }
  0x10   : > { %201 = vst [vmem:[#allocation2 + $0x10] sm:$0x1] %v200_v3  ;;  %v238_v10 = vsel %vm1626_vm5, 0, %v237_v9  ;;  %v211_v11 = vld [vmem:[#allocation2 + $0x30] sm:$0x1]  ;;  %v1520_v12 = vld [vmem:[%s1636_s17] sm:$0xff]   ;;  %v1526_v19 = vunpack.c.h.bf16 %v1642_v13  ;;  %v1525_v60 = vunpack.c.l.bf16 %v1642_v13 }
  0x11   : > { %198 = vst [vmem:[#allocation2 + $0x8] sm:$0x1] %v197_v5  ;;  %v212_v14 = vsel %vm1611_vm3, 0, %v211_v11  ;;  %v1536_v15 = vld [vmem:[%s1636_s17 + $0x10] sm:$0xff]   ;;  %v1522_v17 = vunpack.c.h.bf16 %v1520_v12  ;;  %v1521_v18 = vunpack.c.l.bf16 %v1520_v12  ;;  %v208_v29 = vld [vmem:[#allocation2 + $0x28] sm:$0x1] }
  0x12   : > { %207 = vst [vmem:[#allocation2 + $0x20] sm:$0x1] %v206_v8  ;;  %v1530_v20 = vunpack.c.h.bf16 %v1536_v15  ;;  %v1529_v23 = vunpack.c.l.bf16 %v1536_v15  ;;  %v274_v27 = vmax.f32 %v1526_v19, 0.0  ;;  %v209_v34 = vsel %vm1611_vm3, 0, %v208_v29  ;;  %v228_v35 = vld [vmem:[#allocation2 + $0xc] sm:$0x1] }
  0x13   : > { %v193_v16 = vld [vmem:[#allocation2] sm:$0x1]  ;;  %239 = vst [vmem:[#allocation2 + $0x24] sm:$0x1] %v238_v10  ;;  %v272_v25 = vmax.f32 %v1522_v17, 0.0  ;;  %v271_v26 = vmax.f32 %v1521_v18, 0.0 }
  0x14   : > { %v225_v21 = vld [vmem:[#allocation2 + $0x4] sm:$0x1]  ;;  %v194_v22 = vsel %vm1611_vm3, 0, %v193_v16  ;;  %213 = vst [vmem:[#allocation2 + $0x30] sm:$0x1] %v212_v14  ;;  %v276_v28 = vmax.f32 %v1530_v20, 0.0  ;;  %v282_v33 = vpack.c.bf16 %v274_v27, %v274_v27 }
  0x15   : > { %v226_v24 = vsel %vm1626_vm5, 0, %v225_v21  ;;  %195 = vst [vmem:[#allocation2] sm:$0x1] %v194_v22  ;;  %v275_v30 = vmax.f32 %v1529_v23, 0.0  ;;  %v280_v31 = vpack.c.bf16 %v272_v25, %v272_v25  ;;  %v279_v32 = vpack.c.bf16 %v271_v26, %v271_v26  ;;  %v434_v39 = vld [vmem:[#allocation2] sm:$0xe] }
  0x16   : > { %227 = vst [vmem:[#allocation2 + $0x4] sm:$0x1] %v226_v24  ;;  %v284_v36 = vpack.c.bf16 %v276_v28, %v276_v28  ;;  %v229_v38 = vsel %vm1626_vm5, 0, %v228_v35  ;;  %v312_v46 = vshrl.u32 %v282_v33, 16  ;;  %v315_v47 = vshll.u32 %v282_v33, 16 }
  0x17   : > { %210 = vst [vmem:[#allocation2 + $0x28] sm:$0x1] %v209_v34  ;;  %v283_v37 = vpack.c.bf16 %v275_v30, %v275_v30  ;;  %v296_v40 = vshrl.u32 %v280_v31, 16  ;;  %v299_v41 = vshll.u32 %v280_v31, 16  ;;  %v288_v42 = vshrl.u32 %v279_v32, 16 }
  0x18   : > { %v291_v43 = vshll.u32 %v279_v32, 16  ;;  %v376_v44 = vld [vmem:[#allocation2 + $0x10] sm:$0xf]  ;;  %v370_v45 = vld [vmem:[#allocation2 + $0x8] sm:$0xf]  ;;  %v328_v48 = vshrl.u32 %v284_v36, 16  ;;  %v611_v56 = vunpack.c.l.b16 %v434_v39 }
  0x19   : > { %v331_v49 = vshll.u32 %v284_v36, 16  ;;  %v1656_v50 = vrot.slane %v296_v40, 7  ;;  %v290_v51 = vrot.slane %v288_v42, 7  ;;  %v388_v52 = vld [vmem:[#allocation2 + $0x20] sm:$0xf]  ;;  %v320_v53 = vshrl.u32 %v283_v37, 16 }
  0x1a   : > { %v323_v54 = vshll.u32 %v283_v37, 16  ;;  %v314_v58 = vrot.slane %v312_v46, 7  ;;  %v1664_v59 = vrot.slane %v328_v48, 7  ;;  %230 = vst [vmem:[#allocation2 + $0xc] sm:$0x1] %v229_v38  ;;  %v273_v30 = vmax.f32 %v1525_v60, 0.0 }
  0x1b   : > { %v301_v63 = vor.u32 %v299_v41, %v1656_v50  ;;  %v293_v0 = vor.u32 %v291_v43, %v290_v51  ;;  %v391_v2 = vld [vmem:[#allocation2 + $0x24] sm:$0x1]  ;;  %v1668_v3 = vrot.slane %v320_v53, 7  ;;  %v400_v9 = vld [vmem:[#allocation2 + $0x30] sm:$0xf]  ;;  %v294_v14 = vrot.slane %v290_v51, 4 }
  0x1c   : > { %v418_v57 = vld [vmem:[#allocation2] sm:$0xf]  ;;  %v317_v5 = vor.u32 %v315_v47, %v314_v58  ;;  %v318_v6 = vrot.slane %v314_v58, 4  ;;  %v333_v8 = vor.u32 %v331_v49, %v1664_v59  ;;  %v240_v20 = vld [vmem:[#allocation2 + $0x2c] sm:$0x1]  ;;  %v1696_v39 = vpack.c.bf16 %v273_v30, %v273_v30  ;;  %v1708_v58 = vld [vmem:[%s1636_s17 + $0x18] sm:$0xff]  }
  0x1d   : > { %v426_v61 = vld [vmem:[#allocation2 + $0x4] sm:$0x1]  ;;  %v507_v62 = vunpack.c.l.b16 %v418_v57  ;;  %v377_v10 = vsel %vm1660_vm6, %v301_v63, %v376_v44  ;;  %v371_v11 = vsel %vm1660_vm6, %v293_v0, %v370_v45  ;;  %v325_v12 = vor.u32 %v323_v54, %v1668_v3  ;;  %v231_v26 = vld [vmem:[#allocation2 + $0x14] sm:$0x1]  ;;  %v202_v31 = vld [vmem:[#allocation2 + $0x18] sm:$0x1] }
  0x1e   : > { %v508_v4 = vunpack.c.l.b16 %v426_v61  ;;  %v394_v13 = vld [vmem:[#allocation2 + $0x28] sm:$0xf]  ;;  %378 = vst [vmem:[#allocation2 + $0x10] sm:$0xf] %v377_v10  ;;  %v389_v17 = vsel %vm1660_vm6, %v317_v5, %v388_v52  ;;  %v392_v18 = vsel %vm1611_vm3, %v318_v6, %v391_v2  ;;  %v401_v19 = vsel %vm1660_vm6, %v333_v8, %v400_v9  ;;  %v243_v33 = vld [vmem:[#allocation2 + $0x34] sm:$0x1] }
  0x1f   : > { %372 = vst [vmem:[#allocation2 + $0x8] sm:$0xf] %v371_v11  ;;  %v395_v24 = vsel %vm1660_vm6, %v325_v12, %v394_v13  ;;  %v241_v29 = vsel %vm1626_vm5, 0, %v240_v20  ;;  %v232_v35 = vsel %vm1626_vm5, 0, %v231_v26  ;;  %v203_v38 = vsel %vm1611_vm3, 0, %v202_v31 }
  0x20   : > { %v619_v15 = vpack.c.b16 %v508_v4, %v611_v56  ;;  %v523_v16 = vpack.c.b16 %v508_v4, %v507_v62  ;;  %390 = vst [vmem:[#allocation2 + $0x20] sm:$0xf] %v389_v17  ;;  %v244_v43 = vsel %vm1626_vm5, 0, %v243_v33  ;;  %v326_v51 = vrot.slane %v1668_v3, 4  ;;  %v234_v26 = vld [vmem:[#allocation2 + $0x1c] sm:$0x1] }
  0x21   : > { %393 = vst [vmem:[#allocation2 + $0x24] sm:$0x1] %v392_v18  ;;  %v373_v25 = vld [vmem:[#allocation2 + $0xc] sm:$0x1]  ;;  %v304_v57 = vshrl.u32 %v1696_v39, 16  ;;  %v302_v4 = vrot.slane %v1656_v50, 4  ;;  %v1533_v50 = vunpack.c.l.bf16 %v1708_v58 }
  0x22   : > { %v627_v21 = vrot.slane %v619_v15, 1  ;;  %v532_v22 = vshrl.u32 %v523_v16, 16  ;;  %v534_v23 = vshll.u32 %v523_v16, 16  ;;  %402 = vst [vmem:[#allocation2 + $0x30] sm:$0xf] %v401_v19  ;;  %v374_v28 = vsel %vm1611_vm3, %v294_v14, %v373_v25 }
  0x23   : > { %396 = vst [vmem:[#allocation2 + $0x28] sm:$0xf] %v395_v24  ;;  %v334_v9 = vrot.slane %v1664_v59, 4  ;;  %v1723_v18 = vrot.slane %v304_v57, 7  ;;  %v307_v59 = vshll.u32 %v1696_v39, 16  ;;  %vm1028_vm8 = vcmask 261120  }
  0x24   : > { %635 = vrot.lane.b32.xlu1 %v627_v21, %s1574_s18  ;;  %v536_v27 = vrot.slane %v534_v23, 1  ;;  %375 = vst [vmem:[#allocation2 + $0xc] sm:$0x1] %v374_v28  ;;  %v214_v19 = vld [vmem:[#allocation2 + $0x38] sm:$0x1]  ;;  %vm1045_vm9 = vcmask 392192  }
  0x25   : > { %v443_v34 = vld [vmem:[#allocation2 + $0x10] sm:$0xf]  ;;  %242 = vst [vmem:[#allocation2 + $0x2c] sm:$0x1] %v241_v29  ;;  %v309_v30 = vor.u32 %v307_v59, %v1723_v18  ;;  %vm1062_vm10 = vcmask 523264   ;;  %vm1096_vm11 = vcmask 785408  }
  0x26   : > { %v537_v32 = vor.u32 %v536_v27, %v532_v22  ;;  %v1692_v36 = vunpack.c.l.b16 %v443_v34  ;;  %v442_v37 = vld [vmem:[#allocation2 + $0x8] sm:$0xf]  ;;  %233 = vst [vmem:[#allocation2 + $0x14] sm:$0x1] %v232_v35  ;;  %v246_v27 = vld [vmem:[#allocation2 + $0x3c] sm:$0x1] }
  0x27   : > { %v659_v40 = vunpack.c.l.b16 %v442_v37  ;;  %v438_v41 = vld [vmem:[#allocation2 + $0x20] sm:$0xe]  ;;  %v458_v42 = vld [vmem:[#allocation2 + $0x8] sm:$0xe]  ;;  %204 = vst [vmem:[#allocation2 + $0x18] sm:$0x1] %v203_v38 }
  0x28   : > { %587 = vrot.lane.b32.xlu0 %v537_v32, %s1575_s19  ;;  %v668_v44 = vpack.c.b16 %v1692_v36, %v1692_v36  ;;  %v430_v45 = vld [vmem:[#allocation2 + $0x24] sm:$0x1]  ;;  %v615_v46 = vunpack.c.l.b16 %v438_v41  ;;  %v422_v47 = vld [vmem:[#allocation2 + $0x20] sm:$0xf]  ;;  %v435_v56 = vld [vmem:[#allocation2 + $0x8] sm:$0xe]  ;;  %v795_v63 = vunpack.c.l.b16 %v458_v42 }
  0x29   : > { %v516_v48 = vunpack.c.l.b16 %v430_v45  ;;  %v447_v49 = vld [vmem:[#allocation2 + $0x30] sm:$0xf]  ;;  %v667_v52 = vpack.c.b16 %v659_v40, %v659_v40  ;;  %v515_v61 = vunpack.c.l.b16 %v422_v47  ;;  %245 = vst [vmem:[#allocation2 + $0x34] sm:$0x1] %v244_v43  ;;  %v612_v12 = vunpack.c.l.b16 %v435_v56  ;;  %v1719_v14 = vld [vmem:[#allocation2 + $0x8] sm:$0xf] }
  0x2a   : > { %v1704_v53 = vunpack.c.l.b16 %v447_v49  ;;  %v446_v54 = vld [vmem:[#allocation2 + $0x28] sm:$0xf]  ;;  %v509_v23 = vunpack.c.l.b16 %v1719_v14  ;;  %v215_v32 = vsel %vm1611_vm3, 0, %v214_v19  ;;  %v277_v37 = vmax.f32 %v1533_v50, 0.0  ;;  %v459_v59 = vld [vmem:[#allocation2 + $0x10] sm:$0xe] }
  0x2b   : > { %v623_v60 = vpack.c.b16 %v516_v48, %v615_v46  ;;  %v450_v62 = vld [vmem:[#allocation2 + $0xc] sm:$0x1]  ;;  %v1711_v6 = vunpack.c.l.b16 %v446_v54  ;;  %v439_v13 = vld [vmem:[#allocation2 + $0x28] sm:$0xe]  ;;  %v527_v15 = vpack.c.b16 %v516_v48, %v515_v61  ;;  %216 = vst [vmem:[#allocation2 + $0x38] sm:$0x1] %v215_v32 }
  0x2c   : > { %677 = vrot.lane.b32.xlu1 %v668_v44, %s1576_s20  ;;  %v427_v0 = vld [vmem:[#allocation2 + $0xc] sm:$0x1]  ;;  %v699_v2 = vunpack.c.l.b16 %v450_v62  ;;  %v672_v10 = vpack.c.b16 %v1704_v53, %v1704_v53  ;;  %v1726_v20 = vld [vmem:[#allocation2 + $0x28] sm:$0xf]  ;;  %v616_v22 = vunpack.c.l.b16 %v439_v13  ;;  %v247_v41 = vsel %vm1626_vm5, 0, %v246_v27 }
  0x2d   : > { %v397_v3 = vld [vmem:[#allocation2 + $0x2c] sm:$0x1]  ;;  %v631_v5 = vrot.slane %v623_v60, 1  ;;  %v510_v11 = vunpack.c.l.b16 %v427_v0  ;;  %v379_v17 = vld [vmem:[#allocation2 + $0x14] sm:$0x1]  ;;  %v671_v21 = vpack.c.b16 %v1711_v6, %v1711_v6  ;;  %v562_v34 = vshll.u32 %v527_v15, 16 }
  0x2e   : > { %v398_v8 = vsel %vm1611_vm3, %v326_v51, %v397_v3  ;;  %v803_v16 = vpack.c.b16 %v699_v2, %v795_v63  ;;  %v380_v24 = vsel %vm1611_vm3, %v302_v4, %v379_v17  ;;  %v382_v25 = vld [vmem:[#allocation2 + $0x18] sm:$0xf]  ;;  %v707_v29 = vpack.c.b16 %v699_v2, %v659_v40  ;;  %248 = vst [vmem:[#allocation2 + $0x3c] sm:$0x1] %v247_v41 }
  0x2f   : > { %399 = vst [vmem:[#allocation2 + $0x2c] sm:$0x1] %v398_v8  ;;  %643 = vrot.lane.b32.xlu2 %v631_v5, %s1574_s18  ;;  %v620_v28 = vpack.c.b16 %v510_v11, %v612_v12  ;;  %v517_v38 = vunpack.c.l.b16 %v1726_v20  ;;  %v383_v39 = vsel %vm1660_vm6, %v309_v30, %v382_v25  ;;  %v235_v40 = vsel %vm1626_vm5, 0, %v234_v26 }
  0x30   : > { %675 = vrot.lane.b32.xlu0 %v667_v52, %s1576_s20  ;;  %381 = vst [vmem:[#allocation2 + $0x14] sm:$0x1] %v380_v24  ;;  %v403_v31 = vld [vmem:[#allocation2 + $0x34] sm:$0x1]  ;;  %v811_v33 = vrot.slane %v803_v16, 1  ;;  %v524_v43 = vpack.c.b16 %v510_v11, %v509_v23  ;;  %v285_v45 = vpack.c.bf16 %v277_v37, %v277_v37  ;;  %v718_v48 = vshll.u32 %v707_v29, 16 }
  0x31   : > { %v404_v35 = vsel %vm1611_vm3, %v334_v9, %v403_v31  ;;  %384 = vst [vmem:[#allocation2 + $0x18] sm:$0xf] %v383_v39  ;;  %v628_v46 = vrot.slane %v620_v28, 1  ;;  %v560_v51 = vshrl.u32 %v527_v15, 16  ;;  %v564_v52 = vrot.slane %v562_v34, 1 }
  0x32   : > { %405 = vst [vmem:[#allocation2 + $0x34] sm:$0x1] %v404_v35  ;;  %v336_v54 = vshrl.u32 %v285_v45, 16  ;;  %v716_v60 = vshrl.u32 %v707_v29, 16  ;;  %v339_v63 = vshll.u32 %v285_v45, 16  ;;  %v720_v2 = vrot.slane %v718_v48, 1 }
  0x33   : > { %236 = vst [vmem:[#allocation2 + $0x1c] sm:$0x1] %v235_v40  ;;  %v541_v3 = vshll.u32 %v524_v43, 16  ;;  %v565_v5 = vor.u32 %v564_v52, %v560_v51  ;;  %v539_v12 = vshrl.u32 %v524_v43, 16  ;;  %v406_v15 = vld [vmem:[#allocation2 + $0x38] sm:$0xf]  ;;  %v796_v29 = vunpack.c.l.b16 %v459_v59 }
  0x34   : > { %685 = vrot.lane.b32.xlu1 %v672_v10, %s1576_s20  ;;  %v338_v62 = vrot.slane %v336_v54, 7  ;;  %v721_v11 = vor.u32 %v720_v2, %v716_v60  ;;  %v463_v60 = vld [vmem:[#allocation2 + $0x30] sm:$0xe]  ;;  %vm1079_vm12 = vcmask 654336   ;;  %vm1113_vm13 = vcmask 916480  }
  0x35   : > { %v543_v13 = vrot.slane %v541_v3, 1  ;;  %v409_v25 = vld [vmem:[#allocation2 + $0x3c] sm:$0x1]  ;;  %v800_v2 = vunpack.c.l.b16 %v463_v60  ;;  %v436_v60 = vld [vmem:[#allocation2 + $0x10] sm:$0xe]  ;;  %vm1358_vm14 = vcmask 1040384  }
  0x36   : > { %v431_v42 = vld [vmem:[#allocation2 + $0x2c] sm:$0x1]  ;;  %v341_v10 = vor.u32 %v339_v63, %v338_v62  ;;  %v342_v23 = vrot.slane %v338_v62, 4  ;;  %vm1360_vm15 = vcmask 254976  }
  0x37   : > { %v1746_v44 = vld [vmem:[#allocation2 + $0x2c] sm:$0x1]  ;;  %v518_v47 = vunpack.c.l.b16 %v431_v42  ;;  %819 = vrot.lane.b32.xlu2 %v811_v33, %s1577_s21  ;;  %v451_v61 = vld [vmem:[#allocation2 + $0x14] sm:$0x1]  ;;  %v544_v26 = vor.u32 %v543_v13, %v539_v12 }
  0x38   : > { %683 = vrot.lane.b32.xlu0 %v671_v21, %s1576_s20  ;;  %v703_v49 = vunpack.c.l.b16 %v1746_v44  ;;  %v700_v9 = vunpack.c.l.b16 %v451_v61  ;;  %v407_v24 = vsel %vm1660_vm6, %v341_v10, %v406_v15  ;;  %v410_v34 = vsel %vm1611_vm3, %v342_v23, %v409_v25  ;;  %v468_v42 = vld [vmem:[#allocation2 + $0x18] sm:$0xf]  ;;  %v462_v61 = vld [vmem:[#allocation2 + $0x28] sm:$0xe] }
  0x39   : > { %v624_v56 = vpack.c.b16 %v518_v47, %v616_v22  ;;  %v528_v57 = vpack.c.b16 %v518_v47, %v517_v38  ;;  %v455_v21 = vld [vmem:[#allocation2 + $0x34] sm:$0x1]  ;;  %408 = vst [vmem:[#allocation2 + $0x38] sm:$0xf] %v407_v24 }
  0x3a   : > { %v711_v4 = vpack.c.b16 %v703_v49, %v1711_v6  ;;  %v708_v19 = vpack.c.b16 %v700_v9, %v1692_v36  ;;  %v310_v6 = vrot.slane %v1723_v18, 4  ;;  %v385_v22 = vld [vmem:[#allocation2 + $0x1c] sm:$0x1]  ;;  %v467_v36 = vld [vmem:[#allocation2 + $0x10] sm:$0xf]  ;;  %v704_v32 = vunpack.c.l.b16 %v455_v21 }
  0x3b   : > { %v632_v0 = vrot.slane %v624_v56, 1  ;;  %v569_v8 = vshll.u32 %v528_v57, 16  ;;  %v567_v16 = vshrl.u32 %v528_v57, 16  ;;  %v1762_v18 = vld [vmem:[#allocation2 + $0x14] sm:$0x1]  ;;  %v804_v37 = vpack.c.b16 %v700_v9, %v796_v29 }
  0x3c   : > { %637 = vrot.lane.b32.xlu1 %v628_v46, %s1574_s18  ;;  %v746_v50 = vshll.u32 %v711_v4, 16  ;;  %v744_v27 = vshrl.u32 %v711_v4, 16  ;;  %v725_v31 = vshll.u32 %v708_v19, 16  ;;  %v386_v33 = vsel %vm1611_vm3, %v310_v6, %v385_v22  ;;  %411 = vst [vmem:[#allocation2 + $0x3c] sm:$0x1] %v410_v34 }
  0x3d   : > { %v571_v17 = vrot.slane %v569_v8, 1  ;;  %387 = vst [vmem:[#allocation2 + $0x1c] sm:$0x1] %v386_v33  ;;  %v843_v38 = vunpack.c.l.b16 %v467_v36  ;;  %v883_v39 = vunpack.c.l.b16 %v1762_v18  ;;  %v723_v40 = vshrl.u32 %v708_v19, 16  ;;  %v1782_v8 = vld [vmem:[#allocation2 + $0x14] sm:$0x1] }
  0x3e   : > { %v748_v28 = vrot.slane %v746_v50, 1  ;;  %v727_v41 = vrot.slane %v725_v31, 1  ;;  %v712_v43 = vpack.c.b16 %v704_v32, %v1704_v53  ;;  %v812_v45 = vrot.slane %v804_v37, 1  ;;  %v1788_v50 = vld [vmem:[#allocation2 + $0x34] sm:$0x1]  ;;  %v1510_v18 = vld [vmem:[%s2087_s1] sm:$0xff] }
  0x3f   : > { %595 = vrot.lane.b32.xlu2 %v565_v5, %s1575_s19  ;;  %v572_v30 = vor.u32 %v571_v17, %v567_v16  ;;  %v844_v46 = vunpack.c.l.b16 %v468_v42  ;;  %v891_v47 = vpack.c.b16 %v883_v39, %v843_v38  ;;  %v851_v62 = vpack.c.b16 %v843_v38, %v843_v38  ;;  %v1780_v5 = vld [vmem:[#allocation2 + $0x10] sm:$0xf]  ;;  %v437_v34 = vld [vmem:[#allocation2 + $0x18] sm:$0xe]  ;;  %v249_v42 = vld [vmem:[#allocation2 + $0x44] sm:$0x1] }
  0x40   : > { %645 = vrot.lane.b32.xlu0 %v632_v0, %s1574_s18  ;;  %v749_v35 = vor.u32 %v748_v28, %v744_v27  ;;  %v728_v48 = vor.u32 %v727_v41, %v723_v40  ;;  %v753_v51 = vshll.u32 %v712_v43, 16  ;;  %v751_v56 = vshrl.u32 %v712_v43, 16  ;;  %v472_v15 = vld [vmem:[#allocation2 + $0x38] sm:$0xf]  ;;  %v471_v19 = vld [vmem:[#allocation2 + $0x30] sm:$0xf] }
  0x41   : > { %v852_v52 = vpack.c.b16 %v844_v46, %v844_v46  ;;  %v902_v54 = vshll.u32 %v891_v47, 16  ;;  %v900_v63 = vshrl.u32 %v891_v47, 16  ;;  %v799_v4 = vunpack.c.l.b16 %v462_v61  ;;  %v217_v40 = vld [vmem:[#allocation2 + $0x40] sm:$0x1] }
  0x42   : > { %v755_v57 = vrot.slane %v753_v51, 1  ;;  %v511_v12 = vunpack.c.l.b16 %v1780_v5  ;;  %v512_v13 = vunpack.c.l.b16 %v1782_v8  ;;  %v887_v6 = vunpack.c.l.b16 %v1788_v50 }
  0x43   : > { %v904_v0 = vrot.slane %v902_v54, 1  ;;  %v807_v16 = vpack.c.b16 %v703_v49, %v799_v4  ;;  %v1795_v59 = vld [vmem:[#allocation2 + $0x3c] sm:$0x1]  ;;  %v848_v22 = vunpack.c.l.b16 %v472_v15  ;;  %v847_v49 = vunpack.c.l.b16 %v471_v19 }
  0x44   : > { %771 = vrot.lane.b32.xlu1 %v721_v11, %s1578_s22  ;;  %v1777_v53 = vld [vmem:[#allocation2 + $0x1c] sm:$0x1]  ;;  %v756_v3 = vor.u32 %v755_v57, %v751_v56  ;;  %v808_v11 = vpack.c.b16 %v704_v32, %v800_v2  ;;  %v525_v23 = vpack.c.b16 %v512_v13, %v511_v12  ;;  %v888_v24 = vunpack.c.l.b16 %v1795_v59  ;;  %v1818_v2 = vld [vmem:[#allocation2 + $0x38] sm:$0xf] }
  0x45   : > { %v884_v9 = vunpack.c.l.b16 %v1777_v53  ;;  %v905_v10 = vor.u32 %v904_v0, %v900_v63  ;;  %v815_v44 = vrot.slane %v807_v16, 1  ;;  %v856_v27 = vpack.c.b16 %v848_v22, %v848_v22  ;;  %v429_v33 = vld [vmem:[#allocation2 + $0x1c] sm:$0x1] }
  0x46   : > { %v816_v21 = vrot.slane %v808_v11, 1  ;;  %v548_v28 = vshll.u32 %v525_v23, 16  ;;  %v896_v29 = vpack.c.b16 %v888_v24, %v848_v22  ;;  %v1534_v32 = vunpack.c.h.bf16 %v1708_v58  ;;  %v432_v11 = vld [vmem:[#allocation2 + $0x34] sm:$0x1] }
  0x47   : > { %597 = vrot.lane.b32.xlu2 %v572_v30, %s1575_s19  ;;  %v892_v17 = vpack.c.b16 %v884_v9, %v844_v46  ;;  %v546_v30 = vshrl.u32 %v525_v23, 16  ;;  %v855_v37 = vpack.c.b16 %v847_v49, %v847_v49  ;;  %v218_v46 = vsel %vm1611_vm3, 0, %v217_v40 }
  0x48   : > { %589 = vrot.lane.b32.xlu0 %v544_v26, %s1575_s19  ;;  %v895_v26 = vpack.c.b16 %v887_v6, %v847_v49  ;;  %v278_v41 = vmax.f32 %v1534_v32, 0.0  ;;  %v550_v43 = vrot.slane %v548_v28, 1  ;;  %v250_v47 = vsel %vm1626_vm5, 0, %v249_v42  ;;  %219 = vst [vmem:[#allocation2 + $0x40] sm:$0x1] %v218_v46 }
  0x49   : > { %v909_v25 = vshll.u32 %v892_v17, 16  ;;  %v907_v31 = vshrl.u32 %v892_v17, 16  ;;  %v614_v54 = vunpack.c.l.b16 %v437_v34  ;;  %251 = vst [vmem:[#allocation2 + $0x44] sm:$0x1] %v250_v47  ;;  %v935_v63 = vshrl.u32 %v896_v29, 16 }
  0x4a   : > { %v930_v38 = vshll.u32 %v895_v26, 16  ;;  %v286_v51 = vpack.c.bf16 %v278_v41, %v278_v41  ;;  %v928_v56 = vshrl.u32 %v895_v26, 16  ;;  %v521_v17 = vunpack.c.l.b16 %v1818_v2  ;;  %v441_v46 = vld [vmem:[#allocation2 + $0x38] sm:$0xe] }
  0x4b   : > { %v911_v36 = vrot.slane %v909_v25, 1  ;;  %v520_v25 = vunpack.c.l.b16 %v432_v11 }
  0x4c   : > { %779 = vrot.lane.b32.xlu1 %v749_v35, %s1578_s22  ;;  %v1809_v35 = vld [vmem:[#allocation2 + $0x18] sm:$0xf]  ;;  %v932_v57 = vrot.slane %v930_v38, 1  ;;  %v344_v61 = vshrl.u32 %v286_v51, 16  ;;  %v347_v15 = vshll.u32 %v286_v51, 16 }
  0x4d   : > { %v912_v58 = vor.u32 %v911_v36, %v907_v31 }
  0x4e   : > { %v346_v12 = vrot.slane %v344_v61, 7 }
  0x4f   : > { %773 = vrot.lane.b32.xlu2 %v728_v48, %s1578_s22  ;;  %v513_v48 = vunpack.c.l.b16 %v1809_v35  ;;  %v412_v26 = vld [vmem:[#allocation2 + $0x40] sm:$0xf] }
  0x50   : > { %821 = vrot.lane.b32.xlu0 %v812_v45, %s1577_s21  ;;  %v937_v45 = vshll.u32 %v896_v29, 16  ;;  %v350_v22 = vrot.slane %v346_v12, 4 }
  0x52   : > { %v939_v0 = vrot.slane %v937_v45, 1 }
  0x54   : > { %861 = vrot.lane.b32.xlu1 %v852_v52, %s1579_s23  ;;  %v514_v52 = vunpack.c.l.b16 %v429_v33  ;;  %v940_v23 = vor.u32 %v939_v0, %v935_v63 }
  0x56   : > { %v526_v4 = vpack.c.b16 %v514_v52, %v513_v48  ;;  %v622_v16 = vpack.c.b16 %v514_v52, %v614_v54  ;;  %v440_v52 = vld [vmem:[#allocation2 + $0x30] sm:$0xe]  ;;  %v445_v54 = vld [vmem:[#allocation2 + $0x20] sm:$0xf] }
  0x57   : > { %781 = vrot.lane.b32.xlu2 %v756_v3, %s1578_s22  ;;  %v433_v3 = vld [vmem:[#allocation2 + $0x3c] sm:$0x1]  ;;  %v662_v63 = vunpack.c.l.b16 %v445_v54 }
  0x58   : > { %859 = vrot.lane.b32.xlu0 %v851_v62, %s1579_s23  ;;  %v551_v62 = vor.u32 %v550_v43, %v546_v30  ;;  %v522_v19 = vunpack.c.l.b16 %v433_v3  ;;  %v555_v28 = vshll.u32 %v526_v4, 16  ;;  %v415_v30 = vld [vmem:[#allocation2 + $0x44] sm:$0x1]  ;;  %v630_v32 = vrot.slane %v622_v16, 1  ;;  %v220_v16 = vld [vmem:[#allocation2 + $0x48] sm:$0x1] }
  0x59   : > { %v416_v31 = vsel %vm1611_vm3, %v350_v22, %v415_v30  ;;  %v553_v38 = vshrl.u32 %v526_v4, 16  ;;  %v1517_v54 = vld [vmem:[%s2087_s1 + $0x38] sm:$0xff] }
  0x5a   : > { %v530_v36 = vpack.c.b16 %v522_v19, %v521_v17  ;;  %417 = vst [vmem:[#allocation2 + $0x44] sm:$0x1] %v416_v31  ;;  %v557_v55 = vrot.slane %v555_v28, 1  ;;  %v252_v17 = vld [vmem:[#allocation2 + $0x4c] sm:$0x1]  ;;  %1250 = vmatpush.bf16.msra.mxu0 %v1517_v54  ;;  %1538 = vmatpush.bf16.msra.mxu2 %v1517_v54 }
  0x5c   : > { %955 = vrot.lane.b32.xlu1 %v905_v10, %s1580_s24  ;;  %v1821_v10 = vld [vmem:[#allocation2 + $0x30] sm:$0xf]  ;;  %v583_v40 = vshll.u32 %v530_v36, 16  ;;  %v558_v45 = vor.u32 %v557_v55, %v553_v38  ;;  %v581_v47 = vshrl.u32 %v530_v36, 16 }
  0x5d   : > { %v519_v49 = vunpack.c.l.b16 %v1821_v10 }
  0x5f   : > { %827 = vrot.lane.b32.xlu2 %v815_v44, %s1577_s21  ;;  %v613_v44 = vunpack.c.l.b16 %v436_v60  ;;  %v529_v34 = vpack.c.b16 %v520_v25, %v519_v49 }
  0x60   : > { %829 = vrot.lane.b32.xlu0 %v816_v21, %s1577_s21  ;;  %v349_v21 = vor.u32 %v347_v15, %v346_v12 }
  0x61   : > { %v621_v33 = vpack.c.b16 %v512_v13, %v613_v44  ;;  %v576_v43 = vshll.u32 %v529_v34, 16  ;;  %v618_v13 = vunpack.c.l.b16 %v441_v46  ;;  %v574_v48 = vshrl.u32 %v529_v34, 16  ;;  %v460_v34 = vld [vmem:[#allocation2 + $0x18] sm:$0xe] }
  0x62   : > { %v413_v29 = vsel %vm1660_vm6, %v349_v21, %v412_v26  ;;  %v448_v21 = vld [vmem:[#allocation2 + $0x38] sm:$0xf]  ;;  %v670_v26 = vpack.c.b16 %v662_v63, %v662_v63 }
  0x63   : > { %414 = vst [vmem:[#allocation2 + $0x40] sm:$0xf] %v413_v29  ;;  %v629_v41 = vrot.slane %v621_v33, 1  ;;  %v578_v51 = vrot.slane %v576_v43, 1  ;;  %v626_v61 = vpack.c.b16 %v522_v19, %v618_v13  ;;  %v253_v19 = vsel %vm1626_vm5, 0, %v252_v17 }
  0x64   : > { %869 = vrot.lane.b32.xlu1 %v856_v27, %s1579_s23  ;;  %v933_v27 = vor.u32 %v932_v57, %v928_v56  ;;  %v453_v56 = vld [vmem:[#allocation2 + $0x24] sm:$0x1]  ;;  %v452_v57 = vld [vmem:[#allocation2 + $0x1c] sm:$0x1]  ;;  %254 = vst [vmem:[#allocation2 + $0x4c] sm:$0x1] %v253_v19  ;;  %v665_v49 = vunpack.c.l.b16 %v448_v21  ;;  %v797_v43 = vunpack.c.l.b16 %v460_v34 }
  0x65   : > { %v702_v0 = vunpack.c.l.b16 %v453_v56  ;;  %v579_v3 = vor.u32 %v578_v51, %v574_v48  ;;  %v701_v4 = vunpack.c.l.b16 %v452_v57  ;;  %v634_v11 = vrot.slane %v626_v61, 1  ;;  %v469_v48 = vld [vmem:[#allocation2 + $0x20] sm:$0xf]  ;;  %v464_v17 = vld [vmem:[#allocation2 + $0x38] sm:$0xe] }
  0x66   : > { %v673_v29 = vpack.c.b16 %v665_v49, %v665_v49  ;;  %v845_v57 = vunpack.c.l.b16 %v469_v48  ;;  %v470_v21 = vld [vmem:[#allocation2 + $0x28] sm:$0xf]  ;;  %v1872_v19 = vld [vmem:[#allocation2 + $0x24] sm:$0x1] }
  0x67   : > { %957 = vrot.lane.b32.xlu2 %v912_v58, %s1580_s24  ;;  %v585_v58 = vrot.slane %v583_v40, 1  ;;  %v710_v15 = vpack.c.b16 %v702_v0, %v662_v63  ;;  %v1514_v34 = vld [vmem:[%s2087_s1 + $0x20] sm:$0xff] }
  0x68   : > { %867 = vrot.lane.b32.xlu0 %v855_v37, %s1579_s23  ;;  %v444_v37 = vld [vmem:[#allocation2 + $0x18] sm:$0xf] }
  0x69   : > { %v661_v42 = vunpack.c.l.b16 %v444_v37  ;;  %v586_v60 = vor.u32 %v585_v58, %v581_v47  ;;  %v737_v30 = vshrl.u32 %v710_v15, 16  ;;  %v1847_v37 = vld [vmem:[#allocation2 + $0x3c] sm:$0x1] }
  0x6a   : > { %v449_v36 = vld [vmem:[#allocation2 + $0x40] sm:$0xf] }
  0x6b   : > { %v669_v8 = vpack.c.b16 %v661_v42, %v661_v42  ;;  %v709_v22 = vpack.c.b16 %v701_v4, %v661_v42  ;;  %v666_v55 = vunpack.c.l.b16 %v449_v36  ;;  %v885_v36 = vunpack.c.l.b16 %v1872_v19 }
  0x6c   : > { %591 = vrot.lane.b32.xlu1 %v551_v62, %s1575_s19  ;;  %v617_v62 = vunpack.c.l.b16 %v440_v52 }
  0x6d   : > { %v732_v28 = vshll.u32 %v709_v22, 16  ;;  %v730_v7 = vshrl.u32 %v709_v22, 16  ;;  %v674_v61 = vpack.c.b16 %v666_v55, %v666_v55  ;;  %v1868_v22 = vld [vmem:[#allocation2 + $0x2c] sm:$0x1] }
  0x6e   : > { %v625_v12 = vpack.c.b16 %v520_v25, %v617_v62  ;;  %v739_v25 = vshll.u32 %v710_v15, 16  ;;  %v465_v62 = vld [vmem:[#allocation2 + $0x40] sm:$0xe] }
  0x6f   : > { %963 = vrot.lane.b32.xlu2 %v933_v27, %s1580_s24  ;;  %v461_v27 = vld [vmem:[#allocation2 + $0x20] sm:$0xe]  ;;  %v734_v33 = vrot.slane %v732_v28, 1  ;;  %v846_v28 = vunpack.c.l.b16 %v470_v21 }
  0x70   : > { %965 = vrot.lane.b32.xlu0 %v940_v23, %s1580_s24  ;;  %v221_v23 = vsel %vm1611_vm3, 0, %v220_v16  ;;  %v633_v44 = vrot.slane %v625_v12, 1  ;;  %v741_v31 = vrot.slane %v739_v25, 1  ;;  %v798_v1 = vunpack.c.l.b16 %v461_v27  ;;  %v1515_v25 = vld [vmem:[%s2087_s1 + $0x28] sm:$0xff] }
  0x71   : > { %222 = vst [vmem:[#allocation2 + $0x48] sm:$0x1] %v221_v23  ;;  %v735_v46 = vor.u32 %v734_v33, %v730_v7  ;;  %v802_v12 = vunpack.c.l.b16 %v465_v62  ;;  %v801_v27 = vunpack.c.l.b16 %v464_v17  ;;  %v854_v54 = vpack.c.b16 %v846_v28, %v846_v28  ;;  %v1512_v62 = vld [vmem:[%s2087_s1 + $0x10] sm:$0xff] }
  0x72   : > { %v806_v42 = vpack.c.b16 %v702_v0, %v798_v1 }
  0x74   : > { %641 = vrot.lane.b32.xlu1 %v630_v32, %s1574_s18  ;;  %v457_v32 = vld [vmem:[#allocation2 + $0x44] sm:$0x1]  ;;  %v814_v58 = vrot.slane %v806_v42, 1  ;;  %v473_v42 = vld [vmem:[#allocation2 + $0x40] sm:$0xf] }
  0x75   : > { %v706_v40 = vunpack.c.l.b16 %v457_v32  ;;  %v849_v48 = vunpack.c.l.b16 %v473_v42  ;;  %v486_v42 = vld [vmem:[#allocation2 + $0x28] sm:$0xe] }
  0x77   : > { %593 = vrot.lane.b32.xlu2 %v558_v45, %s1575_s19  ;;  %v705_v45 = vunpack.c.l.b16 %v1847_v37  ;;  %v714_v47 = vpack.c.b16 %v706_v40, %v666_v55 }
  0x78   : > { %639 = vrot.lane.b32.xlu0 %v629_v41, %s1574_s18  ;;  %v742_v41 = vor.u32 %v741_v31, %v737_v30  ;;  %v474_v30 = vld [vmem:[#allocation2 + $0x48] sm:$0xf]  ;;  %v1881_v31 = vld [vmem:[#allocation2 + $0x4c] sm:$0x1] }
  0x79   : > { %v713_v13 = vpack.c.b16 %v705_v45, %v665_v49  ;;  %v767_v52 = vshll.u32 %v714_v47, 16  ;;  %v765_v0 = vshrl.u32 %v714_v47, 16  ;;  %v1886_v7 = vunpack.c.l.b16 %v474_v30  ;;  %v1511_v30 = vld [vmem:[%s2087_s1 + $0x8] sm:$0xff] }
  0x7a   : > { %v890_v33 = vunpack.c.l.b16 %v1881_v31  ;;  %v809_v55 = vpack.c.b16 %v705_v45, %v801_v27 }
  0x7b   : > { %v758_v15 = vshrl.u32 %v713_v13, 16 }
  0x7c   : > { %679 = vrot.lane.b32.xlu1 %v669_v8, %s1576_s20  ;;  %v805_v8 = vpack.c.b16 %v701_v4, %v797_v43  ;;  %v1516_v4 = vld [vmem:[%s2087_s1 + $0x30] sm:$0xff]  ;;  %v893_v43 = vpack.c.b16 %v885_v36, %v845_v57  ;;  %v898_v45 = vpack.c.b16 %v890_v33, %v1886_v7 }
  0x7d   : > { %1251 = vmatpush.bf16.msra.mxu0 %v1516_v4  ;;  %1539 = vmatpush.bf16.msra.mxu2 %v1516_v4 }
  0x7e   : > { %v813_v56 = vrot.slane %v805_v8, 1  ;;  %v1513_v8 = vld [vmem:[%s2087_s1 + $0x18] sm:$0xff] }
  0x7f   : > { %599 = vrot.lane.b32.xlu2 %v579_v3, %s1575_s19  ;;  %v769_v3 = vrot.slane %v767_v52, 1 }
  0x80   : > { %601 = vrot.lane.b32.xlu0 %v586_v60, %s1575_s19  ;;  %v760_v60 = vshll.u32 %v713_v13, 16  ;;  %v817_v13 = vrot.slane %v809_v55, 1 }
  0x81   : > { %v770_v49 = vor.u32 %v769_v3, %v765_v0  ;;  %1252 = vmatpush.bf16.msra.mxu0 %v1515_v25  ;;  %1540 = vmatpush.bf16.msra.mxu2 %v1515_v25  ;;  %v857_v0 = vpack.c.b16 %v849_v48, %v849_v48 }
  0x82   : > { %v762_v16 = vrot.slane %v760_v60, 1  ;;  %v951_v60 = vshll.u32 %v898_v45, 16 }
  0x84   : > { %649 = vrot.lane.b32.xlu1 %v634_v11, %s1574_s18  ;;  %v853_v11 = vpack.c.b16 %v845_v57, %v845_v57  ;;  %v763_v1 = vor.u32 %v762_v16, %v758_v15  ;;  %v483_v15 = vld [vmem:[#allocation2 + $0x10] sm:$0xe]  ;;  %v484_v16 = vld [vmem:[#allocation2 + $0x18] sm:$0xe]  ;;  %v953_v27 = vrot.slane %v951_v60, 1 }
  0x85   : > { %1253 = vmatpush.bf16.msra.mxu0 %v1514_v34  ;;  %1541 = vmatpush.bf16.msra.mxu2 %v1514_v34  ;;  %v979_v21 = vunpack.c.l.b16 %v483_v15 }
  0x87   : > { %681 = vrot.lane.b32.xlu2 %v670_v26, %s1576_s20  ;;  %v810_v26 = vpack.c.b16 %v706_v40, %v802_v12  ;;  %v987_v34 = vpack.c.b16 %v883_v39, %v979_v21  ;;  %v1518_v39 = vld [vmem:[%s2087_s1 + $0x40] sm:$0xff] }
  0x88   : > { %647 = vrot.lane.b32.xlu0 %v633_v44, %s1574_s18  ;;  %1286 = vmatpush.bf16.msra.mxu1 %v1518_v39  ;;  %s1509_s18 = sshll.u32 %s2097_s13, 6 }
  0x89   : > { %v1849_v38 = vpop.permute.xlu2 %643  ;;  %v818_v37 = vrot.slane %v810_v26, 1  ;;  %1254 = vmatpush.bf16.msra.mxu0 %v1513_v8  ;;  %1542 = vmatpush.bf16.msra.mxu2 %v1513_v8  ;;  %v949_v26 = vshrl.u32 %v898_v45, 16  ;;  %v995_v45 = vrot.slane %v987_v34, 1 }
  0x8a   : > { %1546 = vmatpush.bf16.msra.mxu3 %v1518_v39 }
  0x8b   : > { %v1139_v53 = vunpack.c.l.b16 %v995_v45 }
  0x8c   : > { %687 = vrot.lane.b32.xlu1 %v673_v29, %s1576_s20  ;;  %v886_v29 = vunpack.c.l.b16 %v1868_v22 }
  0x8d   : > { %1255 = vmatpush.bf16.msra.mxu0 %v1512_v62  ;;  %1543 = vmatpush.bf16.msra.mxu2 %v1512_v62 }
  0x8e   : > { %v894_v40 = vpack.c.b16 %v886_v29, %v846_v28 }
  0x8f   : > { %775 = vrot.lane.b32.xlu2 %v735_v46, %s1578_s22 }
  0x90   : > { %777 = vrot.lane.b32.xlu0 %v742_v41, %s1578_s22  ;;  %v1895_v41 = vld [vmem:[#allocation2 + $0x44] sm:$0x1]  ;;  %v923_v52 = vshll.u32 %v894_v40, 16  ;;  %v921_v3 = vshrl.u32 %v894_v40, 16  ;;  %v485_v40 = vld [vmem:[#allocation2 + $0x20] sm:$0xe] }
  0x91   : > { %v1855_v51 = vpop.permute.xlu2 %819  ;;  %1256 = vmatpush.bf16.msra.mxu0 %v1511_v30  ;;  %1544 = vmatpush.bf16.msra.mxu2 %v1511_v30 }
  0x92   : > { %v925_v4 = vrot.slane %v923_v52, 1  ;;  %v954_v52 = vor.u32 %v953_v27, %v949_v26  ;;  %v488_v26 = vld [vmem:[#allocation2 + $0x38] sm:$0xe] }
  0x93   : > { %v984_v30 = vunpack.c.l.b16 %v488_v26 }
  0x94   : > { %825 = vrot.lane.b32.xlu1 %v814_v58, %s1577_s21  ;;  %v889_v58 = vunpack.c.l.b16 %v1895_v41 }
  0x95   : > { %1257 = vmatpush.bf16.msra.mxu0 %v1510_v18  ;;  %1545 = vmatpush.bf16.msra.mxu2 %v1510_v18  ;;  %v992_v34 = vpack.c.b16 %v888_v24, %v984_v30 }
  0x96   : > { %v1861_v63 = vpop.permute.xlu1 %635 }
  0x97   : > { %689 = vrot.lane.b32.xlu2 %v674_v61, %s1576_s20  ;;  %v897_v61 = vpack.c.b16 %v889_v58, %v849_v48  ;;  %v982_v48 = vunpack.c.l.b16 %v486_v42  ;;  %v1000_v42 = vrot.slane %v992_v34, 1 }
  0x98   : > { %823 = vrot.lane.b32.xlu0 %v813_v56, %s1577_s21  ;;  %v916_v56 = vshll.u32 %v893_v43, 16 }
  0x99   : > { %v1874_v44 = vpop.permute.xlu2 %595  ;;  %v944_v28 = vshll.u32 %v897_v61, 16  ;;  %v990_v62 = vpack.c.b16 %v886_v29, %v982_v48  ;;  %v858_v29 = vpack.c.b16 %v1886_v7, %v1886_v7  ;;  %v1563_v48 = vld [vmem:[#allocation2] sm:$0xf] }
  0x9a   : > { %v1870_v23 = vpop.permute.xlu0 %587  ;;  %v918_v12 = vrot.slane %v916_v56, 1 }
  0x9b   : > { %v946_v56 = vrot.slane %v944_v28, 1 }
  0x9c   : > { %863 = vrot.lane.b32.xlu1 %v853_v11, %s1579_s23  ;;  %v914_v11 = vshrl.u32 %v893_v43, 16 }
  0x9e   : > { %v1884_v32 = vpop.permute.xlu1 %677  ;;  %v919_v55 = vor.u32 %v918_v12, %v914_v11 }
  0x9f   : > { %783 = vrot.lane.b32.xlu2 %v763_v1, %s1578_s22  ;;  %v926_v1 = vor.u32 %v925_v4, %v921_v3  ;;  %v998_v4 = vrot.slane %v990_v62, 1 }
  0xa0   : > { %785 = vrot.lane.b32.xlu0 %v770_v49, %s1578_s22  ;;  %v980_v49 = vunpack.c.l.b16 %v484_v16  ;;  %s1465_s22 = sshll.u32 %s2097_s13, 1 }
  0xa1   : > { %v1902_v47 = vpop.permute.xlu2 %597  ;;  %v1145_v22 = vunpack.c.l.b16 %v998_v4  ;;  %s181_s25 = scalar_lea.vmem %s2089_s3, %s1465_s22 }
  0xa2   : > { %v1900_v46 = vpop.permute.xlu0 %675 }
  0xa4   : > { %833 = vrot.lane.b32.xlu1 %v818_v37, %s1577_s21  ;;  %v988_v37 = vpack.c.b16 %v884_v9, %v980_v49  ;;  %v487_v49 = vld [vmem:[#allocation2 + $0x30] sm:$0xe] }
  0xa5   : > { %v983_v28 = vunpack.c.l.b16 %v487_v49 }
  0xa6   : > { %v1912_v57 = vpop.permute.xlu1 %685  ;;  %v996_v8 = vrot.slane %v988_v37, 1 }
  0xa7   : > { %865 = vrot.lane.b32.xlu2 %v854_v54, %s1579_s23  ;;  %v942_v54 = vshrl.u32 %v897_v61, 16 }
  0xa8   : > { %831 = vrot.lane.b32.xlu0 %v817_v13, %s1577_s21  ;;  %v981_v13 = vunpack.c.l.b16 %v485_v40  ;;  %v1141_v9 = vunpack.c.l.b16 %v996_v8  ;;  %s2045_s21 = scalar_lea.vmem %s2088_s2, %s1509_s18 }
  0xa9   : > { %v1923_v25 = vpop.permute.xlu2 %773  ;;  %v947_v19 = vor.u32 %v946_v56, %v942_v54 }
  0xaa   : > { %v1921_v17 = vpop.permute.xlu0 %683  ;;  %v989_v60 = vpack.c.b16 %v885_v36, %v981_v13  ;;  %v1149_v13 = vunpack.c.l.b16 %v1000_v42 }
  0xac   : > { %871 = vrot.lane.b32.xlu1 %v857_v0, %s1579_s23  ;;  %v1173_v0 = vpack.c.b16 %v1141_v9, %v1139_v53  ;;  %v997_v3 = vrot.slane %v989_v60, 1 }
  0xae   : > { %v638_v43 = vpop.permute.xlu1 %637  ;;  %v1143_v36 = vunpack.c.l.b16 %v997_v3  ;;  %1502 = vmatmul.msk.bf16.vlgmr.msra.gmra.mxu1 %vm1003_vm7, %v1173_v0  ;;  %v1564_v3 = vld [vmem:[#allocation2 + $0x20] sm:$0xf] }
  0xaf   : > { %959 = vrot.lane.b32.xlu2 %v919_v55, %s1580_s24  ;;  %v1018_v4 = vsel %vm1003_vm7, %v1564_v3, %v1874_v44 }
  0xb0   : > { %961 = vrot.lane.b32.xlu0 %v926_v1, %s1580_s24  ;;  %v1175_v15 = vpack.c.b16 %v1145_v22, %v1143_v36  ;;  %v991_v1 = vpack.c.b16 %v887_v6, %v983_v28  ;;  %v1038_v22 = vsel %vm1028_vm8, %v1018_v4, %v1849_v38 }
  0xb1   : > { %v1947_v11 = vpop.permute.xlu2 %781 }
  0xb2   : > { %v1945_v61 = vpop.permute.xlu0 %645  ;;  %1503 = vmatmul.msk.bf16.vlgmr.msra.gmra.mxu3 %vm1003_vm7, %v1175_v15  ;;  %v999_v40 = vrot.slane %v991_v1, 1 }
  0xb4   : > { %969 = vrot.lane.b32.xlu1 %v954_v52, %s1580_s24  ;;  %v1147_v8 = vunpack.c.l.b16 %v999_v40 }
  0xb6   : > { %v772_v12 = vpop.permute.xlu1 %771  ;;  %v1177_v59 = vpack.c.b16 %v1149_v13, %v1147_v8  ;;  %v489_v13 = vld [vmem:[#allocation2 + $0x40] sm:$0xe] }
  0xb7   : > { %873 = vrot.lane.b32.xlu2 %v858_v29, %s1579_s23  ;;  %v1055_v29 = vsel %vm1045_vm9, %v1038_v22, %v1921_v17 }
  0xb8   : > { %967 = vrot.lane.b32.xlu0 %v947_v19, %s1580_s24 }
  0xb9   : > { %v828_v21 = vpop.permute.xlu2 %827 }
  0xba   : > { %v590_v16 = vpop.permute.xlu0 %589 }
  0xbb   : > { %v1009_v7 = vsel %vm1003_vm7, %v1719_v14, %v590_v16  ;;  %v1006_v14 = vsel %vm1003_vm7, %v1563_v48, %v1870_v23  ;;  %v490_v48 = vld [vmem:[#allocation2 + $0x48] sm:$0xe] }
  0xbc   : > { %v1032_v37 = vsel %vm1028_vm8, %v1009_v7, %v638_v43  ;;  %v1030_v24 = vsel %vm1028_vm8, %v1006_v14, %v1861_v63 }
  0xbd   : > { %v1049_v50 = vsel %vm1045_vm9, %v1032_v37, %v1884_v32  ;;  %v1047_v52 = vsel %vm1045_vm9, %v1030_v24, %v1900_v46 }
  0xbe   : > { %v780_v27 = vpop.permute.xlu1 %779  ;;  %v1066_v43 = vsel %vm1062_vm10, %v1049_v50, %v1923_v25  ;;  %v1064_v32 = vsel %vm1062_vm10, %v1047_v52, %v772_v12  ;;  %v985_v50 = vunpack.c.l.b16 %v489_v13 }
  0xbf   : > { %v1081_v39 = vsel %vm1079_vm12, %v1064_v32, %v1855_v51  ;;  %v1021_v51 = vsel %vm1003_vm7, %v1726_v20, %v1902_v47  ;;  %v1072_v15 = vsel %vm1062_vm10, %v1055_v29, %v780_v27 }
  0xc0   : > { %v1040_v12 = vsel %vm1028_vm8, %v1021_v51, %v1945_v61  ;;  %v1089_v49 = vsel %vm1079_vm12, %v1072_v15, %v828_v21 }
  0xc1   : > { %v958_v45 = vpop.permute.xlu2 %957  ;;  %v1057_v44 = vsel %vm1045_vm9, %v1040_v12, %v1912_v57 }
  0xc2   : > { %v822_v55 = vpop.permute.xlu0 %821  ;;  %1504 = vmatmul.msk.bf16.gmra.mxu3 %vm1003_vm7, %v1177_v59  ;;  %v1074_v38 = vsel %vm1062_vm10, %v1057_v44, %v1947_v11  ;;  %v993_v59 = vpack.c.b16 %v889_v58, %v985_v50 }
  0xc3   : > { %v1083_v23 = vsel %vm1079_vm12, %v1066_v43, %v822_v55 }
  0xc4   : > { %v1001_v52 = vrot.slane %v993_v59, 1 }
  0xc6   : > { %v862_v6 = vpop.permute.xlu1 %861  ;;  %v1151_v32 = vunpack.c.l.b16 %v1001_v52 }
  0xc7   : > { %v1100_v54 = vsel %vm1096_vm11, %v1083_v23, %v862_v6  ;;  %v986_v6 = vunpack.c.l.b16 %v490_v48 }
  0xc8   : > { %v1117_v63 = vsel %vm1113_vm13, %v1100_v54, %v958_v45 }
  0xc9   : > { %v964_v18 = vpop.permute.xlu2 %963  ;;  %v1140_v46 = vunpack.c.l.b16 %v1117_v63  ;;  %v994_v24 = vpack.c.b16 %v890_v33, %v986_v6 }
  0xca   : > { %v860_v56 = vpop.permute.xlu0 %859 }
  0xcb   : > { %v1098_v25 = vsel %vm1096_vm11, %v1081_v39, %v860_v56  ;;  %v1002_v23 = vrot.slane %v994_v24, 1 }
  0xcd   : > { %v1153_v54 = vunpack.c.l.b16 %v1002_v23 }
  0xce   : > { %v956_v53 = vpop.permute.xlu1 %955 }
  0xcf   : > { %v1115_v9 = vsel %vm1113_vm13, %v1098_v25, %v956_v53 }
  0xd0   : > { %v1138_v60 = vunpack.c.l.b16 %v1115_v9 }
  0xd1   : > { %v594_v19 = vpop.permute.xlu2 %593 }
  0xd2   : > { %v830_v62 = vpop.permute.xlu0 %829  ;;  %v1172_v0 = vpack.c.b16 %v1140_v46, %v1138_v60  ;;  %v1015_v41 = vsel %vm1003_vm7, %v1809_v35, %v594_v19 }
  0xd3   : > { %v1091_v17 = vsel %vm1079_vm12, %v1074_v38, %v830_v62 }
  0xd4   : > { %1258 = vmatmul.bf16.vlgmr.msra.gmra.mxu0 %v1172_v0 }
  0xd6   : > { %v870_v36 = vpop.permute.xlu1 %869 }
  0xd7   : > { %v1108_v61 = vsel %vm1096_vm11, %v1091_v17, %v870_v36 }
  0xd9   : > { %v600_v47 = vpop.permute.xlu2 %599 }
  0xda   : > { %v868_v16 = vpop.permute.xlu0 %867  ;;  %v1024_v44 = vsel %vm1003_vm7, %v1821_v10, %v600_v47 }
  0xdb   : > { %v1106_v26 = vsel %vm1096_vm11, %v1089_v49, %v868_v16 }
  0xdc   : > { %v1123_v28 = vsel %vm1113_vm13, %v1106_v26, %v964_v18  ;;  %v1179_v18 = vpack.c.b16 %v1153_v54, %v1151_v32 }
  0xdd   : > { %v1146_v57 = vunpack.c.l.b16 %v1123_v28 }
  0xde   : > { %v592_v20 = vpop.permute.xlu1 %591  ;;  %1505 = vmatmul.msk.bf16.gmra.mxu3 %vm1003_vm7, %v1179_v18 }
  0xdf   : > { %v1012_v31 = vsel %vm1003_vm7, %v1780_v5, %v592_v20 }
  0xe1   : > { %v682_v34 = vpop.permute.xlu2 %681 }
  0xe2   : > { %v966_v27 = vpop.permute.xlu0 %965 }
  0xe3   : > { %v1125_v30 = vsel %vm1113_vm13, %v1108_v61, %v966_v27 }
  0xe4   : > { %v1148_v7 = vunpack.c.l.b16 %v1125_v30 }
  0xe6   : > { %v642_v1 = vpop.permute.xlu1 %641  ;;  %v1176_v21 = vpack.c.b16 %v1148_v7, %v1146_v57 }
  0xe7   : > { %v1036_v60 = vsel %vm1028_vm8, %v1015_v41, %v642_v1 }
  0xe8   : > { %1268 = vmatmul.bf16.vlgmr.msra.gmra.mxu2 %v1176_v21  ;;  %v1053_v4 = vsel %vm1045_vm9, %v1036_v60, %v682_v34 }
  0xe9   : > { %v776_v42 = vpop.permute.xlu2 %775 }
  0xea   : > { %v640_v37 = vpop.permute.xlu0 %639 }
  0xeb   : > { %v1034_v33 = vsel %vm1028_vm8, %v1012_v31, %v640_v37 }
  0xee   : > { %v680_v55 = vpop.permute.xlu1 %679 }
  0xef   : > { %v1051_v58 = vsel %vm1045_vm9, %v1034_v33, %v680_v55 }
  0xf0   : > { %v1068_v3 = vsel %vm1062_vm10, %v1051_v58, %v776_v42 }
  0xf1   : > { %v690_v8 = vpop.permute.xlu2 %689 }
  0xf2   : > { %v602_v40 = vpop.permute.xlu0 %601 }
  0xf3   : > { %v1027_v5 = vsel %vm1003_vm7, %v1818_v2, %v602_v40 }
  0xf6   : > { %v650_v11 = vpop.permute.xlu1 %649 }
  0xf7   : > { %v1044_v29 = vsel %vm1028_vm8, %v1027_v5, %v650_v11 }
  0xf8   : > { %v1061_v49 = vsel %vm1045_vm9, %v1044_v29, %v690_v8 }
  0xf9   : > { %v784_v63 = vpop.permute.xlu2 %783 }
  0xfa   : > { %v648_v45 = vpop.permute.xlu0 %647 }
  0xfb   : > { %v1042_v20 = vsel %vm1028_vm8, %v1024_v44, %v648_v45 }
  0xfe   : > { %v688_v14 = vpop.permute.xlu1 %687 }
  0xff   : > { %v1059_v28 = vsel %vm1045_vm9, %v1042_v20, %v688_v14 }
 0x100   : > { %v1076_v10 = vsel %vm1062_vm10, %v1059_v28, %v784_v63 }
 0x101   : > { %v866_v53 = vpop.permute.xlu2 %865 }
 0x102   : > { %v778_v43 = vpop.permute.xlu0 %777 }
 0x103   : > { %v1070_v51 = vsel %vm1062_vm10, %v1053_v4, %v778_v43 }
 0x106   : > { %v826_v56 = vpop.permute.xlu1 %825 }
 0x107   : > { %v1087_v22 = vsel %vm1079_vm12, %v1070_v51, %v826_v56 }
 0x108   : > { %v1104_v15 = vsel %vm1096_vm11, %v1087_v22, %v866_v53 }
 0x109   : > { %v960_v0 = vpop.permute.xlu2 %959 }
 0x10a   : > { %v824_v39 = vpop.permute.xlu0 %823 }
 0x10b   : > { %v1085_v36 = vsel %vm1079_vm12, %v1068_v3, %v824_v39 }
 0x10e   : > { %v864_v25 = vpop.permute.xlu1 %863 }
 0x10f   : > { %v1102_v35 = vsel %vm1096_vm11, %v1085_v36, %v864_v25 }
 0x110   : > { %v1119_v12 = vsel %vm1113_vm13, %v1102_v35, %v960_v0 }
 0x111   : > { %v1142_v38 = vunpack.c.l.b16 %v1119_v12  ;;  %v874_v27 = vpop.permute.xlu2 %873 }
 0x112   : > { %v786_v9 = vpop.permute.xlu0 %785 }
 0x113   : > { %v1078_v2 = vsel %vm1062_vm10, %v1061_v49, %v786_v9 }
 0x116   : > { %v834_v46 = vpop.permute.xlu1 %833 }
 0x117   : > { %v1095_v61 = vsel %vm1079_vm12, %v1078_v2, %v834_v46 }
 0x118   : > { %v1112_v47 = vsel %vm1096_vm11, %v1095_v61, %v874_v27 }
 0x11a   : > { %v832_v62 = vpop.permute.xlu0 %831 }
 0x11b   : > { %v1093_v57 = vsel %vm1079_vm12, %v1076_v10, %v832_v62 }
 0x11e   : > { %v872_v19 = vpop.permute.xlu1 %871 }
 0x11f   : > { %v1110_v21 = vsel %vm1096_vm11, %v1093_v57, %v872_v19 }
 0x122   : > { %v962_v16 = vpop.permute.xlu0 %961 }
 0x123   : > { %v1121_v26 = vsel %vm1113_vm13, %v1104_v15, %v962_v16 }
 0x124   : > { %v1144_v17 = vunpack.c.l.b16 %v1121_v26 }
 0x126   : > { %v970_v30 = vpop.permute.xlu1 %969  ;;  %v1174_v7 = vpack.c.b16 %v1144_v17, %v1142_v38 }
 0x127   : > { %v1129_v1 = vsel %vm1113_vm13, %v1112_v47, %v970_v30 }
 0x128   : > { %1263 = vmatmul.bf16.gmra.mxu0 %v1174_v7  ;;  %v1152_v55 = vunpack.c.l.b16 %v1129_v1 }
 0x12a   : > { %v968_v34 = vpop.permute.xlu0 %967 }
 0x12b   : > { %v1127_v37 = vsel %vm1113_vm13, %v1110_v21, %v968_v34  ;;  %v1288_v11 = vpop.f32.mrf.mxu1 }
 0x12c   : > { %v1150_v40 = vunpack.c.l.b16 %v1127_v37 }
 0x12e   : > { %v1178_v42 = vpack.c.b16 %v1152_v55, %v1150_v40 }
 0x130   : > { %1273 = vmatmul.bf16.gmra.mxu2 %v1178_v42 }
 0x133   : > { %v1290_v48 = vpop.f32.mrf.mxu1 }
 0x135   : > { %v1293_v13 = vpop.f32.mrf.mxu3 }
 0x13d   : > { %v1295_v23 = vpop.f32.mrf.mxu3 }
 0x145   : > { %v1298_v18 = vpop.f32.mrf.mxu3 }
 0x14d   : > { %v1300_v25 = vpop.f32.mrf.mxu3 }
 0x151   : > { %v1259_v45 = vpop.f32.mrf.mxu0 }
 0x152   : > { %v1289_v8 = vadd.f32 %v1288_v11, %v1259_v45 }
 0x154   : > { %1362 = vst.msk [vmem:[%s2045_s21] sm:$0xff] %vm1028_vm8, %v1289_v8  ;;  %v1329_v50 = vmul.f32 %v1289_v8, %v1289_v8  ;;  %v1308_v59 = vsel %vm1028_vm8, %v1289_v8, 0.0 }
 0x156   : > { %v1337_v32 = vsel %vm1028_vm8, %v1329_v50, 0.0 }
 0x159   : > { %v1261_v14 = vpop.f32.mrf.mxu0 }
 0x15a   : > { %v1291_v6 = vadd.f32 %v1290_v48, %v1261_v14 }
 0x15c   : > { %v1309_v24 = vsel %vm1028_vm8, %v1291_v6, 0.0  ;;  %v1330_v43 = vmul.f32 %v1291_v6, %v1291_v6  ;;  %1363 = vst.msk [vmem:[%s2045_s21 + $0x8] sm:$0xff] %vm1028_vm8, %v1291_v6 }
 0x15d   : > { %v1310_v52 = vadd.f32 %v1309_v24, %v1308_v59 }
 0x15e   : > { %v1338_v54 = vsel %vm1028_vm8, %v1330_v43, 0.0 }
 0x15f   : > { %v1339_v56 = vadd.f32 %v1338_v54, %v1337_v32 }
 0x161   : > { %v1303_v35 = vpop.f32.mrf.mxu3 }
 0x169   : > { %v1305_v27 = vpop.f32.mrf.mxu3 }
 0x16b   : > { %v1269_v63 = vpop.f32.mrf.mxu2 }
 0x16c   : > { %v1299_v39 = vadd.f32 %v1298_v18, %v1269_v63 }
 0x16e   : > { %1366 = vst.msk [vmem:[%s2045_s21 + $0x20] sm:$0xff] %vm1028_vm8, %v1299_v39  ;;  %v1333_v3 = vmul.f32 %v1299_v39, %v1299_v39  ;;  %v1315_v5 = vsel %vm1028_vm8, %v1299_v39, 0.0 }
 0x170   : > { %v1344_v44 = vsel %vm1028_vm8, %v1333_v3, 0.0 }
 0x173   : > { %v1271_v53 = vpop.f32.mrf.mxu2 }
 0x174   : > { %v1301_v9 = vadd.f32 %v1300_v25, %v1271_v53 }
 0x176   : > { %1367 = vst.msk [vmem:[%s2045_s21 + $0x28] sm:$0xff] %vm1028_vm8, %v1301_v9  ;;  %v1334_v22 = vmul.f32 %v1301_v9, %v1301_v9  ;;  %v1317_v49 = vsel %vm1028_vm8, %v1301_v9, 0.0 }
 0x178   : > { %v1346_v2 = vsel %vm1028_vm8, %v1334_v22, 0.0 }
 0x1a5   : > { %v1264_v46 = vpop.f32.mrf.mxu0 }
 0x1a6   : > { %v1294_v41 = vadd.f32 %v1293_v13, %v1264_v46 }
 0x1a8   : > { %1364 = vst.msk [vmem:[%s2045_s21 + $0x10] sm:$0xff] %vm1028_vm8, %v1294_v41  ;;  %v1331_v31 = vmul.f32 %v1294_v41, %v1294_v41  ;;  %v1311_v33 = vsel %vm1028_vm8, %v1294_v41, 0.0 }
 0x1a9   : > { %v1312_v0 = vadd.f32 %v1311_v33, %v1310_v52 }
 0x1aa   : > { %v1340_v60 = vsel %vm1028_vm8, %v1331_v31, 0.0 }
 0x1ab   : > { %v1341_v51 = vadd.f32 %v1340_v60, %v1339_v56 }
 0x1ad   : > { %v1266_v58 = vpop.f32.mrf.mxu0 }
 0x1ae   : > { %v1296_v62 = vadd.f32 %v1295_v23, %v1266_v58 }
 0x1b0   : > { %v1313_v4 = vsel %vm1028_vm8, %v1296_v62, 0.0  ;;  %v1332_v36 = vmul.f32 %v1296_v62, %v1296_v62  ;;  %1365 = vst.msk [vmem:[%s2045_s21 + $0x18] sm:$0xff] %vm1028_vm8, %v1296_v62 }
 0x1b1   : > { %v1314_v19 = vadd.f32 %v1313_v4, %v1312_v0 }
 0x1b2   : > { %v1342_v29 = vsel %vm1028_vm8, %v1332_v36, 0.0 }
 0x1b3   : > { %v1316_v12 = vadd.f32 %v1315_v5, %v1314_v19  ;;  %v1343_v15 = vadd.f32 %v1342_v29, %v1341_v51  ;;  %v1274_v16 = vpop.f32.mrf.mxu2 }
 0x1b4   : > { %v1304_v26 = vadd.f32 %v1303_v35, %v1274_v16 }
 0x1b5   : > { %v1345_v20 = vadd.f32 %v1344_v44, %v1343_v15  ;;  %v1318_v38 = vadd.f32 %v1317_v49, %v1316_v12 }
 0x1b6   : > { %1368 = vst.msk [vmem:[%s2045_s21 + $0x30] sm:$0xff] %vm1028_vm8, %v1304_v26  ;;  %v1335_v28 = vmul.f32 %v1304_v26, %v1304_v26  ;;  %v1319_v61 = vsel %vm1028_vm8, %v1304_v26, 0.0 }
 0x1b7   : > { %v1347_v17 = vadd.f32 %v1346_v2, %v1345_v20  ;;  %v1320_v47 = vadd.f32 %v1319_v61, %v1318_v38 }
 0x1b8   : > { %v1348_v7 = vsel %vm1028_vm8, %v1335_v28, 0.0 }
 0x1b9   : > { %v1349_v21 = vadd.f32 %v1348_v7, %v1347_v17 }
 0x1bb   : > { %v1276_v30 = vpop.f32.mrf.mxu2 }
 0x1bc   : > { %v1306_v10 = vadd.f32 %v1305_v27, %v1276_v30 }
 0x1be   : > { %v1321_v57 = vsel %vm1028_vm8, %v1306_v10, 0.0  ;;  %v1336_v1 = vmul.f32 %v1306_v10, %v1306_v10  ;;  %1369 = vst.msk [vmem:[%s2045_s21 + $0x38] sm:$0xff] %vm1028_vm8, %v1306_v10 }
 0x1bf   : > { %v1322_v34 = vadd.f32 %v1321_v57, %v1320_v47 }
 0x1c0   : > { %v1350_v37 = vsel %vm1028_vm8, %v1336_v1, 0.0 }
 0x1c1   : > { %v1323_v55 = vrot.slane %v1322_v34, 4  ;;  %v1351_v40 = vadd.f32 %v1350_v37, %v1349_v21 }
 0x1c3   : > { %v1324_v42 = vadd.f32 %v1323_v55, %v1322_v34  ;;  %v1352_v11 = vrot.slane %v1351_v40, 4 }
 0x1c5   : > { %v1325_v45 = vrot.slane %v1324_v42, 2  ;;  %v1353_v8 = vadd.f32 %v1352_v11, %v1351_v40 }
 0x1c7   : > { %v1326_v13 = vadd.f32 %v1325_v45, %v1324_v42  ;;  %v1354_v48 = vrot.slane %v1353_v8, 2 }
 0x1c9   : > { %v1327_v14 = vrot.slane %v1326_v13, 1  ;;  %v1355_v50 = vadd.f32 %v1354_v48, %v1353_v8 }
 0x1cb   : > { %v1356_v6 = vrot.slane %v1355_v50, 1  ;;  %v1328_v59 = vadd.f32 %v1327_v14, %v1326_v13 }
 0x1cd   : > { %v1357_v24 = vadd.f32 %v1356_v6, %v1355_v50 }
 0x1cf   : > { %v1359_v43 = vsel %vm1358_vm14, %v1328_v59, %v1357_v24 }
 0x1d0   : > { %1361 = vst.msk [vmem:[%s181_s25] sm:$0x3] %vm1360_vm15, %v1359_v43 }
 0x1d1 PF: > { %s14_s12 = sadd.s32 1, %s1571_s12  }
 0x1d2   : > { %p11_p4 = scmp.ge.s32.totalorder %s14_s12, 4  }
 0x1d4   :  { %13 = sbr.rel (!%p11_p4) target bundleno = 1 (0x1), region = 73 }

// kernel: shake_block_forward.4
= control target key start
LH: loop header
LB: loop body
LE: loop exit
PB: predicated region body
PF: predicated region fallthrough
CT: control target
= control target key end

     0   :  { %s1804_s18 = smov 0   ;;  %s2393_s0 = inlined_call_operand.vmem [shape: f32[2,8,8,32], index: 0, kind: input, shape index: {}]   ;;  %s2394_s1 = inlined_call_operand.vmem [shape: f32[1,32], index: 1, kind: input, shape index: {}]   ;;  %s2395_s2 = inlined_call_operand.vmem [shape: f32[1,32], index: 2, kind: input, shape index: {}]   ;;  %s2396_s3 = inlined_call_operand.vmem [shape: bf16[288,32], index: 3, kind: input, shape index: {}]   ;;  %s2397_s4 = inlined_call_operand.vmem [shape: f32[2,8,8,32], index: 4, kind: output, shape index: {0}]   ;;  %s2398_s5 = inlined_call_operand.vmem [shape: f32[2,2,32], index: 5, kind: output, shape index: {1}]  }
   0x1 LB: > { %s1623_s19 = sadd.s32 4294967295, %s1768_s18   ;;  %p1627_p0 = scmp.ge.s32.totalorder %s1768_s18, 1  ;;  %s1768_s18 = sphi %s1804_s18, %s16_s18  }
   0x2   : > { %p190_p1 = scmp.lt.s32.totalorder %s1768_s18, 3 }
   0x4   : > { %p191_p2 = pnand %p1627_p0, %p190_p1 }
   0x5   : > { %p222_p3 = scmp.lt.s32.totalorder (!%p191_p2), %s1623_s19, 1  ;;  %s1771_s28 = smov (!%p191_p2), 64  }
   0x6   : > { %194 = sbr.rel (%p191_p2) target bundleno = 441 (0x1b9), region = 36  ;;  %s1772_s29 = smov (!%p191_p2), 32  }
   0x7   : > { %s1773_s30 = smov (!%p191_p2), 96  }
   0xb   : > { %vm277_vm0 = vcmask 257024   ;;  %vm279_vm1 = vcmask 253952   ;;  %v1770_v0 = vmov 0   ;;  %vm285_vm2 = vsmask.f32 256  ;;  %s2406_s19 = smov (!%p222_p3, %s1623_s19), 1 }
   0xc   : > { %278 = vst.msk [vmem:[#allocation2] sm:$0xf] %vm277_vm0, %v1770_v0  ;;  %vm317_vm3 = vsmask.f32 7938  ;;  %vm1816_vm4 = vmand %vm279_vm1, %vm285_vm2  ;;  %v1823_v2 = vld [vmem:[%s2394_s1] ss:$0 sm:$0xff] }
   0xd   : > { %280 = vst.msk [vmem:[#allocation2 + $0x4] sm:$0x1] %vm279_vm1, %v1770_v0  ;;  %v290_v3 = vld [vmem:[#allocation2 + $0x8] sm:$0x1]  ;;  %vm1826_vm5 = vmand %vm279_vm1, %vm317_vm3  ;;  %s1711_s22 = sshll.u32 %s2406_s19, 6  ;;  %vm1057_vm7 = vcmask 261120  }
   0xe   : > { %282 = vst.msk [vmem:[#allocation2 + $0x48] sm:$0xf] %vm277_vm0, %v1770_v0  ;;  %v291_v5 = vsel %vm1816_vm4, 0, %v290_v3  ;;  %v322_v6 = vld [vmem:[#allocation2 + $0xc] sm:$0x1]  ;;  %s1838_s25 = scalar_lea.vmem %s2393_s0, %s1711_s22  ;;  %vm1882_vm6 = vmand %vm277_vm0, %vm317_vm3  ;;  %vm1082_vm8 = vcmask 523264  }
   0xf   : > { %283 = vst.msk [vmem:[#allocation2 + $0x4c] sm:$0x1] %vm279_vm1, %v1770_v0  ;;  %v302_v7 = vld [vmem:[#allocation2 + $0x28] sm:$0x1]  ;;  %v1843_v8 = vld [vmem:[%s2395_s2] ss:$0 sm:$0xff] }
  0x10   : > { %292 = vst [vmem:[#allocation2 + $0x8] sm:$0x1] %v291_v5  ;;  %v323_v9 = vsel %vm1826_vm5, 0, %v322_v6  ;;  %v303_v10 = vsel %vm1816_vm4, 0, %v302_v7  ;;  %v237_v11 = vld [vmem:[%s1838_s25] sm:$0xff]  ;;  %v238_v13 = vld [vmem:[%s1838_s25 + $0x8] sm:$0xff] }
  0x11   : > { %324 = vst [vmem:[#allocation2 + $0xc] sm:$0x1] %v323_v9  ;;  %v241_v12 = vld [vmem:[%s1838_s25 + $0x20] sm:$0xff]  ;;  %v249_v15 = vmul.f32 %v1823_v2, %v237_v11  ;;  %v250_v17 = vmul.f32 %v1823_v2, %v238_v13  ;;  %v293_v18 = vld [vmem:[#allocation2 + $0x10] sm:$0x1]  ;;  %v240_v32 = vld [vmem:[%s1838_s25 + $0x18] sm:$0xff] }
  0x12   : > { %v253_v16 = vmul.f32 %v1823_v2, %v241_v12  ;;  %304 = vst [vmem:[#allocation2 + $0x28] sm:$0x1] %v303_v10  ;;  %v294_v21 = vsel %vm1816_vm4, 0, %v293_v18  ;;  %v325_v22 = vld [vmem:[#allocation2 + $0x14] sm:$0x1]  ;;  %v252_v39 = vmul.f32 %v1823_v2, %v240_v32  ;;  %vm1099_vm9 = vcmask 785408  }
  0x13   : > { %v287_v14 = vld [vmem:[#allocation2] sm:$0x1]  ;;  %v261_v24 = vadd.f32 %v1843_v8, %v249_v15  ;;  %v262_v26 = vadd.f32 %v1843_v8, %v250_v17  ;;  %v504_v27 = vld [vmem:[#allocation2] sm:$0xe]  ;;  %v239_v28 = vld [vmem:[%s1838_s25 + $0x10] sm:$0xff]  ;;  %v326_v29 = vsel %vm1826_vm5, 0, %v325_v22 }
  0x14   : > { %v288_v19 = vsel %vm1816_vm4, 0, %v287_v14  ;;  %v319_v20 = vld [vmem:[#allocation2 + $0x4] sm:$0x1]  ;;  %v265_v25 = vadd.f32 %v1843_v8, %v253_v16  ;;  %v251_v30 = vmul.f32 %v1823_v2, %v239_v28  ;;  %v296_v31 = vld [vmem:[#allocation2 + $0x18] sm:$0x1]  ;;  %v681_v44 = vunpack.c.l.b16 %v504_v27 }
  0x15   : > { %289 = vst [vmem:[#allocation2] sm:$0x1] %v288_v19  ;;  %v320_v23 = vsel %vm1826_vm5, 0, %v319_v20  ;;  %v269_v33 = vmax.f32 %v261_v24, 0.0  ;;  %v270_v35 = vmax.f32 %v262_v26, 0.0  ;;  %v297_v36 = vsel %vm1816_vm4, 0, %v296_v31 }
  0x16   : > { %321 = vst [vmem:[#allocation2 + $0x4] sm:$0x1] %v320_v23  ;;  %v273_v34 = vmax.f32 %v265_v25, 0.0  ;;  %v263_v37 = vadd.f32 %v1843_v8, %v251_v30  ;;  %v328_v38 = vld [vmem:[#allocation2 + $0x1c] sm:$0x1]  ;;  %v264_v46 = vadd.f32 %v1843_v8, %v252_v39  ;;  %vm1525_vm10 = vcmask 1040384  }
  0x17   : > { %295 = vst [vmem:[#allocation2 + $0x10] sm:$0x1] %v294_v21  ;;  %v349_v40 = vpack.c.bf16 %v269_v33, %v269_v33  ;;  %v350_v42 = vpack.c.bf16 %v270_v35, %v270_v35  ;;  %v329_v43 = vsel %vm1826_vm5, 0, %v328_v38  ;;  %v299_v51 = vld [vmem:[#allocation2 + $0x20] sm:$0x1]  ;;  %vm1527_vm11 = vcmask 254976  }
  0x18   : > { %327 = vst [vmem:[#allocation2 + $0x14] sm:$0x1] %v326_v29  ;;  %v353_v41 = vpack.c.bf16 %v273_v34, %v273_v34  ;;  %v271_v45 = vmax.f32 %v263_v37, 0.0  ;;  %v440_v53 = vld [vmem:[#allocation2 + $0x8] sm:$0xf]  ;;  %v272_v58 = vmax.f32 %v264_v46, 0.0 }
  0x19   : > { %298 = vst [vmem:[#allocation2 + $0x18] sm:$0x1] %v297_v36  ;;  %v358_v47 = vshrl.u32 %v349_v40, 16  ;;  %v361_v48 = vshll.u32 %v349_v40, 16  ;;  %v443_v54 = vld [vmem:[#allocation2 + $0xc] sm:$0x1] }
  0x1a   : > { %330 = vst [vmem:[#allocation2 + $0x1c] sm:$0x1] %v329_v43  ;;  %v390_v49 = vshrl.u32 %v353_v41, 16  ;;  %v393_v50 = vshll.u32 %v353_v41, 16  ;;  %v366_v55 = vshrl.u32 %v350_v42, 16  ;;  %v369_v56 = vshll.u32 %v350_v42, 16 }
  0x1b   : > { %v351_v57 = vpack.c.bf16 %v271_v45, %v271_v45  ;;  %v360_v61 = vrot.slane %v358_v47, 7  ;;  %v300_v63 = vsel %vm1816_vm4, 0, %v299_v51  ;;  %v464_v5 = vld [vmem:[#allocation2 + $0x28] sm:$0xf]  ;;  %v352_v14 = vpack.c.bf16 %v272_v58, %v272_v58  ;;  %v331_v25 = vld [vmem:[#allocation2 + $0x24] sm:$0x1] }
  0x1c   : > { %v488_v52 = vld [vmem:[#allocation2] sm:$0xf]  ;;  %v1876_v62 = vrot.slane %v390_v49, 7  ;;  %v368_v6 = vrot.slane %v366_v55, 7  ;;  %301 = vst [vmem:[#allocation2 + $0x20] sm:$0x1] %v300_v63 }
  0x1d   : > { %v496_v59 = vld [vmem:[#allocation2 + $0x4] sm:$0x1]  ;;  %v577_v60 = vunpack.c.l.b16 %v488_v52  ;;  %v374_v7 = vshrl.u32 %v351_v57, 16  ;;  %v377_v9 = vshll.u32 %v351_v57, 16  ;;  %v363_v10 = vor.u32 %v361_v48, %v360_v61  ;;  %v334_v34 = vld [vmem:[#allocation2 + $0x2c] sm:$0x1] }
  0x1e   : > { %v578_v3 = vunpack.c.l.b16 %v496_v59  ;;  %v364_v11 = vrot.slane %v360_v61, 4  ;;  %v395_v12 = vor.u32 %v393_v50, %v1876_v62  ;;  %v446_v13 = vld [vmem:[#allocation2 + $0x10] sm:$0xf]  ;;  %v371_v16 = vor.u32 %v369_v56, %v368_v6 }
  0x1f   : > { %v372_v17 = vrot.slane %v368_v6, 4  ;;  %v449_v18 = vld [vmem:[#allocation2 + $0x14] sm:$0x1]  ;;  %v441_v20 = vsel %vm1882_vm6, %v363_v10, %v440_v53  ;;  %v376_v23 = vrot.slane %v374_v7, 7  ;;  %v382_v36 = vshrl.u32 %v352_v14, 16 }
  0x20   : > { %v593_v15 = vpack.c.b16 %v578_v3, %v577_v60  ;;  %v689_v19 = vpack.c.b16 %v578_v3, %v681_v44  ;;  %v444_v21 = vsel %vm1816_vm4, %v364_v11, %v443_v54  ;;  %v465_v22 = vsel %vm1882_vm6, %v395_v12, %v464_v5  ;;  %v452_v24 = vld [vmem:[#allocation2 + $0x18] sm:$0xf]  ;;  %442 = vst [vmem:[#allocation2 + $0x8] sm:$0xf] %v441_v20 }
  0x21   : > { %v447_v28 = vsel %vm1882_vm6, %v371_v16, %v446_v13  ;;  %v455_v29 = vld [vmem:[#allocation2 + $0x1c] sm:$0x1]  ;;  %445 = vst [vmem:[#allocation2 + $0xc] sm:$0x1] %v444_v21  ;;  %v450_v30 = vsel %vm1816_vm4, %v372_v17, %v449_v18  ;;  %v379_v32 = vor.u32 %v377_v9, %v376_v23  ;;  %v380_v33 = vrot.slane %v376_v23, 4 }
  0x22   : > { %v602_v26 = vshrl.u32 %v593_v15, 16  ;;  %v604_v27 = vshll.u32 %v593_v15, 16  ;;  %v697_v31 = vrot.slane %v689_v19, 1  ;;  %466 = vst [vmem:[#allocation2 + $0x28] sm:$0xf] %v465_v22  ;;  %v385_v37 = vshll.u32 %v352_v14, 16 }
  0x23   : > { %448 = vst [vmem:[#allocation2 + $0x10] sm:$0xf] %v447_v28  ;;  %v453_v38 = vsel %vm1882_vm6, %v379_v32, %v452_v24  ;;  %v456_v39 = vsel %vm1816_vm4, %v380_v33, %v455_v29  ;;  %v332_v41 = vsel %vm1826_vm5, 0, %v331_v25  ;;  %v384_v42 = vrot.slane %v382_v36, 7  ;;  %v458_v43 = vld [vmem:[#allocation2 + $0x20] sm:$0xf] }
  0x24   : > { %v606_v35 = vrot.slane %v604_v27, 1  ;;  %705 = vrot.lane.b32.xlu2 %v697_v31, %s1771_s28  ;;  %451 = vst [vmem:[#allocation2 + $0x14] sm:$0x1] %v450_v30  ;;  %v335_v44 = vsel %vm1826_vm5, 0, %v334_v34  ;;  %v396_v25 = vrot.slane %v1876_v62, 4  ;;  %v242_v32 = vld [vmem:[%s1838_s25 + $0x28] sm:$0xff] }
  0x25   : > { %454 = vst [vmem:[#allocation2 + $0x18] sm:$0xf] %v453_v38  ;;  %v387_v45 = vor.u32 %v385_v37, %v384_v42  ;;  %v388_v58 = vrot.slane %v384_v42, 4  ;;  %v305_v34 = vld [vmem:[#allocation2 + $0x30] sm:$0x1] }
  0x26   : > { %v607_v40 = vor.u32 %v606_v35, %v602_v26  ;;  %457 = vst [vmem:[#allocation2 + $0x1c] sm:$0x1] %v456_v39  ;;  %v337_v42 = vld [vmem:[#allocation2 + $0x34] sm:$0x1] }
  0x27   : > { %v512_v46 = vld [vmem:[#allocation2 + $0x8] sm:$0xf]  ;;  %333 = vst [vmem:[#allocation2 + $0x24] sm:$0x1] %v332_v41  ;;  %v459_v49 = vsel %vm1882_vm6, %v387_v45, %v458_v43  ;;  %v306_v41 = vsel %vm1816_vm4, 0, %v305_v34 }
  0x28   : > { %657 = vrot.lane.b32.xlu0 %v607_v40, %s1772_s29  ;;  %v1907_v47 = vld [vmem:[#allocation2 + $0xc] sm:$0x1]  ;;  %v729_v48 = vunpack.c.l.b16 %v512_v46  ;;  %336 = vst [vmem:[#allocation2 + $0x2c] sm:$0x1] %v335_v44  ;;  %v505_v17 = vld [vmem:[#allocation2 + $0x8] sm:$0xe]  ;;  %v254_v40 = vmul.f32 %v1823_v2, %v242_v32 }
  0x29   : > { %v769_v50 = vunpack.c.l.b16 %v1907_v47  ;;  %v540_v51 = vld [vmem:[#allocation2 + $0x28] sm:$0xf]  ;;  %460 = vst [vmem:[#allocation2 + $0x20] sm:$0xf] %v459_v49  ;;  %v1927_v16 = vld [vmem:[#allocation2 + $0xc] sm:$0x1]  ;;  %v682_v28 = vunpack.c.l.b16 %v505_v17 }
  0x2a   : > { %v737_v52 = vpack.c.b16 %v729_v48, %v729_v48  ;;  %v1912_v53 = vunpack.c.l.b16 %v540_v51  ;;  %v506_v54 = vld [vmem:[#allocation2 + $0x10] sm:$0xe]  ;;  %v580_v27 = vunpack.c.l.b16 %v1927_v16  ;;  %307 = vst [vmem:[#allocation2 + $0x30] sm:$0x1] %v306_v41 }
  0x2b   : > { %v1916_v55 = vpack.c.b16 %v769_v50, %v729_v48  ;;  %v498_v56 = vld [vmem:[#allocation2 + $0x14] sm:$0x1]  ;;  %v683_v57 = vunpack.c.l.b16 %v506_v54  ;;  %v1924_v13 = vld [vmem:[#allocation2 + $0x10] sm:$0xf] }
  0x2c   : > { %745 = vrot.lane.b32.xlu1 %v737_v52, %s1773_s30  ;;  %v908_v59 = vpack.c.b16 %v1912_v53, %v1912_v53  ;;  %v582_v60 = vunpack.c.l.b16 %v498_v56  ;;  %v530_v61 = vld [vmem:[#allocation2 + $0x18] sm:$0xe]  ;;  %v581_v24 = vunpack.c.l.b16 %v1924_v13  ;;  %v690_v38 = vpack.c.b16 %v580_v27, %v682_v28  ;;  %v243_v54 = vld [vmem:[%s1838_s25 + $0x30] sm:$0xff] }
  0x2d   : > { %v507_v63 = vld [vmem:[#allocation2 + $0x18] sm:$0xe]  ;;  %v522_v5 = vld [vmem:[#allocation2 + $0x1c] sm:$0x1]  ;;  %v851_v6 = vunpack.c.l.b16 %v530_v61  ;;  %v266_v52 = vadd.f32 %v1843_v8, %v254_v40  ;;  %v513_v17 = vld [vmem:[#allocation2 + $0x10] sm:$0xf] }
  0x2e   : > { %v514_v3 = vld [vmem:[#allocation2 + $0x18] sm:$0xf]  ;;  %v1921_v7 = vld [vmem:[#allocation2 + $0x1c] sm:$0x1]  ;;  %v691_v9 = vpack.c.b16 %v582_v60, %v683_v57  ;;  %v771_v10 = vunpack.c.l.b16 %v522_v5  ;;  %v461_v12 = vld [vmem:[#allocation2 + $0x24] sm:$0x1]  ;;  %v684_v15 = vunpack.c.l.b16 %v507_v63  ;;  %v595_v35 = vpack.c.b16 %v582_v60, %v581_v24 }
  0x2f   : > { %v731_v11 = vunpack.c.l.b16 %v514_v3  ;;  %v584_v14 = vunpack.c.l.b16 %v1921_v7  ;;  %v462_v18 = vsel %vm1816_vm4, %v388_v58, %v461_v12  ;;  %v467_v30 = vld [vmem:[#allocation2 + $0x2c] sm:$0x1]  ;;  %v1941_v37 = vld [vmem:[#allocation2 + $0x18] sm:$0xf]  ;;  %v338_v57 = vsel %vm1826_vm5, 0, %v337_v42 }
  0x30   : > { %919 = vrot.lane.b32.xlu0 %v908_v59, %s1771_s28  ;;  %v699_v19 = vrot.slane %v691_v9, 1  ;;  %v859_v20 = vpack.c.b16 %v771_v10, %v851_v6  ;;  %463 = vst [vmem:[#allocation2 + $0x24] sm:$0x1] %v462_v18  ;;  %v515_v23 = vld [vmem:[#allocation2 + $0x20] sm:$0xf]  ;;  %v468_v62 = vsel %vm1816_vm4, %v396_v25, %v467_v30  ;;  %v618_v56 = vshll.u32 %v595_v35, 16 }
  0x31   : > { %v739_v21 = vpack.c.b16 %v731_v11, %v731_v11  ;;  %v1931_v22 = vpack.c.b16 %v771_v10, %v731_v11  ;;  %v732_v29 = vunpack.c.l.b16 %v515_v23  ;;  %v692_v31 = vpack.c.b16 %v584_v14, %v684_v15  ;;  %v531_v33 = vld [vmem:[#allocation2 + $0x20] sm:$0xe]  ;;  %469 = vst [vmem:[#allocation2 + $0x2c] sm:$0x1] %v468_v62  ;;  %v308_v58 = vld [vmem:[#allocation2 + $0x38] sm:$0x1] }
  0x32   : > { %v867_v26 = vrot.slane %v859_v20, 1  ;;  %v539_v36 = vld [vmem:[#allocation2 + $0x20] sm:$0xf]  ;;  %v852_v45 = vunpack.c.l.b16 %v531_v33  ;;  %v698_v59 = vrot.slane %v690_v38, 1  ;;  %v583_v61 = vunpack.c.l.b16 %v1941_v37  ;;  %339 = vst [vmem:[#allocation2 + $0x34] sm:$0x1] %v338_v57 }
  0x33   : > { %749 = vrot.lane.b32.xlu2 %v739_v21, %s1773_s30  ;;  %v740_v39 = vpack.c.b16 %v732_v29, %v732_v29  ;;  %v700_v43 = vrot.slane %v692_v31, 1  ;;  %v899_v49 = vunpack.c.l.b16 %v539_v36  ;;  %v274_v63 = vmax.f32 %v266_v52, 0.0  ;;  %v1968_v10 = vld [vmem:[#allocation2 + $0x8] sm:$0xf]  ;;  %v1975_v21 = vld [vmem:[#allocation2 + $0x20] sm:$0xf] }
  0x34   : > { %709 = vrot.lane.b32.xlu1 %v699_v19, %s1771_s28  ;;  %v255_v3 = vmul.f32 %v1823_v2, %v243_v54  ;;  %v309_v5 = vsel %vm1816_vm4, 0, %v308_v58  ;;  %v616_v12 = vshrl.u32 %v595_v35, 16  ;;  %v620_v15 = vrot.slane %v618_v56, 1  ;;  %v516_v25 = vld [vmem:[#allocation2 + $0x28] sm:$0xf] }
  0x35   : > { %v354_v11 = vpack.c.bf16 %v274_v63, %v274_v63  ;;  %310 = vst [vmem:[#allocation2 + $0x38] sm:$0x1] %v309_v5  ;;  %v907_v19 = vpack.c.b16 %v899_v49, %v899_v49  ;;  %v596_v20 = vpack.c.b16 %v584_v14, %v583_v61  ;;  %v579_v32 = vunpack.c.l.b16 %v1968_v10  ;;  %v2005_v52 = vld [vmem:[#allocation2 + $0x28] sm:$0xf] }
  0x36   : > { %v1984_v33 = vunpack.c.l.b16 %v513_v17  ;;  %v621_v7 = vor.u32 %v620_v15, %v616_v12  ;;  %v585_v14 = vunpack.c.l.b16 %v1975_v21  ;;  %v1992_v38 = vunpack.c.l.b16 %v516_v25 }
  0x37   : > { %v523_v44 = vld [vmem:[#allocation2 + $0x24] sm:$0x1]  ;;  %v398_v28 = vshrl.u32 %v354_v11, 16  ;;  %v401_v35 = vshll.u32 %v354_v11, 16  ;;  %v625_v36 = vshll.u32 %v596_v20, 16  ;;  %v623_v16 = vshrl.u32 %v596_v20, 16 }
  0x38   : > { %877 = vrot.lane.b32.xlu0 %v867_v26, %s1772_s29  ;;  %v1951_v46 = vld [vmem:[#allocation2 + $0x24] sm:$0x1]  ;;  %v772_v48 = vunpack.c.l.b16 %v523_v44  ;;  %v1970_v18 = vld [vmem:[#allocation2 + $0x2c] sm:$0x1]  ;;  %v594_v44 = vpack.c.b16 %v580_v27, %v579_v32  ;;  %v587_v12 = vunpack.c.l.b16 %v2005_v52  ;;  %v508_v32 = vld [vmem:[#allocation2 + $0x20] sm:$0xe] }
  0x39   : > { %v939_v51 = vunpack.c.l.b16 %v1951_v46  ;;  %v1977_v23 = vld [vmem:[#allocation2 + $0x24] sm:$0x1]  ;;  %v940_v24 = vunpack.c.l.b16 %v1970_v18  ;;  %v1980_v26 = vld [vmem:[#allocation2 + $0x2c] sm:$0x1]  ;;  %v400_v40 = vrot.slane %v398_v28, 7  ;;  %v627_v27 = vrot.slane %v625_v36, 1 }
  0x3a   : > { %v1958_v60 = vpack.c.b16 %v772_v48, %v732_v29  ;;  %v860_v6 = vpack.c.b16 %v772_v48, %v852_v45  ;;  %v267_v29 = vadd.f32 %v1843_v8, %v255_v3  ;;  %v586_v34 = vunpack.c.l.b16 %v1977_v23  ;;  %v470_v48 = vld [vmem:[#allocation2 + $0x30] sm:$0xf]  ;;  %v501_v54 = vld [vmem:[#allocation2 + $0x2c] sm:$0x1]  ;;  %v2031_v23 = vld [vmem:[#allocation2 + $0x14] sm:$0x1] }
  0x3b   : > { %751 = vrot.lane.b32.xlu2 %v740_v39, %s1773_s30  ;;  %v947_v9 = vpack.c.b16 %v939_v51, %v899_v49  ;;  %v948_v62 = vpack.c.b16 %v940_v24, %v1912_v53  ;;  %v773_v39 = vunpack.c.l.b16 %v1980_v26  ;;  %v473_v53 = vld [vmem:[#allocation2 + $0x34] sm:$0x1]  ;;  %v403_v56 = vor.u32 %v401_v35, %v400_v40 }
  0x3c   : > { %711 = vrot.lane.b32.xlu1 %v700_v43, %s1771_s28  ;;  %v868_v30 = vrot.slane %v860_v6, 1  ;;  %v275_v41 = vmax.f32 %v267_v29, 0.0  ;;  %v597_v49 = vpack.c.b16 %v586_v34, %v585_v14  ;;  %v404_v57 = vrot.slane %v400_v40, 4  ;;  %v476_v29 = vld [vmem:[#allocation2 + $0x38] sm:$0xf] }
  0x3d   : > { %v970_v31 = vshll.u32 %v947_v9, 16  ;;  %v968_v42 = vshrl.u32 %v947_v9, 16  ;;  %v2001_v45 = vpack.c.b16 %v773_v39, %v1992_v38  ;;  %v977_v61 = vshll.u32 %v948_v62, 16 }
  0x3e   : > { %v355_v58 = vpack.c.bf16 %v275_v41, %v275_v41  ;;  %v471_v63 = vsel %vm1882_vm6, %v403_v56, %v470_v48  ;;  %v474_v3 = vsel %vm1816_vm4, %v404_v57, %v473_v53  ;;  %v611_v11 = vshll.u32 %v594_v44, 16  ;;  %v509_v48 = vld [vmem:[#allocation2 + $0x28] sm:$0xe] }
  0x3f   : > { %v972_v43 = vrot.slane %v970_v31, 1  ;;  %v588_v15 = vunpack.c.l.b16 %v501_v54  ;;  %472 = vst [vmem:[#allocation2 + $0x30] sm:$0xf] %v471_v63  ;;  %v632_v17 = vshll.u32 %v597_v49, 16  ;;  %v628_v20 = vor.u32 %v627_v27, %v623_v16 }
  0x40   : > { %707 = vrot.lane.b32.xlu0 %v698_v59, %s1771_s28  ;;  %v738_v59 = vpack.c.b16 %v1984_v33, %v1984_v33  ;;  %v406_v5 = vshrl.u32 %v355_v58, 16  ;;  %v409_v6 = vshll.u32 %v355_v58, 16  ;;  %475 = vst [vmem:[#allocation2 + $0x34] sm:$0x1] %v474_v3  ;;  %v975_v25 = vshrl.u32 %v948_v62, 16 }
  0x41   : > { %v973_v9 = vor.u32 %v972_v43, %v968_v42  ;;  %v979_v28 = vrot.slane %v977_v61, 1  ;;  %v609_v14 = vshrl.u32 %v594_v44, 16  ;;  %v613_v35 = vrot.slane %v611_v11, 1 }
  0x42   : > { %v598_v36 = vpack.c.b16 %v588_v15, %v587_v12  ;;  %v630_v62 = vshrl.u32 %v597_v49, 16  ;;  %v634_v41 = vrot.slane %v632_v17, 1  ;;  %v685_v43 = vunpack.c.l.b16 %v508_v32 }
  0x43   : > { %917 = vrot.lane.b32.xlu2 %v907_v19, %s1771_s28  ;;  %v408_v19 = vrot.slane %v406_v5, 7  ;;  %v980_v42 = vor.u32 %v979_v28, %v975_v25  ;;  %v614_v53 = vor.u32 %v613_v35, %v609_v14  ;;  %v686_v44 = vunpack.c.l.b16 %v509_v48  ;;  %v244_v14 = vld [vmem:[%s1838_s25 + $0x38] sm:$0xff]  ;;  %s2352_s25 = scalar_lea.vmem %s2397_s4, %s1711_s22  ;;  %s1632_s22 = sshll.u32 %s2406_s19, 1 }
  0x44   : > { %879 = vrot.lane.b32.xlu1 %v868_v30, %s1772_s29  ;;  %v340_v30 = vld [vmem:[#allocation2 + $0x3c] sm:$0x1]  ;;  %v639_v54 = vshll.u32 %v598_v36, 16  ;;  %v635_v57 = vor.u32 %v634_v41, %v630_v62  ;;  %v693_v58 = vpack.c.b16 %v586_v34, %v685_v43  ;;  %v532_v34 = vld [vmem:[#allocation2 + $0x28] sm:$0xe]  ;;  %v770_v12 = vunpack.c.l.b16 %v2031_v23  ;;  %s235_s6 = scalar_lea.vmem %s2398_s5, %s1632_s22 }
  0x45   : > { %v411_v31 = vor.u32 %v409_v6, %v408_v19  ;;  %v412_v27 = vrot.slane %v408_v19, 4  ;;  %v694_v6 = vpack.c.b16 %v588_v15, %v686_v44  ;;  %v853_v25 = vunpack.c.l.b16 %v532_v34  ;;  %v528_v44 = vld [vmem:[#allocation2 + $0x8] sm:$0xe] }
  0x46   : > { %v517_v16 = vld [vmem:[#allocation2 + $0x30] sm:$0xf]  ;;  %v641_v49 = vrot.slane %v639_v54, 1  ;;  %v2037_v19 = vpack.c.b16 %v770_v12, %v1984_v33  ;;  %v741_v62 = vpack.c.b16 %v1992_v38, %v1992_v38  ;;  %v311_v54 = vld [vmem:[#allocation2 + $0x40] sm:$0x1] }
  0x47   : > { %v477_v40 = vsel %vm1882_vm6, %v411_v31, %v476_v29  ;;  %v525_v56 = vld [vmem:[#allocation2 + $0x34] sm:$0x1]  ;;  %v734_v3 = vunpack.c.l.b16 %v517_v16  ;;  %v541_v15 = vld [vmem:[#allocation2 + $0x30] sm:$0xf]  ;;  %v861_v32 = vpack.c.b16 %v773_v39, %v853_v25  ;;  %v312_v38 = vsel %vm1816_vm4, 0, %v311_v54 }
  0x48   : > { %661 = vrot.lane.b32.xlu0 %v621_v7, %s1772_s29  ;;  %v341_v7 = vsel %vm1826_vm5, 0, %v340_v30  ;;  %478 = vst [vmem:[#allocation2 + $0x38] sm:$0xf] %v477_v40  ;;  %v774_v63 = vunpack.c.l.b16 %v525_v56  ;;  %v2041_v28 = vld [vmem:[#allocation2 + $0x34] sm:$0x1]  ;;  %v901_v35 = vunpack.c.l.b16 %v541_v15  ;;  %v256_v40 = vmul.f32 %v1823_v2, %v244_v14 }
  0x49   : > { %342 = vst [vmem:[#allocation2 + $0x3c] sm:$0x1] %v341_v7  ;;  %v533_v29 = vld [vmem:[#allocation2 + $0x30] sm:$0xe]  ;;  %v742_v33 = vpack.c.b16 %v734_v3, %v734_v3  ;;  %v869_v48 = vrot.slane %v861_v32, 1 }
  0x4a   : > { %v2029_v11 = vpack.c.b16 %v774_v63, %v734_v3  ;;  %v854_v41 = vunpack.c.l.b16 %v533_v29  ;;  %v268_v43 = vadd.f32 %v1843_v8, %v256_v40  ;;  %v343_v56 = vld [vmem:[#allocation2 + $0x44] sm:$0x1]  ;;  %313 = vst [vmem:[#allocation2 + $0x40] sm:$0x1] %v312_v38  ;;  %v538_v29 = vld [vmem:[#allocation2 + $0x18] sm:$0xf] }
  0x4b   : > { %747 = vrot.lane.b32.xlu2 %v738_v59, %s1773_s30  ;;  %v637_v59 = vshrl.u32 %v598_v36, 16  ;;  %v941_v36 = vunpack.c.l.b16 %v2041_v28  ;;  %v344_v8 = vsel %vm1826_vm5, 0, %v343_v56  ;;  %v537_v14 = vld [vmem:[#allocation2 + $0x10] sm:$0xf] }
  0x4c   : > { %1013 = vrot.lane.b32.xlu1 %v973_v9, %s1773_s30  ;;  %v701_v9 = vrot.slane %v693_v58, 1  ;;  %v862_v2 = vpack.c.b16 %v774_v63, %v854_v41  ;;  %v909_v58 = vpack.c.b16 %v901_v35, %v901_v35  ;;  %345 = vst [vmem:[#allocation2 + $0x44] sm:$0x1] %v344_v8  ;;  %v2077_v41 = vld [vmem:[#allocation2 + $0x30] sm:$0xf]  ;;  %v897_v54 = vunpack.c.l.b16 %v537_v14 }
  0x4d   : > { %v642_v17 = vor.u32 %v641_v49, %v637_v59  ;;  %v949_v39 = vpack.c.b16 %v941_v36, %v901_v35  ;;  %v849_v49 = vunpack.c.l.b16 %v528_v44  ;;  %v2072_v35 = vld [vmem:[#allocation2 + $0x14] sm:$0x1]  ;;  %v589_v8 = vunpack.c.l.b16 %v2077_v41 }
  0x4e   : > { %v937_v56 = vunpack.c.l.b16 %v2072_v35  ;;  %v1729_v35 = vld [vmem:[%s2396_s3 + $0x80] sm:$0xff] }
  0x4f   : > { %v542_v30 = vld [vmem:[#allocation2 + $0x38] sm:$0xf]  ;;  %v982_v34 = vshrl.u32 %v949_v39, 16 }
  0x50   : > { %663 = vrot.lane.b32.xlu0 %v628_v20, %s1772_s29  ;;  %v479_v61 = vld [vmem:[#allocation2 + $0x3c] sm:$0x1]  ;;  %v702_v20 = vrot.slane %v694_v6, 1  ;;  %v945_v1 = vpack.c.b16 %v937_v56, %v897_v54 }
  0x51   : > { %v480_v5 = vsel %vm1816_vm4, %v412_v27, %v479_v61  ;;  %v984_v27 = vshll.u32 %v949_v39, 16  ;;  %v870_v61 = vrot.slane %v862_v2, 1  ;;  %v482_v32 = vld [vmem:[#allocation2 + $0x40] sm:$0xf]  ;;  %v314_v2 = vld [vmem:[#allocation2 + $0x48] sm:$0x1] }
  0x52   : > { %481 = vst [vmem:[#allocation2 + $0x3c] sm:$0x1] %v480_v5 }
  0x53   : > { %1015 = vrot.lane.b32.xlu2 %v980_v42, %s1773_s30  ;;  %v902_v42 = vunpack.c.l.b16 %v542_v30  ;;  %v2068_v30 = vld [vmem:[#allocation2 + $0x1c] sm:$0x1] }
  0x54   : > { %659 = vrot.lane.b32.xlu1 %v614_v53, %s1772_s29  ;;  %v276_v53 = vmax.f32 %v268_v43, 0.0 }
  0x55   : > { %v910_v5 = vpack.c.b16 %v902_v42, %v902_v42 }
  0x58   : > { %665 = vrot.lane.b32.xlu0 %v635_v57, %s1772_s29  ;;  %v356_v57 = vpack.c.bf16 %v276_v53, %v276_v53  ;;  %v898_v53 = vunpack.c.l.b16 %v538_v29  ;;  %v510_v29 = vld [vmem:[#allocation2 + $0x30] sm:$0xe] }
  0x59   : > { %v2043_v31 = vld [vmem:[#allocation2 + $0x3c] sm:$0x1] }
  0x5a   : > { %v942_v7 = vunpack.c.l.b16 %v2043_v31  ;;  %v414_v59 = vshrl.u32 %v356_v57, 16  ;;  %v417_v63 = vshll.u32 %v356_v57, 16  ;;  %v2082_v39 = vld [vmem:[#allocation2 + $0x3c] sm:$0x1]  ;;  %v315_v57 = vsel %vm1816_vm4, 0, %v314_v2 }
  0x5b   : > { %713 = vrot.lane.b32.xlu2 %v701_v9, %s1771_s28  ;;  %316 = vst [vmem:[#allocation2 + $0x48] sm:$0x1] %v315_v57 }
  0x5c   : > { %667 = vrot.lane.b32.xlu1 %v642_v17, %s1772_s29  ;;  %v950_v26 = vpack.c.b16 %v942_v7, %v902_v42  ;;  %v416_v3 = vrot.slane %v414_v59, 7  ;;  %v986_v17 = vrot.slane %v984_v27, 1  ;;  %v502_v42 = vld [vmem:[#allocation2 + $0x34] sm:$0x1] }
  0x5d   : > { %v590_v44 = vunpack.c.l.b16 %v502_v42 }
  0x5e   : > { %v991_v16 = vshll.u32 %v950_v26, 16  ;;  %v989_v6 = vshrl.u32 %v950_v26, 16  ;;  %v419_v25 = vor.u32 %v417_v63, %v416_v3  ;;  %v420_v15 = vrot.slane %v416_v3, 4  ;;  %v518_v26 = vld [vmem:[#allocation2 + $0x38] sm:$0xf] }
  0x5f   : > { %v987_v0 = vor.u32 %v986_v17, %v982_v34  ;;  %v503_v3 = vld [vmem:[#allocation2 + $0x3c] sm:$0x1]  ;;  %v599_v63 = vpack.c.b16 %v590_v44, %v589_v8  ;;  %v956_v34 = vshll.u32 %v945_v1, 16  ;;  %v906_v17 = vpack.c.b16 %v898_v53, %v898_v53 }
  0x60   : > { %715 = vrot.lane.b32.xlu0 %v702_v20, %s1771_s28  ;;  %v993_v9 = vrot.slane %v991_v16, 1  ;;  %v529_v20 = vld [vmem:[#allocation2 + $0x10] sm:$0xe]  ;;  %v483_v40 = vsel %vm1882_vm6, %v419_v25, %v482_v32  ;;  %v775_v16 = vunpack.c.l.b16 %v2082_v39  ;;  %v954_v32 = vshrl.u32 %v945_v1, 16 }
  0x61   : > { %484 = vst [vmem:[#allocation2 + $0x40] sm:$0xf] %v483_v40  ;;  %v644_v40 = vshrl.u32 %v599_v63, 16 }
  0x62   : > { %v994_v43 = vor.u32 %v993_v9, %v989_v6 }
  0x63   : > { %755 = vrot.lane.b32.xlu2 %v742_v33, %s1773_s30  ;;  %v857_v33 = vpack.c.b16 %v769_v50, %v849_v49  ;;  %v850_v50 = vunpack.c.l.b16 %v529_v20  ;;  %v2104_v49 = vld [vmem:[#allocation2 + $0x38] sm:$0xf]  ;;  %v646_v20 = vshll.u32 %v599_v63, 16 }
  0x64   : > { %753 = vrot.lane.b32.xlu1 %v741_v62, %s1773_s30  ;;  %v485_v62 = vld [vmem:[#allocation2 + $0x44] sm:$0x1]  ;;  %v591_v23 = vunpack.c.l.b16 %v2104_v49 }
  0x65   : > { %v486_v47 = vsel %vm1816_vm4, %v420_v15, %v485_v62  ;;  %v865_v38 = vrot.slane %v857_v33, 1  ;;  %v858_v59 = vpack.c.b16 %v770_v12, %v850_v50  ;;  %v592_v12 = vunpack.c.l.b16 %v503_v3 }
  0x66   : > { %487 = vst [vmem:[#allocation2 + $0x44] sm:$0x1] %v486_v47  ;;  %v958_v33 = vrot.slane %v956_v34, 1  ;;  %v648_v62 = vrot.slane %v646_v20, 1  ;;  %v511_v47 = vld [vmem:[#allocation2 + $0x38] sm:$0xe] }
  0x67   : > { %v866_v9 = vrot.slane %v858_v59, 1  ;;  %v600_v14 = vpack.c.b16 %v592_v12, %v591_v23  ;;  %v346_v59 = vld [vmem:[#allocation2 + $0x4c] sm:$0x1]  ;;  %v534_v34 = vld [vmem:[#allocation2 + $0x38] sm:$0xe] }
  0x68   : > { %881 = vrot.lane.b32.xlu0 %v869_v48, %s1772_s29  ;;  %v938_v48 = vunpack.c.l.b16 %v2068_v30  ;;  %v959_v50 = vor.u32 %v958_v33, %v954_v32  ;;  %v519_v8 = vld [vmem:[#allocation2 + $0x40] sm:$0xf]  ;;  %v1720_v23 = vld [vmem:[%s2396_s3 + $0x38] sm:$0xff] }
  0x69   : > { %v651_v57 = vshrl.u32 %v600_v14, 16  ;;  %v736_v63 = vunpack.c.l.b16 %v519_v8  ;;  %1731 = vmatpush.bf16.msra.mxu3 %v1720_v23  ;;  %1388 = vmatpush.bf16.msra.mxu0 %v1720_v23  ;;  %v535_v32 = vld [vmem:[#allocation2 + $0x40] sm:$0xe]  ;;  %v1730_v8 = vld [vmem:[%s2396_s3 + $0x88] sm:$0xff]  ;;  %v1716_v30 = vld [vmem:[%s2396_s3 + $0x18] sm:$0xff] }
  0x6a   : > { %v946_v27 = vpack.c.b16 %v938_v48, %v898_v53  ;;  %v649_v53 = vor.u32 %v648_v62, %v644_v40  ;;  %v543_v40 = vld [vmem:[#allocation2 + $0x40] sm:$0xf]  ;;  %1452 = vmatpush.bf16.msra.mxu2 %v1730_v8  ;;  %v2217_v8 = vld [vmem:[%s2396_s3 + $0x48] sm:$0xff] }
  0x6b   : > { %921 = vrot.lane.b32.xlu2 %v909_v58, %s1771_s28  ;;  %v2089_v58 = vunpack.c.l.b16 %v518_v26  ;;  %v653_v26 = vshll.u32 %v600_v14, 16  ;;  %v544_v14 = vld [vmem:[#allocation2 + $0x48] sm:$0xf] }
  0x6c   : > { %883 = vrot.lane.b32.xlu1 %v870_v61, %s1772_s29  ;;  %v963_v6 = vshll.u32 %v946_v27, 16  ;;  %v961_v25 = vshrl.u32 %v946_v27, 16  ;;  %v2119_v27 = vld [vmem:[%s2396_s3 + $0x78] sm:$0xff]  ;;  %v904_v39 = vunpack.c.l.b16 %v544_v14 }
  0x6d   : > { %v2102_v61 = vpack.c.b16 %v775_v16, %v2089_v58  ;;  %v655_v1 = vrot.slane %v653_v26, 1  ;;  %1739 = vmatpush.bf16.msra.mxu1 %v2119_v27  ;;  %v2152_v62 = vld [vmem:[#allocation2 + $0x44] sm:$0x1]  ;;  %v856_v26 = vunpack.c.l.b16 %v535_v32 }
  0x6e   : > { %v965_v15 = vrot.slane %v963_v6, 1  ;;  %1453 = vmatpush.bf16.msra.mxu2 %v1729_v35 }
  0x6f   : > { %v656_v4 = vor.u32 %v655_v1, %v651_v57  ;;  %v1717_v57 = vld [vmem:[%s2396_s3 + $0x20] sm:$0xff]  ;;  %v554_v1 = vld [vmem:[#allocation2 + $0x18] sm:$0xe] }
  0x70   : > { %923 = vrot.lane.b32.xlu0 %v910_v5, %s1771_s28  ;;  %v905_v5 = vpack.c.b16 %v897_v54, %v897_v54  ;;  %v966_v42 = vor.u32 %v965_v15, %v961_v25  ;;  %v688_v54 = vunpack.c.l.b16 %v511_v47  ;;  %v855_v25 = vunpack.c.l.b16 %v534_v34  ;;  %v2145_v15 = vld [vmem:[%s2396_s3 + $0x68] sm:$0xff] }
  0x73   : > { %1019 = vrot.lane.b32.xlu2 %v994_v43, %s1773_s30  ;;  %v687_v43 = vunpack.c.l.b16 %v510_v29 }
  0x74   : > { %1017 = vrot.lane.b32.xlu1 %v987_v0, %s1773_s30  ;;  %v2111_v0 = vld [vmem:[#allocation2 + $0x44] sm:$0x1] }
  0x75   : > { %v776_v3 = vunpack.c.l.b16 %v2111_v0  ;;  %v1718_v0 = vld [vmem:[%s2396_s3 + $0x28] sm:$0xff] }
  0x77   : > { %v864_v34 = vpack.c.b16 %v776_v3, %v856_v26 }
  0x78   : > { %873 = vrot.lane.b32.xlu0 %v865_v38, %s1772_s29  ;;  %v695_v38 = vpack.c.b16 %v590_v44, %v687_v43  ;;  %v696_v44 = vpack.c.b16 %v592_v12, %v688_v54  ;;  %v1719_v12 = vld [vmem:[%s2396_s3 + $0x30] sm:$0xff]  ;;  %v744_v43 = vpack.c.b16 %v736_v63, %v736_v63 }
  0x79   : > { %1732 = vmatpush.bf16.msra.mxu3 %v1719_v12  ;;  %1389 = vmatpush.bf16.msra.mxu0 %v1719_v12  ;;  %v553_v54 = vld [vmem:[#allocation2 + $0x10] sm:$0xe] }
  0x7a   : > { %v703_v6 = vrot.slane %v695_v38, 1  ;;  %v704_v20 = vrot.slane %v696_v44, 1  ;;  %v943_v38 = vunpack.c.l.b16 %v2152_v62  ;;  %v1034_v44 = vunpack.c.l.b16 %v554_v1 }
  0x7b   : > { %913 = vrot.lane.b32.xlu2 %v905_v5, %s1771_s28  ;;  %v347_v5 = vsel %vm1826_vm5, 0, %v346_v59  ;;  %v2180_v59 = vld [vmem:[%s2396_s3 + $0x58] sm:$0xff] }
  0x7c   : > { %875 = vrot.lane.b32.xlu1 %v866_v9, %s1772_s29  ;;  %348 = vst [vmem:[#allocation2 + $0x4c] sm:$0x1] %v347_v5  ;;  %v2127_v9 = vpack.c.b16 %v776_v3, %v736_v63 }
  0x7d   : > { %1733 = vmatpush.bf16.msra.mxu3 %v1718_v0  ;;  %1390 = vmatpush.bf16.msra.mxu0 %v1718_v0 }
  0x7e   : > { %v2113_v2 = vpop.permute.xlu2 %705 }
  0x80   : > { %915 = vrot.lane.b32.xlu0 %v906_v17, %s1771_s28  ;;  %v2135_v17 = vld [vmem:[%s2396_s3 + $0x70] sm:$0xff] }
  0x81   : > { %1740 = vmatpush.bf16.msra.mxu1 %v2135_v17  ;;  %1734 = vmatpush.bf16.msra.mxu3 %v1717_v57 }
  0x82   : > { %1391 = vmatpush.bf16.msra.mxu0 %v1717_v57 }
  0x83   : > { %1011 = vrot.lane.b32.xlu2 %v966_v42, %s1773_s30  ;;  %v2150_v33 = vld [vmem:[#allocation2 + $0x4c] sm:$0x1]  ;;  %v863_v42 = vpack.c.b16 %v775_v16, %v855_v25  ;;  %v903_v16 = vunpack.c.l.b16 %v543_v40  ;;  %v872_v40 = vrot.slane %v864_v34, 1 }
  0x84   : > { %1009 = vrot.lane.b32.xlu1 %v959_v50, %s1773_s30  ;;  %v944_v47 = vunpack.c.l.b16 %v2150_v33  ;;  %v743_v50 = vpack.c.b16 %v2089_v58, %v2089_v58  ;;  %v1033_v58 = vunpack.c.l.b16 %v553_v54 }
  0x85   : > { %1741 = vmatpush.bf16.msra.mxu1 %v2145_v15  ;;  %v871_v63 = vrot.slane %v863_v42, 1  ;;  %1735 = vmatpush.bf16.msra.mxu3 %v1716_v30 }
  0x86   : > { %v952_v5 = vpack.c.b16 %v944_v47, %v904_v39  ;;  %1392 = vmatpush.bf16.msra.mxu0 %v1716_v30 }
  0x88   : > { %669 = vrot.lane.b32.xlu0 %v649_v53, %s1772_s29  ;;  %v2167_v53 = vld [vmem:[%s2396_s3 + $0x60] sm:$0xff]  ;;  %v1005_v3 = vshll.u32 %v952_v5, 16  ;;  %v1003_v26 = vshrl.u32 %v952_v5, 16  ;;  %v1714_v5 = vld [vmem:[%s2396_s3 + $0x8] sm:$0xff] }
  0x89   : > { %1742 = vmatpush.bf16.msra.mxu1 %v2167_v53 }
  0x8a   : > { %v1007_v0 = vrot.slane %v1005_v3, 1  ;;  %v1713_v3 = vld [vmem:[%s2396_s3] sm:$0xff] }
  0x8b   : > { %717 = vrot.lane.b32.xlu2 %v703_v6, %s1771_s28  ;;  %v1041_v6 = vpack.c.b16 %v937_v56, %v1033_v58  ;;  %v911_v56 = vpack.c.b16 %v903_v16, %v903_v16 }
  0x8c   : > { %671 = vrot.lane.b32.xlu1 %v656_v4, %s1772_s29  ;;  %v951_v4 = vpack.c.b16 %v943_v38, %v903_v16  ;;  %v1715_v16 = vld [vmem:[%s2396_s3 + $0x10] sm:$0xff] }
  0x8d   : > { %v2148_v29 = vpop.permute.xlu2 %749  ;;  %v1049_v25 = vrot.slane %v1041_v6, 1  ;;  %1743 = vmatpush.bf16.msra.mxu1 %v2180_v59  ;;  %1736 = vmatpush.bf16.msra.mxu3 %v1715_v16  ;;  %v555_v6 = vld [vmem:[#allocation2 + $0x20] sm:$0xe] }
  0x8e   : > { %v998_v42 = vshll.u32 %v951_v4, 16  ;;  %v996_v58 = vshrl.u32 %v951_v4, 16  ;;  %1393 = vmatpush.bf16.msra.mxu0 %v1715_v16 }
  0x8f   : > { %v1190_v32 = vunpack.c.l.b16 %v1049_v25  ;;  %v1035_v25 = vunpack.c.l.b16 %v555_v6 }
  0x90   : > { %719 = vrot.lane.b32.xlu0 %v704_v20, %s1771_s28  ;;  %v1042_v20 = vpack.c.b16 %v938_v48, %v1034_v44  ;;  %v2205_v48 = vld [vmem:[%s2396_s3 + $0x50] sm:$0xff]  ;;  %v2233_v44 = vld [vmem:[%s2396_s3 + $0x40] sm:$0xff] }
  0x91   : > { %1744 = vmatpush.bf16.msra.mxu1 %v2205_v48  ;;  %1737 = vmatpush.bf16.msra.mxu3 %v1714_v5 }
  0x92   : > { %v1050_v12 = vrot.slane %v1042_v20, 1  ;;  %v556_v20 = vld [vmem:[#allocation2 + $0x28] sm:$0xe]  ;;  %1394 = vmatpush.bf16.msra.mxu0 %v1714_v5 }
  0x93   : > { %759 = vrot.lane.b32.xlu2 %v744_v43, %s1773_s30  ;;  %v1036_v35 = vunpack.c.l.b16 %v556_v20 }
  0x94   : > { %757 = vrot.lane.b32.xlu1 %v743_v50, %s1773_s30  ;;  %v1193_v43 = vunpack.c.l.b16 %v1050_v12  ;;  %v912_v50 = vpack.c.b16 %v904_v39, %v904_v39  ;;  %v1000_v39 = vrot.slane %v998_v42, 1 }
  0x95   : > { %v2188_v23 = vpop.permute.xlu2 %751  ;;  %1745 = vmatpush.bf16.msra.mxu1 %v2217_v8  ;;  %v1044_v12 = vpack.c.b16 %v940_v24, %v1036_v35  ;;  %1738 = vmatpush.bf16.msra.mxu3 %v1713_v3  ;;  %v802_v24 = vshll.u32 %v1931_v22, 16  ;;  %v558_v35 = vld [vmem:[#allocation2 + $0x38] sm:$0xe] }
  0x96   : > { %v1250_v54 = vpack.c.b16 %v1193_v43, %v1190_v32  ;;  %v1001_v4 = vor.u32 %v1000_v39, %v996_v58  ;;  %1395 = vmatpush.bf16.msra.mxu0 %v1713_v3  ;;  %v800_v39 = vshrl.u32 %v1931_v22, 16 }
  0x97   : > { %v1052_v30 = vrot.slane %v1044_v12, 1 }
  0x98   : > { %885 = vrot.lane.b32.xlu0 %v871_v63, %s1772_s29  ;;  %1705 = vmatmul.msk.bf16.vlgmr.msra.gmra.mxu2 %vm1057_vm7, %v1250_v54  ;;  %v1008_v63 = vor.u32 %v1007_v0, %v1003_v26  ;;  %v809_v26 = vshll.u32 %v1958_v60, 16  ;;  %v807_v0 = vshrl.u32 %v1958_v60, 16 }
  0x99   : > { %1746 = vmatpush.bf16.msra.mxu1 %v2233_v44 }
  0x9a   : > { %v2207_v14 = vpop.permute.xlu0 %657  ;;  %1417 = vmatpush.bf16.msrb.mxu0 %v2119_v27  ;;  %v811_v54 = vrot.slane %v809_v26, 1  ;;  %v804_v27 = vrot.slane %v802_v24, 1 }
  0x9b   : > { %925 = vrot.lane.b32.xlu2 %v911_v56, %s1771_s28  ;;  %v1043_v56 = vpack.c.b16 %v939_v51, %v1035_v25  ;;  %v557_v25 = vld [vmem:[#allocation2 + $0x30] sm:$0xe] }
  0x9c   : > { %887 = vrot.lane.b32.xlu1 %v872_v40, %s1772_s29  ;;  %v805_v6 = vor.u32 %v804_v27, %v800_v39  ;;  %v1037_v12 = vunpack.c.l.b16 %v557_v25 }
  0x9d   : > { %v2220_v57 = vpop.permute.xlu2 %917  ;;  %v1051_v32 = vrot.slane %v1043_v56, 1 }
  0x9e   : > { %v2224_v1 = vpop.permute.xlu1 %745  ;;  %1418 = vmatpush.bf16.msrb.mxu0 %v2135_v17 }
  0x9f   : > { %v1196_v43 = vunpack.c.l.b16 %v1051_v32  ;;  %v1761_v32 = vld [vmem:[#allocation2] sm:$0xf] }
  0xa0   : > { %927 = vrot.lane.b32.xlu0 %v912_v50, %s1771_s28  ;;  %v1199_v50 = vunpack.c.l.b16 %v1052_v30  ;;  %v1060_v30 = vsel %vm1057_vm7, %v1761_v32, %v2207_v14  ;;  %v814_v32 = vshrl.u32 %v2001_v45, 16 }
  0xa1   : > { %v1084_v28 = vsel %vm1082_vm8, %v1060_v30, %v2113_v2 }
  0xa2   : > { %v920_v34 = vpop.permute.xlu0 %919  ;;  %v1253_v51 = vpack.c.b16 %v1199_v50, %v1196_v43  ;;  %1419 = vmatpush.bf16.msrb.mxu0 %v2145_v15  ;;  %v1101_v39 = vsel %vm1099_vm9, %v1084_v28, %v2224_v1  ;;  %v788_v28 = vshll.u32 %v1916_v55, 16 }
  0xa3   : > { %1023 = vrot.lane.b32.xlu2 %v1008_v63, %s1773_s30  ;;  %v812_v63 = vor.u32 %v811_v54, %v807_v0 }
  0xa4   : > { %1021 = vrot.lane.b32.xlu1 %v1001_v4, %s1773_s30 }
  0xa5   : > { %v2245_v42 = vpop.permute.xlu2 %747 }
  0xa6   : > { %v710_v40 = vpop.permute.xlu1 %709  ;;  %1420 = vmatpush.bf16.msrb.mxu0 %v2167_v53 }
  0xa8   : > { %1706 = vmatmul.msk.bf16.gmra.mxu2 %vm1057_vm7, %v1253_v51 }
  0xaa   : > { %v878_v46 = vpop.permute.xlu0 %877  ;;  %1421 = vmatpush.bf16.msrb.mxu0 %v2180_v59 }
  0xab   : > { %v1124_v15 = vsel %vm1057_vm7, %v805_v6, %v878_v46  ;;  %v1045_v46 = vpack.c.b16 %v941_v36, %v1037_v12 }
  0xac   : > { %v1145_v56 = vsel %vm1082_vm8, %v1124_v15, %v2220_v57  ;;  %v823_v15 = vshll.u32 %v2029_v11, 16 }
  0xad   : > { %v1016_v58 = vpop.permute.xlu2 %1015  ;;  %v1053_v0 = vrot.slane %v1045_v46, 1 }
  0xae   : > { %v712_v18 = vpop.permute.xlu1 %711  ;;  %1422 = vmatpush.bf16.msrb.mxu0 %v2205_v48 }
  0xb2   : > { %v708_v16 = vpop.permute.xlu0 %707  ;;  %1423 = vmatpush.bf16.msrb.mxu0 %v2217_v8  ;;  %v1202_v8 = vunpack.c.l.b16 %v1053_v0 }
  0xb5   : > { %v2257_v20 = vpop.permute.xlu2 %713 }
  0xb6   : > { %v880_v5 = vpop.permute.xlu1 %879  ;;  %1424 = vmatpush.bf16.msrb.mxu0 %v2233_v44 }
  0xb7   : > { %v1127_v17 = vsel %vm1057_vm7, %v812_v63, %v880_v5  ;;  %v1188_v5 = vunpack.c.l.b16 %v1101_v39 }
  0xb8   : > { %v1147_v60 = vsel %vm1082_vm8, %v1127_v17, %v920_v34  ;;  %v1038_v34 = vunpack.c.l.b16 %v558_v35 }
  0xb9   : > { %v1163_v53 = vsel %vm1099_vm9, %v1147_v60, %v1016_v58 }
  0xba   : > { %v662_v4 = vpop.permute.xlu0 %661  ;;  %v1198_v43 = vunpack.c.l.b16 %v1163_v53  ;;  %v1046_v57 = vpack.c.b16 %v942_v7, %v1038_v34 }
  0xbb   : > { %v1066_v22 = vsel %vm1057_vm7, %v1924_v13, %v662_v4 }
  0xbc   : > { %v1088_v59 = vsel %vm1082_vm8, %v1066_v22, %v710_v40  ;;  %v1054_v54 = vrot.slane %v1046_v57, 1 }
  0xbd   : > { %v1105_v51 = vsel %vm1099_vm9, %v1088_v59, %v2148_v29  ;;  %v756_v24 = vpop.permute.xlu2 %755  ;;  %v825_v59 = vrot.slane %v823_v15, 1 }
  0xbe   : > { %v1014_v3 = vpop.permute.xlu1 %1013  ;;  %v1194_v7 = vunpack.c.l.b16 %v1105_v51 }
  0xbf   : > { %v1161_v13 = vsel %vm1099_vm9, %v1145_v56, %v1014_v3  ;;  %v816_v56 = vshll.u32 %v2001_v45, 16 }
  0xc0   : > { %v1195_v48 = vunpack.c.l.b16 %v1161_v13 }
  0xc1   : > { %v818_v30 = vrot.slane %v816_v56, 1 }
  0xc2   : > { %v664_v50 = vpop.permute.xlu0 %663  ;;  %v1252_v26 = vpack.c.b16 %v1198_v43, %v1195_v48 }
  0xc3   : > { %v1069_v40 = vsel %vm1057_vm7, %v1941_v37, %v664_v50  ;;  %v1205_v37 = vunpack.c.l.b16 %v1054_v54 }
  0xc4   : > { %v1090_v14 = vsel %vm1082_vm8, %v1069_v40, %v712_v18  ;;  %1430 = vmatmul.bf16.vlgmr.msra.gmra.mxu1 %v1252_v26  ;;  %v795_v40 = vshll.u32 %v2037_v19, 16  ;;  %v560_v26 = vld [vmem:[#allocation2 + $0x48] sm:$0xe] }
  0xc5   : > { %v1107_v31 = vsel %vm1099_vm9, %v1090_v14, %v2188_v23  ;;  %v1256_v18 = vpack.c.b16 %v1205_v37, %v1202_v8  ;;  %v922_v17 = vpop.permute.xlu2 %921  ;;  %v559_v14 = vld [vmem:[#allocation2 + $0x40] sm:$0xe]  ;;  %v1040_v54 = vunpack.c.l.b16 %v560_v26 }
  0xc6   : > { %v1197_v36 = vunpack.c.l.b16 %v1107_v31  ;;  %v660_v29 = vpop.permute.xlu1 %659  ;;  %v1039_v0 = vunpack.c.l.b16 %v559_v14 }
  0xc7   : > { %v1063_v27 = vsel %vm1057_vm7, %v1968_v10, %v660_v29  ;;  %1707 = vmatmul.msk.bf16.gmra.mxu2 %vm1057_vm7, %v1256_v18  ;;  %v1048_v18 = vpack.c.b16 %v944_v47, %v1040_v54 }
  0xc8   : > { %v1251_v58 = vpack.c.b16 %v1197_v36, %v1194_v7  ;;  %v1086_v2 = vsel %vm1082_vm8, %v1063_v27, %v708_v16  ;;  %v793_v7 = vshrl.u32 %v2037_v19, 16  ;;  %v797_v36 = vrot.slane %v795_v40, 1 }
  0xc9   : > { %v1103_v63 = vsel %vm1099_vm9, %v1086_v2, %v2245_v42 }
  0xca   : > { %1401 = vmatmul.bf16.vlgmr.msra.gmra.mxu3 %v1251_v58  ;;  %v666_v23 = vpop.permute.xlu0 %665  ;;  %v1191_v44 = vunpack.c.l.b16 %v1103_v63  ;;  %v1047_v58 = vpack.c.b16 %v943_v38, %v1039_v0  ;;  %v790_v63 = vrot.slane %v788_v28, 1 }
  0xcb   : > { %v1072_v16 = vsel %vm1057_vm7, %v1975_v21, %v666_v23  ;;  %v786_v23 = vshrl.u32 %v1916_v55, 16 }
  0xcc   : > { %v1248_v6 = vpack.c.b16 %v1191_v44, %v1188_v5  ;;  %v1092_v42 = vsel %vm1082_vm8, %v1072_v16, %v2257_v20  ;;  %v819_v20 = vor.u32 %v818_v30, %v814_v32  ;;  %v1055_v2 = vrot.slane %v1047_v58, 1 }
  0xcd   : > { %v1020_v25 = vpop.permute.xlu2 %1019  ;;  %v798_v5 = vor.u32 %v797_v36, %v793_v7  ;;  %v1056_v44 = vrot.slane %v1048_v18, 1 }
  0xce   : > { %1396 = vmatmul.bf16.vlgmr.msra.gmra.mxu0 %v1248_v6  ;;  %v668_v4 = vpop.permute.xlu1 %667  ;;  %v1208_v19 = vunpack.c.l.b16 %v1055_v2 }
  0xcf   : > { %v1075_v1 = vsel %vm1057_vm7, %v2005_v52, %v668_v4  ;;  %v821_v52 = vshrl.u32 %v2029_v11, 16  ;;  %v1211_v6 = vunpack.c.l.b16 %v1056_v44  ;;  %v791_v4 = vor.u32 %v790_v63, %v786_v23 }
  0xd1   : > { %v826_v13 = vor.u32 %v825_v59, %v821_v52  ;;  %v1259_v62 = vpack.c.b16 %v1211_v6, %v1208_v19 }
  0xd2   : > { %v716_v60 = vpop.permute.xlu0 %715 }
  0xd3   : > { %v1094_v10 = vsel %vm1082_vm8, %v1075_v1, %v716_v60 }
  0xd4   : > { %v1111_v22 = vsel %vm1099_vm9, %v1094_v10, %v756_v24 }
  0xd5   : > { %v1203_v3 = vunpack.c.l.b16 %v1111_v22  ;;  %v914_v46 = vpop.permute.xlu2 %913 }
  0xd6   : > { %v754_v53 = vpop.permute.xlu1 %753 }
  0xd7   : > { %v1109_v35 = vsel %vm1099_vm9, %v1092_v42, %v754_v53  ;;  %1708 = vmatmul.msk.bf16.gmra.mxu2 %vm1057_vm7, %v1259_v62 }
  0xd8   : > { %v1200_v12 = vunpack.c.l.b16 %v1109_v35 }
  0xda   : > { %v882_v34 = vpop.permute.xlu0 %881  ;;  %v1254_v21 = vpack.c.b16 %v1203_v3, %v1200_v12 }
  0xdb   : > { %v1130_v11 = vsel %vm1057_vm7, %v819_v20, %v882_v34  ;;  %v837_v34 = vshll.u32 %v2127_v9, 16  ;;  %v835_v20 = vshrl.u32 %v2127_v9, 16 }
  0xdc   : > { %1406 = vmatmul.bf16.gmra.mxu3 %v1254_v21  ;;  %v1149_v45 = vsel %vm1082_vm8, %v1130_v11, %v922_v17 }
  0xdd   : > { %v1012_v27 = vpop.permute.xlu2 %1011 }
  0xde   : > { %v884_v43 = vpop.permute.xlu1 %883 }
  0xdf   : > { %v1133_v48 = vsel %vm1057_vm7, %v826_v13, %v884_v43  ;;  %v830_v43 = vshll.u32 %v2102_v61, 16 }
  0xe1   : > { %v832_v40 = vrot.slane %v830_v43, 1 }
  0xe2   : > { %v924_v50 = vpop.permute.xlu0 %923 }
  0xe3   : > { %v1151_v57 = vsel %vm1082_vm8, %v1133_v48, %v924_v50 }
  0xe4   : > { %v1167_v51 = vsel %vm1099_vm9, %v1151_v57, %v1020_v25 }
  0xe5   : > { %v1204_v8 = vunpack.c.l.b16 %v1167_v51  ;;  %v718_v60 = vpop.permute.xlu2 %717 }
  0xe6   : > { %v1018_v24 = vpop.permute.xlu1 %1017 }
  0xe7   : > { %v1165_v31 = vsel %vm1099_vm9, %v1149_v45, %v1018_v24 }
  0xe8   : > { %v1201_v37 = vunpack.c.l.b16 %v1165_v31 }
  0xea   : > { %v874_v29 = vpop.permute.xlu0 %873  ;;  %v1255_v39 = vpack.c.b16 %v1204_v8, %v1201_v37 }
  0xeb   : > { %v1118_v47 = vsel %vm1057_vm7, %v791_v4, %v874_v29 }
  0xec   : > { %1435 = vmatmul.bf16.gmra.mxu1 %v1255_v39  ;;  %v1141_v10 = vsel %vm1082_vm8, %v1118_v47, %v914_v46 }
  0xed   : > { %v760_v56 = vpop.permute.xlu2 %759 }
  0xee   : > { %v876_v17 = vpop.permute.xlu1 %875 }
  0xef   : > { %v1121_v1 = vsel %vm1057_vm7, %v798_v5, %v876_v17 }
  0xf2   : > { %v916_v38 = vpop.permute.xlu0 %915 }
  0xf3   : > { %v1143_v33 = vsel %vm1082_vm8, %v1121_v1, %v916_v38 }
  0xf4   : > { %v1159_v55 = vsel %vm1099_vm9, %v1143_v33, %v1012_v27 }
  0xf5   : > { %v1192_v22 = vunpack.c.l.b16 %v1159_v55  ;;  %v926_v57 = vpop.permute.xlu2 %925 }
  0xf6   : > { %v1010_v16 = vpop.permute.xlu1 %1009 }
  0xf7   : > { %v1157_v15 = vsel %vm1099_vm9, %v1141_v10, %v1010_v16 }
  0xf8   : > { %v1189_v42 = vunpack.c.l.b16 %v1157_v15 }
  0xfa   : > { %v670_v53 = vpop.permute.xlu0 %669  ;;  %v1249_v25 = vpack.c.b16 %v1192_v22, %v1189_v42 }
  0xfb   : > { %v1078_v12 = vsel %vm1057_vm7, %v2077_v41, %v670_v53  ;;  %v828_v41 = vshrl.u32 %v2102_v61, 16 }
  0xfc   : > { %1425 = vmatmul.bf16.vlgmr.msrb.gmra.mxu0 %v1249_v25  ;;  %v1096_v32 = vsel %vm1082_vm8, %v1078_v12, %v718_v60 }
  0xfd   : > { %v833_v26 = vor.u32 %v832_v40, %v828_v41  ;;  %v1024_v54 = vpop.permute.xlu2 %1023 }
  0xfe   : > { %v672_v35 = vpop.permute.xlu1 %671 }
  0xff   : > { %v1081_v52 = vsel %vm1057_vm7, %v2104_v49, %v672_v35  ;;  %v839_v49 = vrot.slane %v837_v34, 1 }
 0x101   : > { %v840_v51 = vor.u32 %v839_v49, %v835_v20 }
 0x102   : > { %v720_v59 = vpop.permute.xlu0 %719 }
 0x103   : > { %v1098_v3 = vsel %vm1082_vm8, %v1081_v52, %v720_v59 }
 0x104   : > { %v1115_v21 = vsel %vm1099_vm9, %v1098_v3, %v760_v56 }
 0x105   : > { %v1209_v48 = vunpack.c.l.b16 %v1115_v21 }
 0x106   : > { %v758_v30 = vpop.permute.xlu1 %757 }
 0x107   : > { %v1113_v13 = vsel %vm1099_vm9, %v1096_v32, %v758_v30 }
 0x108   : > { %v1206_v50 = vunpack.c.l.b16 %v1113_v13 }
 0x10a   : > { %v886_v46 = vpop.permute.xlu0 %885  ;;  %v1257_v11 = vpack.c.b16 %v1209_v48, %v1206_v50 }
 0x10b   : > { %v1136_v9 = vsel %vm1057_vm7, %v833_v26, %v886_v46 }
 0x10c   : > { %1411 = vmatmul.bf16.gmra.mxu3 %v1257_v11  ;;  %v1153_v31 = vsel %vm1082_vm8, %v1136_v9, %v926_v57 }
 0x10e   : > { %v888_v14 = vpop.permute.xlu1 %887 }
 0x10f   : > { %v1139_v45 = vsel %vm1057_vm7, %v840_v51, %v888_v14 }
 0x112   : > { %v928_v24 = vpop.permute.xlu0 %927 }
 0x113   : > { %v1155_v0 = vsel %vm1082_vm8, %v1139_v45, %v928_v24 }
 0x114   : > { %v1171_v28 = vsel %vm1099_vm9, %v1155_v0, %v1024_v54 }
 0x115   : > { %v1210_v36 = vunpack.c.l.b16 %v1171_v28 }
 0x116   : > { %v1022_v7 = vpop.permute.xlu1 %1021 }
 0x117   : > { %v1169_v61 = vsel %vm1099_vm9, %v1153_v31, %v1022_v7 }
 0x118   : > { %v1207_v8 = vunpack.c.l.b16 %v1169_v61 }
 0x11a   : > { %v1258_v37 = vpack.c.b16 %v1210_v36, %v1207_v8 }
 0x11b   : > { %v1455_v29 = vpop.f32.mrf.mxu2 }
 0x11c   : > { %1440 = vmatmul.bf16.gmra.mxu1 %v1258_v37 }
 0x123   : > { %v1457_v58 = vpop.f32.mrf.mxu2 }
 0x12b   : > { %v1460_v18 = vpop.f32.mrf.mxu2 }
 0x133   : > { %v1462_v63 = vpop.f32.mrf.mxu2 }
 0x141   : > { %v1431_v39 = vpop.f32.mrf.mxu1 }
 0x149   : > { %v1433_v5 = vpop.f32.mrf.mxu1 }
 0x14a   : > { %v1465_v4 = vpop.f32.mrf.mxu2 }
 0x14b   : > { %v1397_v17 = vpop.f32.mrf.mxu0 }
 0x14d   : > { %v1402_v27 = vpop.f32.mrf.mxu3 }
 0x14e   : > { %v1432_v2 = vadd.f32 %v1431_v39, %v1402_v27 }
 0x150   : > { %v1461_v23 = vadd.f32 %v1460_v18, %v1432_v2 }
 0x152   : > { %1531 = vst.msk [vmem:[%s2352_s25 + $0x10] sm:$0xff] %vm1057_vm7, %v1461_v23  ;;  %v1467_v60 = vpop.f32.mrf.mxu2  ;;  %v1498_v59 = vmul.f32 %v1461_v23, %v1461_v23  ;;  %v1478_v32 = vsel %vm1057_vm7, %v1461_v23, 0.0 }
 0x153   : > { %v1399_v47 = vpop.f32.mrf.mxu0 }
 0x154   : > { %v1507_v48 = vsel %vm1057_vm7, %v1498_v59, 0.0 }
 0x155   : > { %v1404_v44 = vpop.f32.mrf.mxu3 }
 0x156   : > { %v1434_v19 = vadd.f32 %v1433_v5, %v1404_v44 }
 0x158   : > { %v1463_v6 = vadd.f32 %v1462_v63, %v1434_v19 }
 0x15a   : > { %1532 = vst.msk [vmem:[%s2352_s25 + $0x18] sm:$0xff] %vm1057_vm7, %v1463_v6  ;;  %v1499_v30 = vmul.f32 %v1463_v6, %v1463_v6  ;;  %v1480_v50 = vsel %vm1057_vm7, %v1463_v6, 0.0  ;;  %v1470_v51 = vpop.f32.mrf.mxu2 }
 0x15c   : > { %v1509_v11 = vsel %vm1057_vm7, %v1499_v30, 0.0 }
 0x15f   : > { %v1407_v1 = vpop.f32.mrf.mxu3 }
 0x162   : > { %v1472_v18 = vpop.f32.mrf.mxu2 }
 0x167   : > { %v1409_v55 = vpop.f32.mrf.mxu3 }
 0x169   : > { %v1436_v62 = vpop.f32.mrf.mxu1 }
 0x16a   : > { %v1437_v38 = vadd.f32 %v1436_v62, %v1407_v1 }
 0x16c   : > { %v1466_v33 = vadd.f32 %v1465_v4, %v1437_v38 }
 0x16e   : > { %1533 = vst.msk [vmem:[%s2352_s25 + $0x20] sm:$0xff] %vm1057_vm7, %v1466_v33  ;;  %v1500_v45 = vmul.f32 %v1466_v33, %v1466_v33  ;;  %v1482_v0 = vsel %vm1057_vm7, %v1466_v33, 0.0 }
 0x170   : > { %v1511_v9 = vsel %vm1057_vm7, %v1500_v45, 0.0 }
 0x171   : > { %v1438_v10 = vpop.f32.mrf.mxu1 }
 0x172   : > { %v1439_v16 = vadd.f32 %v1438_v10, %v1409_v55 }
 0x174   : > { %v1468_v15 = vadd.f32 %v1467_v60, %v1439_v16 }
 0x176   : > { %1534 = vst.msk [vmem:[%s2352_s25 + $0x28] sm:$0xff] %vm1057_vm7, %v1468_v15  ;;  %v1501_v28 = vmul.f32 %v1468_v15, %v1468_v15  ;;  %v1484_v8 = vsel %vm1057_vm7, %v1468_v15, 0.0 }
 0x178   : > { %v1513_v39 = vsel %vm1057_vm7, %v1501_v28, 0.0 }
 0x179   : > { %v1426_v22 = vpop.f32.mrf.mxu0 }
 0x17a   : > { %v1427_v42 = vadd.f32 %v1426_v22, %v1397_v17 }
 0x17c   : > { %v1456_v53 = vadd.f32 %v1455_v29, %v1427_v42 }
 0x17e   : > { %1529 = vst.msk [vmem:[%s2352_s25] sm:$0xff] %vm1057_vm7, %v1456_v53  ;;  %v1496_v56 = vmul.f32 %v1456_v53, %v1456_v53  ;;  %v1475_v3 = vsel %vm1057_vm7, %v1456_v53, 0.0 }
 0x180   : > { %v1504_v13 = vsel %vm1057_vm7, %v1496_v56, 0.0 }
 0x181   : > { %v1428_v25 = vpop.f32.mrf.mxu0 }
 0x182   : > { %v1429_v35 = vadd.f32 %v1428_v25, %v1399_v47 }
 0x184   : > { %v1458_v52 = vadd.f32 %v1457_v58, %v1429_v35 }
 0x186   : > { %v1476_v12 = vsel %vm1057_vm7, %v1458_v52, 0.0  ;;  %v1497_v34 = vmul.f32 %v1458_v52, %v1458_v52  ;;  %1530 = vst.msk [vmem:[%s2352_s25 + $0x8] sm:$0xff] %vm1057_vm7, %v1458_v52 }
 0x187   : > { %v1477_v21 = vadd.f32 %v1476_v12, %v1475_v3 }
 0x188   : > { %v1505_v43 = vsel %vm1057_vm7, %v1497_v34, 0.0 }
 0x189   : > { %v1479_v20 = vadd.f32 %v1478_v32, %v1477_v21  ;;  %v1506_v49 = vadd.f32 %v1505_v43, %v1504_v13 }
 0x18b   : > { %v1481_v46 = vadd.f32 %v1480_v50, %v1479_v20  ;;  %v1508_v57 = vadd.f32 %v1507_v48, %v1506_v49 }
 0x18d   : > { %v1510_v41 = vadd.f32 %v1509_v11, %v1508_v57  ;;  %v1483_v54 = vadd.f32 %v1482_v0, %v1481_v46 }
 0x18f   : > { %v1412_v40 = vpop.f32.mrf.mxu3  ;;  %v1512_v61 = vadd.f32 %v1511_v9, %v1510_v41  ;;  %v1485_v58 = vadd.f32 %v1484_v8, %v1483_v54 }
 0x191   : > { %v1514_v63 = vadd.f32 %v1513_v39, %v1512_v61 }
 0x197   : > { %v1414_v7 = vpop.f32.mrf.mxu3 }
 0x199   : > { %v1441_v14 = vpop.f32.mrf.mxu1 }
 0x19a   : > { %v1442_v26 = vadd.f32 %v1441_v14, %v1412_v40 }
 0x19c   : > { %v1471_v24 = vadd.f32 %v1470_v51, %v1442_v26 }
 0x19e   : > { %1535 = vst.msk [vmem:[%s2352_s25 + $0x30] sm:$0xff] %vm1057_vm7, %v1471_v24  ;;  %v1502_v31 = vmul.f32 %v1471_v24, %v1471_v24  ;;  %v1486_v37 = vsel %vm1057_vm7, %v1471_v24, 0.0 }
 0x19f   : > { %v1487_v23 = vadd.f32 %v1486_v37, %v1485_v58 }
 0x1a0   : > { %v1515_v27 = vsel %vm1057_vm7, %v1502_v31, 0.0 }
 0x1a1   : > { %v1443_v36 = vpop.f32.mrf.mxu1  ;;  %v1516_v19 = vadd.f32 %v1515_v27, %v1514_v63 }
 0x1a2   : > { %v1444_v29 = vadd.f32 %v1443_v36, %v1414_v7 }
 0x1a4   : > { %v1473_v2 = vadd.f32 %v1472_v18, %v1444_v29 }
 0x1a6   : > { %v1488_v5 = vsel %vm1057_vm7, %v1473_v2, 0.0  ;;  %v1503_v44 = vmul.f32 %v1473_v2, %v1473_v2  ;;  %1536 = vst.msk [vmem:[%s2352_s25 + $0x38] sm:$0xff] %vm1057_vm7, %v1473_v2 }
 0x1a7   : > { %v1489_v6 = vadd.f32 %v1488_v5, %v1487_v23 }
 0x1a8   : > { %v1517_v17 = vsel %vm1057_vm7, %v1503_v44, 0.0 }
 0x1a9   : > { %v1490_v4 = vrot.slane %v1489_v6, 4  ;;  %v1518_v1 = vadd.f32 %v1517_v17, %v1516_v19 }
 0x1ab   : > { %v1491_v62 = vadd.f32 %v1490_v4, %v1489_v6  ;;  %v1519_v38 = vrot.slane %v1518_v1, 4 }
 0x1ad   : > { %v1492_v33 = vrot.slane %v1491_v62, 2  ;;  %v1520_v47 = vadd.f32 %v1519_v38, %v1518_v1 }
 0x1af   : > { %v1493_v60 = vadd.f32 %v1492_v33, %v1491_v62  ;;  %v1521_v55 = vrot.slane %v1520_v47, 2 }
 0x1b1   : > { %v1494_v10 = vrot.slane %v1493_v60, 1  ;;  %v1522_v16 = vadd.f32 %v1521_v55, %v1520_v47 }
 0x1b3   : > { %v1523_v15 = vrot.slane %v1522_v16, 1  ;;  %v1495_v22 = vadd.f32 %v1494_v10, %v1493_v60 }
 0x1b5   : > { %v1524_v42 = vadd.f32 %v1523_v15, %v1522_v16 }
 0x1b7   : > { %v1526_v53 = vsel %vm1525_vm10, %v1495_v22, %v1524_v42 }
 0x1b8   : > { %1528 = vst.msk [vmem:[%s235_s6] sm:$0x3] %vm1527_vm11, %v1526_v53 }
 0x1b9 PF: > { %s16_s18 = sadd.s32 1, %s1768_s18  }
 0x1ba   : > { %p13_p4 = scmp.ge.s32.totalorder %s16_s18, 4  }
 0x1bc   :  { %15 = sbr.rel (!%p13_p4) target bundleno = 1 (0x1), region = 81 }

</bundles_post_ra>
